<compile_context>
chip_gen: v5e
topology: v5e:2x2
jax: 0.10.0
libtpu: 0.0.40
codegen_flags: <defaults>
</compile_context>

<pallas_src>
import jax
import jax.numpy as jnp
from jax.experimental import pallas as pl
from jax.experimental.pallas import tpu as pltpu


_VMEM = pl.BlockSpec(memory_space=pltpu.MemorySpace.VMEM)
_SMEM = pl.BlockSpec(memory_space=pltpu.MemorySpace.SMEM)


# ----------------------------- fused kernel ----------------------------------
def make_fused_kernel(T, H, num_layers):
    """Fused Brain_GNN forward kernel (closure over static sizes)."""

    def kernel(gir_ref, giz_ref, gin_ref, a_ref, p_ref,
               whr_ref, whz_ref, whn_ref, bhr_ref, bhz_ref, bhn_ref,
               alpha_ref, *rest):
        # rest = [W_0, b_0, ..., W_{L-1}, b_{L-1}, node_out_ref, graph_out_ref]
        w_refs = rest[:2 * num_layers]
        node_out_ref = rest[2 * num_layers]
        graph_out_ref = rest[2 * num_layers + 1]

        whr = whr_ref[...]                  # (H, H) recurrent weights, per gate
        whz = whz_ref[...]
        whn = whn_ref[...]
        bhr = bhr_ref[...]                  # (1, H) recurrent biases, per gate
        bhz = bhz_ref[...]
        bhn = bhn_ref[...]

        N = gir_ref.shape[1]

        # ---- GRU (input_size=1), h0 = 0 --------------------------------------
        # gi_* are the per-gate input terms (x_t * W_i* + b_i*), precomputed
        # T-major in the wrapper.  The length-freeze is folded into gi_z
        # (z == 1 exactly for frozen steps), so the update below is a no-op for
        # frozen rows with no extra mask blend on the serial chain.
        h = jnp.zeros((N, H), jnp.float32)
        for t in range(T):                  # static unroll, T fixed & small
            ghr = jnp.dot(h, whr, preferred_element_type=jnp.float32) + bhr
            ghz = jnp.dot(h, whz, preferred_element_type=jnp.float32) + bhz
            ghn = jnp.dot(h, whn, preferred_element_type=jnp.float32) + bhn
            r = jax.nn.sigmoid(gir_ref[t] + ghr)
            z = jax.nn.sigmoid(giz_ref[t] + ghz)
            n = jnp.tanh(gin_ref[t] + r * ghn)
            h = h + (1.0 - z) * (n - h)     # fused update

        # ---- GCN stack: h = PReLU(A_norm @ (h @ W) + b), dropout = identity --
        A = a_ref[...]                      # (N, N) bf16, loaded once, reused
        for i in range(num_layers):
            W = w_refs[2 * i][...]          # (d_in, d_out) bf16
            b = w_refs[2 * i + 1][...]      # (1, d_out) f32
            hw = jnp.dot(h.astype(jnp.bfloat16), W,
                         preferred_element_type=jnp.float32)
            y = jnp.dot(A, hw.astype(jnp.bfloat16),
                        preferred_element_type=jnp.float32) + b
            alpha = alpha_ref[i]            # scalar PReLU slope from SMEM
            h = jnp.where(y >= 0.0, y, alpha * y)

        # ---- outputs: JK='last' node embeddings + global mean pool ----------
        node_out_ref[...] = h
        graph_out_ref[...] = jnp.dot(p_ref[...], h,
                                     preferred_element_type=jnp.float32)

    return kernel


# -------------------------- glue (plain JAX) ---------------------------------
def gcn_norm_dense(edge_index, edge_weight, num_nodes):
    """Dense normalized adjacency matching PyG GCNConv defaults
    (add_remaining_self_loops with fill 1, symmetric normalization)."""
    src, dst = edge_index[0], edge_index[1]
    w = edge_weight.astype(jnp.float32)
    # only add a weight-1 self loop to nodes that do not already have one
    has_loop = jnp.zeros((num_nodes,), jnp.float32).at[src].add(
        jnp.where(src == dst, 1.0, 0.0))
    loop_w = jnp.where(has_loop > 0, 0.0, 1.0)
    loop = jnp.arange(num_nodes, dtype=src.dtype)
    src = jnp.concatenate([src, loop])
    dst = jnp.concatenate([dst, loop])
    w = jnp.concatenate([w, loop_w])
    deg = jnp.zeros((num_nodes,), jnp.float32).at[dst].add(w)
    dinv = jnp.where(deg > 0, jax.lax.rsqrt(deg), 0.0)
    norm = dinv[src] * w * dinv[dst]
    return jnp.zeros((num_nodes, num_nodes), jnp.float32).at[dst, src].add(norm)


def brain_gnn_forward(params, x, edge_index, edge_attr, lengths, batch):
    N, T = x.shape
    G = int(lengths.shape[0])
    split_size = N // G
    # TODO(synk): split_size = N // G assumes equal-size graphs (matches
    # torch.split in the reference forward); unequal graphs would need
    # per-node lengths derived from `batch`.
    node_lens = jnp.repeat(lengths.astype(jnp.int32), split_size)
    active = node_lens[:, None] > jnp.arange(T, dtype=jnp.int32)[None, :]  # (N,T)

    a_norm = gcn_norm_dense(edge_index, edge_attr, N)

    # global mean pool as a dense (G, N) matmul
    onehot = (batch[None, :] == jnp.arange(G)[:, None]).astype(jnp.float32)
    counts = jnp.sum(onehot, axis=1, keepdims=True)
    P = onehot / jnp.maximum(counts, 1.0)

    w_ih, w_hh, b_ih, b_hh = params["gru"]
    H = w_hh.shape[1]
    L = len(params["gcn"])
    d_last = params["gcn"][-1][0].shape[1]

    # ---- GRU input-gate precompute, T-major, split per gate ------------------
    # gi[t] = x[:, t, None] * W_ih + b_ih  (input_size = 1)
    xt = x.T.astype(jnp.float32)                                        # (T, N)
    gi = xt[:, :, None] * w_ih.reshape(1, 1, 3 * H).astype(jnp.float32) \
        + b_ih.reshape(1, 1, 3 * H).astype(jnp.float32)                 # (T,N,3H)
    gi_r = gi[:, :, :H]
    gi_z = gi[:, :, H:2 * H]
    gi_n = gi[:, :, 2 * H:]
    # Fold the sequence-length freeze into the z gate: for t >= node length set
    # the z pre-activation to +1e4 so sigmoid == 1.0 exactly in f32 and the GRU
    # update h += (1-z)*(n-h) leaves h bitwise unchanged.
    gi_z = jnp.where(active.T[:, :, None], gi_z, jnp.float32(1e4))

    # recurrent weights/biases split per gate (lane-aligned in the kernel)
    whhT = w_hh.T.astype(jnp.float32)                                   # (H, 3H)
    whr, whz, whn = whhT[:, :H], whhT[:, H:2 * H], whhT[:, 2 * H:]
    bhh = b_hh.reshape(1, -1).astype(jnp.float32)
    bhr, bhz, bhn = bhh[:, :H], bhh[:, H:2 * H], bhh[:, 2 * H:]

    alphas = jnp.stack([jnp.asarray(a, jnp.float32).reshape(())
                        for (_, _, a) in params["gcn"]])
    gcn_args = []
    for (W, b, _) in params["gcn"]:
        gcn_args += [W.astype(jnp.bfloat16),                 # bf16 MXU inputs
                     b.reshape(1, -1).astype(jnp.float32)]

    kernel = make_fused_kernel(T, H, L)
    node_emb, graph_emb = pl.pallas_call(
        kernel,
        out_shape=(jax.ShapeDtypeStruct((N, d_last), jnp.float32),
                   jax.ShapeDtypeStruct((G, d_last), jnp.float32)),
        in_specs=[_VMEM] * 11 + [_SMEM] + [_VMEM] * (2 * L),
        out_specs=(_VMEM, _VMEM),
        # default scoped VMEM is ample; do NOT pin 64 MiB (== all of v7x VMEM)
    )(
        gi_r, gi_z, gi_n,
        a_norm.astype(jnp.bfloat16),
        P,
        whr, whz, whn, bhr, bhz, bhn,
        alphas,
        *gcn_args,
    )
    return node_emb, graph_emb


# -------------------------- pure-JAX reference --------------------------------
def brain_gnn_reference(params, x, edge_index, edge_attr, lengths, batch,
                        mxu_bf16=False):
    hi = jax.lax.Precision.HIGHEST
    N, T = x.shape
    G = int(lengths.shape[0])
    node_lens = jnp.repeat(lengths.astype(jnp.int32), N // G)
    w_ih, w_hh, b_ih, b_hh = params["gru"]
    H = w_hh.shape[1]
    wih, whhT = w_ih.reshape(1, -1), w_hh.T
    bih, bhh = b_ih.reshape(1, -1), b_hh.reshape(1, -1)
    h = jnp.zeros((N, H), jnp.float32)
    for t in range(T):
        gi = x[:, t:t + 1] * wih + bih
        gh = jnp.dot(h, whhT, precision=hi) + bhh
        r = jax.nn.sigmoid(gi[:, :H] + gh[:, :H])
        z = jax.nn.sigmoid(gi[:, H:2 * H] + gh[:, H:2 * H])
        n = jnp.tanh(gi[:, 2 * H:] + r * gh[:, 2 * H:])
        h_new = (1.0 - z) * n + z * h
        act = (node_lens[:, None] > t).astype(jnp.float32)
        h = act * h_new + (1.0 - act) * h
    A = gcn_norm_dense(edge_index, edge_attr, N)
    for (W, b, alpha) in params["gcn"]:
        if mxu_bf16:
            hw = jnp.dot(h.astype(jnp.bfloat16), W.astype(jnp.bfloat16),
                         preferred_element_type=jnp.float32)
            y = jnp.dot(A.astype(jnp.bfloat16), hw.astype(jnp.bfloat16),
                        preferred_element_type=jnp.float32) + b.reshape(1, -1)
        else:
            y = jnp.dot(A, jnp.dot(h, W, precision=hi),
                        precision=hi) + b.reshape(1, -1)
        h = jnp.where(y >= 0.0, y, alpha * y)
    onehot = (batch[None, :] == jnp.arange(G)[:, None]).astype(jnp.float32)
    P = onehot / jnp.maximum(onehot.sum(1, keepdims=True), 1.0)
    return h, jnp.dot(P, h, precision=hi)


def init_params(key, input_dim, hidden_dim_list):
    ks = jax.random.split(key, 8 + 2 * len(hidden_dim_list))
    H = input_dim
    gru = (
        0.1 * jax.random.normal(ks[0], (3 * H,), jnp.float32),    # W_ih (3H, 1)
        0.1 * jax.random.normal(ks[1], (3 * H, H), jnp.float32),  # W_hh
        0.1 * jax.random.normal(ks[2], (3 * H,), jnp.float32),    # b_ih
        0.1 * jax.random.normal(ks[3], (3 * H,), jnp.float32),    # b_hh
    )
    gcn = []
    d_in = input_dim
    for i, d_out in enumerate(hidden_dim_list):
        W = 0.2 * jax.random.normal(ks[4 + 2 * i], (d_in, d_out), jnp.float32)
        b = 0.05 * jax.random.normal(ks[5 + 2 * i], (d_out,), jnp.float32)
        alpha = jnp.array(0.25, jnp.float32)                      # PReLU default
        gcn.append((W, b, alpha))
        d_in = d_out
    # TODO(synk): projection_head exists in __init__ but is never used in forward.
    return {"gru": gru, "gcn": gcn}


if __name__ == "__main__":
    key = jax.random.PRNGKey(0)
    k_x, k_w, k_p = jax.random.split(key, 3)

    input_dim = 16                       # GRU hidden size == input_dim
    hidden_dim_list = [32, 32, 32, 32]   # g_num_layers = 4
    G = 2                                # graphs in the batch
    nodes_per_graph = 8
    N = G * nodes_per_graph
    T = 12                               # max time-series length

    # node time-series (PyTorch x: [N, T], then unsqueeze(-1) -> GRU input_size=1)
    x = jax.random.normal(k_x, (N, T), jnp.float32)
    lengths = jnp.array([12, 9], jnp.int32)
    batch = jnp.repeat(jnp.arange(G, dtype=jnp.int32), nodes_per_graph)

    # bidirectional ring edges within each graph (global node indexing)
    srcs, dsts = [], []
    for g in range(G):
        base = g * nodes_per_graph
        for j in range(nodes_per_graph):
            a = base + j
            b = base + (j + 1) % nodes_per_graph
            srcs += [a, b]
            dsts += [b, a]
    edge_index = jnp.array([srcs, dsts], jnp.int32)
    edge_attr = 0.5 + jnp.abs(jax.random.normal(k_w, (edge_index.shape[1],),
                                                jnp.float32))

    params = init_params(k_p, input_dim, hidden_dim_list)

    fwd = jax.jit(brain_gnn_forward)
    node_emb, graph_emb = fwd(params, x, edge_index, edge_attr, lengths, batch)
    jax.block_until_ready((node_emb, graph_emb))

    assert node_emb.shape == (N, hidden_dim_list[-1])
    assert graph_emb.shape == (G, hidden_dim_list[-1])

    # 1) tight check against a reference with matching bf16-MXU numerics
    ref_node_b, ref_graph_b = brain_gnn_reference(
        params, x, edge_index, edge_attr, lengths, batch, mxu_bf16=True)
    assert jnp.allclose(node_emb, ref_node_b, atol=5e-3, rtol=5e-3)
    assert jnp.allclose(graph_emb, ref_graph_b, atol=5e-3, rtol=5e-3)

    # 2) looser check against the full-f32 reference (delta is bf16 dot inputs)
    ref_node, ref_graph = brain_gnn_reference(
        params, x, edge_index, edge_attr, lengths, batch, mxu_bf16=False)
    assert jnp.allclose(node_emb, ref_node, atol=2e-2, rtol=2e-2)
    assert jnp.allclose(graph_emb, ref_graph, atol=2e-2, rtol=2e-2)

    print("KERNEL_OK")
</pallas_src>

<mosaic_0001>
module attributes {stable_mosaic.version = 11 : i64} {
  func.func @kernel(%arg0: memref<12x16x16xf32, #tpu.memory_space<vmem>>, %arg1: memref<12x16x16xf32, #tpu.memory_space<vmem>>, %arg2: memref<12x16x16xf32, #tpu.memory_space<vmem>>, %arg3: memref<16x16xbf16, #tpu.memory_space<vmem>>, %arg4: memref<2x16xf32, #tpu.memory_space<vmem>>, %arg5: memref<16x16xf32, #tpu.memory_space<vmem>>, %arg6: memref<16x16xf32, #tpu.memory_space<vmem>>, %arg7: memref<16x16xf32, #tpu.memory_space<vmem>>, %arg8: memref<1x16xf32, #tpu.memory_space<vmem>>, %arg9: memref<1x16xf32, #tpu.memory_space<vmem>>, %arg10: memref<1x16xf32, #tpu.memory_space<vmem>>, %arg11: memref<4xf32, #tpu.memory_space<smem>>, %arg12: memref<16x32xbf16, #tpu.memory_space<vmem>>, %arg13: memref<1x32xf32, #tpu.memory_space<vmem>>, %arg14: memref<32x32xbf16, #tpu.memory_space<vmem>>, %arg15: memref<1x32xf32, #tpu.memory_space<vmem>>, %arg16: memref<32x32xbf16, #tpu.memory_space<vmem>>, %arg17: memref<1x32xf32, #tpu.memory_space<vmem>>, %arg18: memref<32x32xbf16, #tpu.memory_space<vmem>>, %arg19: memref<1x32xf32, #tpu.memory_space<vmem>>, %arg20: memref<16x32xf32, #tpu.memory_space<vmem>>, %arg21: memref<2x32xf32, #tpu.memory_space<vmem>>) attributes {dimension_semantics = [], scalar_prefetch = 0 : i64, scratch_operands = 0 : i64, tpu.core_type = #tpu.core_type<tc>} {
    %c0 = arith.constant 0 : index
    %c0_0 = arith.constant 0 : index
    %0 = vector.load %arg5[%c0, %c0_0] : memref<16x16xf32, #tpu.memory_space<vmem>>, vector<16x16xf32>
    %c0_1 = arith.constant 0 : index
    %c0_2 = arith.constant 0 : index
    %1 = vector.load %arg6[%c0_1, %c0_2] : memref<16x16xf32, #tpu.memory_space<vmem>>, vector<16x16xf32>
    %c0_3 = arith.constant 0 : index
    %c0_4 = arith.constant 0 : index
    %2 = vector.load %arg7[%c0_3, %c0_4] : memref<16x16xf32, #tpu.memory_space<vmem>>, vector<16x16xf32>
    %c0_5 = arith.constant 0 : index
    %c0_6 = arith.constant 0 : index
    %3 = vector.load %arg8[%c0_5, %c0_6] : memref<1x16xf32, #tpu.memory_space<vmem>>, vector<1x16xf32>
    %c0_7 = arith.constant 0 : index
    %c0_8 = arith.constant 0 : index
    %4 = vector.load %arg9[%c0_7, %c0_8] : memref<1x16xf32, #tpu.memory_space<vmem>>, vector<1x16xf32>
    %c0_9 = arith.constant 0 : index
    %c0_10 = arith.constant 0 : index
    %5 = vector.load %arg10[%c0_9, %c0_10] : memref<1x16xf32, #tpu.memory_space<vmem>>, vector<1x16xf32>
    %cst = arith.constant 0.000000e+00 : f32
    %6 = vector.broadcast %cst : f32 to vector<16x16xf32>
    %cst_11 = arith.constant dense<0.000000e+00> : vector<16x16xf32>
    %7 = tpu.matmul %6, %0, %cst_11 {dimension_numbers = #tpu.dot_dimension_numbers<[1], [0], [0], [1], [0, 0, 1, 1], [], []>} : vector<16x16xf32>, vector<16x16xf32>, vector<16x16xf32> -> vector<16x16xf32>
    %8 = vector.broadcast %3 : vector<1x16xf32> to vector<16x16xf32>
    %9 = arith.addf %7, %8 : vector<16x16xf32>
    %cst_12 = arith.constant dense<0.000000e+00> : vector<16x16xf32>
    %10 = tpu.matmul %6, %1, %cst_12 {dimension_numbers = #tpu.dot_dimension_numbers<[1], [0], [0], [1], [0, 0, 1, 1], [], []>} : vector<16x16xf32>, vector<16x16xf32>, vector<16x16xf32> -> vector<16x16xf32>
    %11 = vector.broadcast %4 : vector<1x16xf32> to vector<16x16xf32>
    %12 = arith.addf %10, %11 : vector<16x16xf32>
    %cst_13 = arith.constant dense<0.000000e+00> : vector<16x16xf32>
    %13 = tpu.matmul %6, %2, %cst_13 {dimension_numbers = #tpu.dot_dimension_numbers<[1], [0], [0], [1], [0, 0, 1, 1], [], []>} : vector<16x16xf32>, vector<16x16xf32>, vector<16x16xf32> -> vector<16x16xf32>
    %14 = vector.broadcast %5 : vector<1x16xf32> to vector<16x16xf32>
    %15 = arith.addf %13, %14 : vector<16x16xf32>
    %c0_14 = arith.constant 0 : index
    %c0_15 = arith.constant 0 : index
    %c0_16 = arith.constant 0 : index
    %16 = vector.load %arg0[%c0_14, %c0_15, %c0_16] : memref<12x16x16xf32, #tpu.memory_space<vmem>>, vector<1x16x16xf32>
    %17 = vector.shape_cast %16 : vector<1x16x16xf32> to vector<16x16xf32>
    %18 = arith.addf %17, %9 : vector<16x16xf32>
    %19 = arith.negf %18 : vector<16x16xf32>
    %20 = math.exp %19 : vector<16x16xf32>
    %cst_17 = arith.constant 1.000000e+00 : f32
    %21 = vector.broadcast %cst_17 : f32 to vector<16x16xf32>
    %22 = arith.addf %21, %20 : vector<16x16xf32>
    %23 = arith.divf %21, %22 : vector<16x16xf32>
    %c0_18 = arith.constant 0 : index
    %c0_19 = arith.constant 0 : index
    %c0_20 = arith.constant 0 : index
    %24 = vector.load %arg1[%c0_18, %c0_19, %c0_20] : memref<12x16x16xf32, #tpu.memory_space<vmem>>, vector<1x16x16xf32>
    %25 = vector.shape_cast %24 : vector<1x16x16xf32> to vector<16x16xf32>
    %26 = arith.addf %25, %12 : vector<16x16xf32>
    %27 = arith.negf %26 : vector<16x16xf32>
    %28 = math.exp %27 : vector<16x16xf32>
    %cst_21 = arith.constant 1.000000e+00 : f32
    %29 = vector.broadcast %cst_21 : f32 to vector<16x16xf32>
    %30 = arith.addf %29, %28 : vector<16x16xf32>
    %31 = arith.divf %29, %30 : vector<16x16xf32>
    %c0_22 = arith.constant 0 : index
    %c0_23 = arith.constant 0 : index
    %c0_24 = arith.constant 0 : index
    %32 = vector.load %arg2[%c0_22, %c0_23, %c0_24] : memref<12x16x16xf32, #tpu.memory_space<vmem>>, vector<1x16x16xf32>
    %33 = vector.shape_cast %32 : vector<1x16x16xf32> to vector<16x16xf32>
    %34 = arith.mulf %23, %15 : vector<16x16xf32>
    %35 = arith.addf %33, %34 : vector<16x16xf32>
    %36 = math.tanh %35 : vector<16x16xf32>
    %cst_25 = arith.constant 1.000000e+00 : f32
    %37 = vector.broadcast %cst_25 : f32 to vector<16x16xf32>
    %38 = arith.subf %37, %31 : vector<16x16xf32>
    %39 = arith.subf %36, %6 : vector<16x16xf32>
    %40 = arith.mulf %38, %39 : vector<16x16xf32>
    %41 = arith.addf %6, %40 : vector<16x16xf32>
    %cst_26 = arith.constant dense<0.000000e+00> : vector<16x16xf32>
    %42 = tpu.matmul %41, %0, %cst_26 {dimension_numbers = #tpu.dot_dimension_numbers<[1], [0], [0], [1], [0, 0, 1, 1], [], []>} : vector<16x16xf32>, vector<16x16xf32>, vector<16x16xf32> -> vector<16x16xf32>
    %43 = vector.broadcast %3 : vector<1x16xf32> to vector<16x16xf32>
    %44 = arith.addf %42, %43 : vector<16x16xf32>
    %cst_27 = arith.constant dense<0.000000e+00> : vector<16x16xf32>
    %45 = tpu.matmul %41, %1, %cst_27 {dimension_numbers = #tpu.dot_dimension_numbers<[1], [0], [0], [1], [0, 0, 1, 1], [], []>} : vector<16x16xf32>, vector<16x16xf32>, vector<16x16xf32> -> vector<16x16xf32>
    %46 = vector.broadcast %4 : vector<1x16xf32> to vector<16x16xf32>
    %47 = arith.addf %45, %46 : vector<16x16xf32>
    %cst_28 = arith.constant dense<0.000000e+00> : vector<16x16xf32>
    %48 = tpu.matmul %41, %2, %cst_28 {dimension_numbers = #tpu.dot_dimension_numbers<[1], [0], [0], [1], [0, 0, 1, 1], [], []>} : vector<16x16xf32>, vector<16x16xf32>, vector<16x16xf32> -> vector<16x16xf32>
    %49 = vector.broadcast %5 : vector<1x16xf32> to vector<16x16xf32>
    %50 = arith.addf %48, %49 : vector<16x16xf32>
    %c1 = arith.constant 1 : index
    %c0_29 = arith.constant 0 : index
    %c0_30 = arith.constant 0 : index
    %51 = vector.load %arg0[%c1, %c0_29, %c0_30] : memref<12x16x16xf32, #tpu.memory_space<vmem>>, vector<1x16x16xf32>
    %52 = vector.shape_cast %51 : vector<1x16x16xf32> to vector<16x16xf32>
    %53 = arith.addf %52, %44 : vector<16x16xf32>
    %54 = arith.negf %53 : vector<16x16xf32>
    %55 = math.exp %54 : vector<16x16xf32>
    %cst_31 = arith.constant 1.000000e+00 : f32
    %56 = vector.broadcast %cst_31 : f32 to vector<16x16xf32>
    %57 = arith.addf %56, %55 : vector<16x16xf32>
    %58 = arith.divf %56, %57 : vector<16x16xf32>
    %c1_32 = arith.constant 1 : index
    %c0_33 = arith.constant 0 : index
    %c0_34 = arith.constant 0 : index
    %59 = vector.load %arg1[%c1_32, %c0_33, %c0_34] : memref<12x16x16xf32, #tpu.memory_space<vmem>>, vector<1x16x16xf32>
    %60 = vector.shape_cast %59 : vector<1x16x16xf32> to vector<16x16xf32>
    %61 = arith.addf %60, %47 : vector<16x16xf32>
    %62 = arith.negf %61 : vector<16x16xf32>
    %63 = math.exp %62 : vector<16x16xf32>
    %cst_35 = arith.constant 1.000000e+00 : f32
    %64 = vector.broadcast %cst_35 : f32 to vector<16x16xf32>
    %65 = arith.addf %64, %63 : vector<16x16xf32>
    %66 = arith.divf %64, %65 : vector<16x16xf32>
    %c1_36 = arith.constant 1 : index
    %c0_37 = arith.constant 0 : index
    %c0_38 = arith.constant 0 : index
    %67 = vector.load %arg2[%c1_36, %c0_37, %c0_38] : memref<12x16x16xf32, #tpu.memory_space<vmem>>, vector<1x16x16xf32>
    %68 = vector.shape_cast %67 : vector<1x16x16xf32> to vector<16x16xf32>
    %69 = arith.mulf %58, %50 : vector<16x16xf32>
    %70 = arith.addf %68, %69 : vector<16x16xf32>
    %71 = math.tanh %70 : vector<16x16xf32>
    %cst_39 = arith.constant 1.000000e+00 : f32
    %72 = vector.broadcast %cst_39 : f32 to vector<16x16xf32>
    %73 = arith.subf %72, %66 : vector<16x16xf32>
    %74 = arith.subf %71, %41 : vector<16x16xf32>
    %75 = arith.mulf %73, %74 : vector<16x16xf32>
    %76 = arith.addf %41, %75 : vector<16x16xf32>
    %cst_40 = arith.constant dense<0.000000e+00> : vector<16x16xf32>
    %77 = tpu.matmul %76, %0, %cst_40 {dimension_numbers = #tpu.dot_dimension_numbers<[1], [0], [0], [1], [0, 0, 1, 1], [], []>} : vector<16x16xf32>, vector<16x16xf32>, vector<16x16xf32> -> vector<16x16xf32>
    %78 = vector.broadcast %3 : vector<1x16xf32> to vector<16x16xf32>
    %79 = arith.addf %77, %78 : vector<16x16xf32>
    %cst_41 = arith.constant dense<0.000000e+00> : vector<16x16xf32>
    %80 = tpu.matmul %76, %1, %cst_41 {dimension_numbers = #tpu.dot_dimension_numbers<[1], [0], [0], [1], [0, 0, 1, 1], [], []>} : vector<16x16xf32>, vector<16x16xf32>, vector<16x16xf32> -> vector<16x16xf32>
    %81 = vector.broadcast %4 : vector<1x16xf32> to vector<16x16xf32>
    %82 = arith.addf %80, %81 : vector<16x16xf32>
    %cst_42 = arith.constant dense<0.000000e+00> : vector<16x16xf32>
    %83 = tpu.matmul %76, %2, %cst_42 {dimension_numbers = #tpu.dot_dimension_numbers<[1], [0], [0], [1], [0, 0, 1, 1], [], []>} : vector<16x16xf32>, vector<16x16xf32>, vector<16x16xf32> -> vector<16x16xf32>
    %84 = vector.broadcast %5 : vector<1x16xf32> to vector<16x16xf32>
    %85 = arith.addf %83, %84 : vector<16x16xf32>
    %c2 = arith.constant 2 : index
    %c0_43 = arith.constant 0 : index
    %c0_44 = arith.constant 0 : index
    %86 = vector.load %arg0[%c2, %c0_43, %c0_44] : memref<12x16x16xf32, #tpu.memory_space<vmem>>, vector<1x16x16xf32>
    %87 = vector.shape_cast %86 : vector<1x16x16xf32> to vector<16x16xf32>
    %88 = arith.addf %87, %79 : vector<16x16xf32>
    %89 = arith.negf %88 : vector<16x16xf32>
    %90 = math.exp %89 : vector<16x16xf32>
    %cst_45 = arith.constant 1.000000e+00 : f32
    %91 = vector.broadcast %cst_45 : f32 to vector<16x16xf32>
    %92 = arith.addf %91, %90 : vector<16x16xf32>
    %93 = arith.divf %91, %92 : vector<16x16xf32>
    %c2_46 = arith.constant 2 : index
    %c0_47 = arith.constant 0 : index
    %c0_48 = arith.constant 0 : index
    %94 = vector.load %arg1[%c2_46, %c0_47, %c0_48] : memref<12x16x16xf32, #tpu.memory_space<vmem>>, vector<1x16x16xf32>
    %95 = vector.shape_cast %94 : vector<1x16x16xf32> to vector<16x16xf32>
    %96 = arith.addf %95, %82 : vector<16x16xf32>
    %97 = arith.negf %96 : vector<16x16xf32>
    %98 = math.exp %97 : vector<16x16xf32>
    %cst_49 = arith.constant 1.000000e+00 : f32
    %99 = vector.broadcast %cst_49 : f32 to vector<16x16xf32>
    %100 = arith.addf %99, %98 : vector<16x16xf32>
    %101 = arith.divf %99, %100 : vector<16x16xf32>
    %c2_50 = arith.constant 2 : index
    %c0_51 = arith.constant 0 : index
    %c0_52 = arith.constant 0 : index
    %102 = vector.load %arg2[%c2_50, %c0_51, %c0_52] : memref<12x16x16xf32, #tpu.memory_space<vmem>>, vector<1x16x16xf32>
    %103 = vector.shape_cast %102 : vector<1x16x16xf32> to vector<16x16xf32>
    %104 = arith.mulf %93, %85 : vector<16x16xf32>
    %105 = arith.addf %103, %104 : vector<16x16xf32>
    %106 = math.tanh %105 : vector<16x16xf32>
    %cst_53 = arith.constant 1.000000e+00 : f32
    %107 = vector.broadcast %cst_53 : f32 to vector<16x16xf32>
    %108 = arith.subf %107, %101 : vector<16x16xf32>
    %109 = arith.subf %106, %76 : vector<16x16xf32>
    %110 = arith.mulf %108, %109 : vector<16x16xf32>
    %111 = arith.addf %76, %110 : vector<16x16xf32>
    %cst_54 = arith.constant dense<0.000000e+00> : vector<16x16xf32>
    %112 = tpu.matmul %111, %0, %cst_54 {dimension_numbers = #tpu.dot_dimension_numbers<[1], [0], [0], [1], [0, 0, 1, 1], [], []>} : vector<16x16xf32>, vector<16x16xf32>, vector<16x16xf32> -> vector<16x16xf32>
    %113 = vector.broadcast %3 : vector<1x16xf32> to vector<16x16xf32>
    %114 = arith.addf %112, %113 : vector<16x16xf32>
    %cst_55 = arith.constant dense<0.000000e+00> : vector<16x16xf32>
    %115 = tpu.matmul %111, %1, %cst_55 {dimension_numbers = #tpu.dot_dimension_numbers<[1], [0], [0], [1], [0, 0, 1, 1], [], []>} : vector<16x16xf32>, vector<16x16xf32>, vector<16x16xf32> -> vector<16x16xf32>
    %116 = vector.broadcast %4 : vector<1x16xf32> to vector<16x16xf32>
    %117 = arith.addf %115, %116 : vector<16x16xf32>
    %cst_56 = arith.constant dense<0.000000e+00> : vector<16x16xf32>
    %118 = tpu.matmul %111, %2, %cst_56 {dimension_numbers = #tpu.dot_dimension_numbers<[1], [0], [0], [1], [0, 0, 1, 1], [], []>} : vector<16x16xf32>, vector<16x16xf32>, vector<16x16xf32> -> vector<16x16xf32>
    %119 = vector.broadcast %5 : vector<1x16xf32> to vector<16x16xf32>
    %120 = arith.addf %118, %119 : vector<16x16xf32>
    %c3 = arith.constant 3 : index
    %c0_57 = arith.constant 0 : index
    %c0_58 = arith.constant 0 : index
    %121 = vector.load %arg0[%c3, %c0_57, %c0_58] : memref<12x16x16xf32, #tpu.memory_space<vmem>>, vector<1x16x16xf32>
    %122 = vector.shape_cast %121 : vector<1x16x16xf32> to vector<16x16xf32>
    %123 = arith.addf %122, %114 : vector<16x16xf32>
    %124 = arith.negf %123 : vector<16x16xf32>
    %125 = math.exp %124 : vector<16x16xf32>
    %cst_59 = arith.constant 1.000000e+00 : f32
    %126 = vector.broadcast %cst_59 : f32 to vector<16x16xf32>
    %127 = arith.addf %126, %125 : vector<16x16xf32>
    %128 = arith.divf %126, %127 : vector<16x16xf32>
    %c3_60 = arith.constant 3 : index
    %c0_61 = arith.constant 0 : index
    %c0_62 = arith.constant 0 : index
    %129 = vector.load %arg1[%c3_60, %c0_61, %c0_62] : memref<12x16x16xf32, #tpu.memory_space<vmem>>, vector<1x16x16xf32>
    %130 = vector.shape_cast %129 : vector<1x16x16xf32> to vector<16x16xf32>
    %131 = arith.addf %130, %117 : vector<16x16xf32>
    %132 = arith.negf %131 : vector<16x16xf32>
    %133 = math.exp %132 : vector<16x16xf32>
    %cst_63 = arith.constant 1.000000e+00 : f32
    %134 = vector.broadcast %cst_63 : f32 to vector<16x16xf32>
    %135 = arith.addf %134, %133 : vector<16x16xf32>
    %136 = arith.divf %134, %135 : vector<16x16xf32>
    %c3_64 = arith.constant 3 : index
    %c0_65 = arith.constant 0 : index
    %c0_66 = arith.constant 0 : index
    %137 = vector.load %arg2[%c3_64, %c0_65, %c0_66] : memref<12x16x16xf32, #tpu.memory_space<vmem>>, vector<1x16x16xf32>
    %138 = vector.shape_cast %137 : vector<1x16x16xf32> to vector<16x16xf32>
    %139 = arith.mulf %128, %120 : vector<16x16xf32>
    %140 = arith.addf %138, %139 : vector<16x16xf32>
    %141 = math.tanh %140 : vector<16x16xf32>
    %cst_67 = arith.constant 1.000000e+00 : f32
    %142 = vector.broadcast %cst_67 : f32 to vector<16x16xf32>
    %143 = arith.subf %142, %136 : vector<16x16xf32>
    %144 = arith.subf %141, %111 : vector<16x16xf32>
    %145 = arith.mulf %143, %144 : vector<16x16xf32>
    %146 = arith.addf %111, %145 : vector<16x16xf32>
    %cst_68 = arith.constant dense<0.000000e+00> : vector<16x16xf32>
    %147 = tpu.matmul %146, %0, %cst_68 {dimension_numbers = #tpu.dot_dimension_numbers<[1], [0], [0], [1], [0, 0, 1, 1], [], []>} : vector<16x16xf32>, vector<16x16xf32>, vector<16x16xf32> -> vector<16x16xf32>
    %148 = vector.broadcast %3 : vector<1x16xf32> to vector<16x16xf32>
    %149 = arith.addf %147, %148 : vector<16x16xf32>
    %cst_69 = arith.constant dense<0.000000e+00> : vector<16x16xf32>
    %150 = tpu.matmul %146, %1, %cst_69 {dimension_numbers = #tpu.dot_dimension_numbers<[1], [0], [0], [1], [0, 0, 1, 1], [], []>} : vector<16x16xf32>, vector<16x16xf32>, vector<16x16xf32> -> vector<16x16xf32>
    %151 = vector.broadcast %4 : vector<1x16xf32> to vector<16x16xf32>
    %152 = arith.addf %150, %151 : vector<16x16xf32>
    %cst_70 = arith.constant dense<0.000000e+00> : vector<16x16xf32>
    %153 = tpu.matmul %146, %2, %cst_70 {dimension_numbers = #tpu.dot_dimension_numbers<[1], [0], [0], [1], [0, 0, 1, 1], [], []>} : vector<16x16xf32>, vector<16x16xf32>, vector<16x16xf32> -> vector<16x16xf32>
    %154 = vector.broadcast %5 : vector<1x16xf32> to vector<16x16xf32>
    %155 = arith.addf %153, %154 : vector<16x16xf32>
    %c4 = arith.constant 4 : index
    %c0_71 = arith.constant 0 : index
    %c0_72 = arith.constant 0 : index
    %156 = vector.load %arg0[%c4, %c0_71, %c0_72] : memref<12x16x16xf32, #tpu.memory_space<vmem>>, vector<1x16x16xf32>
    %157 = vector.shape_cast %156 : vector<1x16x16xf32> to vector<16x16xf32>
    %158 = arith.addf %157, %149 : vector<16x16xf32>
    %159 = arith.negf %158 : vector<16x16xf32>
    %160 = math.exp %159 : vector<16x16xf32>
    %cst_73 = arith.constant 1.000000e+00 : f32
    %161 = vector.broadcast %cst_73 : f32 to vector<16x16xf32>
    %162 = arith.addf %161, %160 : vector<16x16xf32>
    %163 = arith.divf %161, %162 : vector<16x16xf32>
    %c4_74 = arith.constant 4 : index
    %c0_75 = arith.constant 0 : index
    %c0_76 = arith.constant 0 : index
    %164 = vector.load %arg1[%c4_74, %c0_75, %c0_76] : memref<12x16x16xf32, #tpu.memory_space<vmem>>, vector<1x16x16xf32>
    %165 = vector.shape_cast %164 : vector<1x16x16xf32> to vector<16x16xf32>
    %166 = arith.addf %165, %152 : vector<16x16xf32>
    %167 = arith.negf %166 : vector<16x16xf32>
    %168 = math.exp %167 : vector<16x16xf32>
    %cst_77 = arith.constant 1.000000e+00 : f32
    %169 = vector.broadcast %cst_77 : f32 to vector<16x16xf32>
    %170 = arith.addf %169, %168 : vector<16x16xf32>
    %171 = arith.divf %169, %170 : vector<16x16xf32>
    %c4_78 = arith.constant 4 : index
    %c0_79 = arith.constant 0 : index
    %c0_80 = arith.constant 0 : index
    %172 = vector.load %arg2[%c4_78, %c0_79, %c0_80] : memref<12x16x16xf32, #tpu.memory_space<vmem>>, vector<1x16x16xf32>
    %173 = vector.shape_cast %172 : vector<1x16x16xf32> to vector<16x16xf32>
    %174 = arith.mulf %163, %155 : vector<16x16xf32>
    %175 = arith.addf %173, %174 : vector<16x16xf32>
    %176 = math.tanh %175 : vector<16x16xf32>
    %cst_81 = arith.constant 1.000000e+00 : f32
    %177 = vector.broadcast %cst_81 : f32 to vector<16x16xf32>
    %178 = arith.subf %177, %171 : vector<16x16xf32>
    %179 = arith.subf %176, %146 : vector<16x16xf32>
    %180 = arith.mulf %178, %179 : vector<16x16xf32>
    %181 = arith.addf %146, %180 : vector<16x16xf32>
    %cst_82 = arith.constant dense<0.000000e+00> : vector<16x16xf32>
    %182 = tpu.matmul %181, %0, %cst_82 {dimension_numbers = #tpu.dot_dimension_numbers<[1], [0], [0], [1], [0, 0, 1, 1], [], []>} : vector<16x16xf32>, vector<16x16xf32>, vector<16x16xf32> -> vector<16x16xf32>
    %183 = vector.broadcast %3 : vector<1x16xf32> to vector<16x16xf32>
    %184 = arith.addf %182, %183 : vector<16x16xf32>
    %cst_83 = arith.constant dense<0.000000e+00> : vector<16x16xf32>
    %185 = tpu.matmul %181, %1, %cst_83 {dimension_numbers = #tpu.dot_dimension_numbers<[1], [0], [0], [1], [0, 0, 1, 1], [], []>} : vector<16x16xf32>, vector<16x16xf32>, vector<16x16xf32> -> vector<16x16xf32>
    %186 = vector.broadcast %4 : vector<1x16xf32> to vector<16x16xf32>
    %187 = arith.addf %185, %186 : vector<16x16xf32>
    %cst_84 = arith.constant dense<0.000000e+00> : vector<16x16xf32>
    %188 = tpu.matmul %181, %2, %cst_84 {dimension_numbers = #tpu.dot_dimension_numbers<[1], [0], [0], [1], [0, 0, 1, 1], [], []>} : vector<16x16xf32>, vector<16x16xf32>, vector<16x16xf32> -> vector<16x16xf32>
    %189 = vector.broadcast %5 : vector<1x16xf32> to vector<16x16xf32>
    %190 = arith.addf %188, %189 : vector<16x16xf32>
    %c5 = arith.constant 5 : index
    %c0_85 = arith.constant 0 : index
    %c0_86 = arith.constant 0 : index
    %191 = vector.load %arg0[%c5, %c0_85, %c0_86] : memref<12x16x16xf32, #tpu.memory_space<vmem>>, vector<1x16x16xf32>
    %192 = vector.shape_cast %191 : vector<1x16x16xf32> to vector<16x16xf32>
    %193 = arith.addf %192, %184 : vector<16x16xf32>
    %194 = arith.negf %193 : vector<16x16xf32>
    %195 = math.exp %194 : vector<16x16xf32>
    %cst_87 = arith.constant 1.000000e+00 : f32
    %196 = vector.broadcast %cst_87 : f32 to vector<16x16xf32>
    %197 = arith.addf %196, %195 : vector<16x16xf32>
    %198 = arith.divf %196, %197 : vector<16x16xf32>
    %c5_88 = arith.constant 5 : index
    %c0_89 = arith.constant 0 : index
    %c0_90 = arith.constant 0 : index
    %199 = vector.load %arg1[%c5_88, %c0_89, %c0_90] : memref<12x16x16xf32, #tpu.memory_space<vmem>>, vector<1x16x16xf32>
    %200 = vector.shape_cast %199 : vector<1x16x16xf32> to vector<16x16xf32>
    %201 = arith.addf %200, %187 : vector<16x16xf32>
    %202 = arith.negf %201 : vector<16x16xf32>
    %203 = math.exp %202 : vector<16x16xf32>
    %cst_91 = arith.constant 1.000000e+00 : f32
    %204 = vector.broadcast %cst_91 : f32 to vector<16x16xf32>
    %205 = arith.addf %204, %203 : vector<16x16xf32>
    %206 = arith.divf %204, %205 : vector<16x16xf32>
    %c5_92 = arith.constant 5 : index
    %c0_93 = arith.constant 0 : index
    %c0_94 = arith.constant 0 : index
    %207 = vector.load %arg2[%c5_92, %c0_93, %c0_94] : memref<12x16x16xf32, #tpu.memory_space<vmem>>, vector<1x16x16xf32>
    %208 = vector.shape_cast %207 : vector<1x16x16xf32> to vector<16x16xf32>
    %209 = arith.mulf %198, %190 : vector<16x16xf32>
    %210 = arith.addf %208, %209 : vector<16x16xf32>
    %211 = math.tanh %210 : vector<16x16xf32>
    %cst_95 = arith.constant 1.000000e+00 : f32
    %212 = vector.broadcast %cst_95 : f32 to vector<16x16xf32>
    %213 = arith.subf %212, %206 : vector<16x16xf32>
    %214 = arith.subf %211, %181 : vector<16x16xf32>
    %215 = arith.mulf %213, %214 : vector<16x16xf32>
    %216 = arith.addf %181, %215 : vector<16x16xf32>
    %cst_96 = arith.constant dense<0.000000e+00> : vector<16x16xf32>
    %217 = tpu.matmul %216, %0, %cst_96 {dimension_numbers = #tpu.dot_dimension_numbers<[1], [0], [0], [1], [0, 0, 1, 1], [], []>} : vector<16x16xf32>, vector<16x16xf32>, vector<16x16xf32> -> vector<16x16xf32>
    %218 = vector.broadcast %3 : vector<1x16xf32> to vector<16x16xf32>
    %219 = arith.addf %217, %218 : vector<16x16xf32>
    %cst_97 = arith.constant dense<0.000000e+00> : vector<16x16xf32>
    %220 = tpu.matmul %216, %1, %cst_97 {dimension_numbers = #tpu.dot_dimension_numbers<[1], [0], [0], [1], [0, 0, 1, 1], [], []>} : vector<16x16xf32>, vector<16x16xf32>, vector<16x16xf32> -> vector<16x16xf32>
    %221 = vector.broadcast %4 : vector<1x16xf32> to vector<16x16xf32>
    %222 = arith.addf %220, %221 : vector<16x16xf32>
    %cst_98 = arith.constant dense<0.000000e+00> : vector<16x16xf32>
    %223 = tpu.matmul %216, %2, %cst_98 {dimension_numbers = #tpu.dot_dimension_numbers<[1], [0], [0], [1], [0, 0, 1, 1], [], []>} : vector<16x16xf32>, vector<16x16xf32>, vector<16x16xf32> -> vector<16x16xf32>
    %224 = vector.broadcast %5 : vector<1x16xf32> to vector<16x16xf32>
    %225 = arith.addf %223, %224 : vector<16x16xf32>
    %c6 = arith.constant 6 : index
    %c0_99 = arith.constant 0 : index
    %c0_100 = arith.constant 0 : index
    %226 = vector.load %arg0[%c6, %c0_99, %c0_100] : memref<12x16x16xf32, #tpu.memory_space<vmem>>, vector<1x16x16xf32>
    %227 = vector.shape_cast %226 : vector<1x16x16xf32> to vector<16x16xf32>
    %228 = arith.addf %227, %219 : vector<16x16xf32>
    %229 = arith.negf %228 : vector<16x16xf32>
    %230 = math.exp %229 : vector<16x16xf32>
    %cst_101 = arith.constant 1.000000e+00 : f32
    %231 = vector.broadcast %cst_101 : f32 to vector<16x16xf32>
    %232 = arith.addf %231, %230 : vector<16x16xf32>
    %233 = arith.divf %231, %232 : vector<16x16xf32>
    %c6_102 = arith.constant 6 : index
    %c0_103 = arith.constant 0 : index
    %c0_104 = arith.constant 0 : index
    %234 = vector.load %arg1[%c6_102, %c0_103, %c0_104] : memref<12x16x16xf32, #tpu.memory_space<vmem>>, vector<1x16x16xf32>
    %235 = vector.shape_cast %234 : vector<1x16x16xf32> to vector<16x16xf32>
    %236 = arith.addf %235, %222 : vector<16x16xf32>
    %237 = arith.negf %236 : vector<16x16xf32>
    %238 = math.exp %237 : vector<16x16xf32>
    %cst_105 = arith.constant 1.000000e+00 : f32
    %239 = vector.broadcast %cst_105 : f32 to vector<16x16xf32>
    %240 = arith.addf %239, %238 : vector<16x16xf32>
    %241 = arith.divf %239, %240 : vector<16x16xf32>
    %c6_106 = arith.constant 6 : index
    %c0_107 = arith.constant 0 : index
    %c0_108 = arith.constant 0 : index
    %242 = vector.load %arg2[%c6_106, %c0_107, %c0_108] : memref<12x16x16xf32, #tpu.memory_space<vmem>>, vector<1x16x16xf32>
    %243 = vector.shape_cast %242 : vector<1x16x16xf32> to vector<16x16xf32>
    %244 = arith.mulf %233, %225 : vector<16x16xf32>
    %245 = arith.addf %243, %244 : vector<16x16xf32>
    %246 = math.tanh %245 : vector<16x16xf32>
    %cst_109 = arith.constant 1.000000e+00 : f32
    %247 = vector.broadcast %cst_109 : f32 to vector<16x16xf32>
    %248 = arith.subf %247, %241 : vector<16x16xf32>
    %249 = arith.subf %246, %216 : vector<16x16xf32>
    %250 = arith.mulf %248, %249 : vector<16x16xf32>
    %251 = arith.addf %216, %250 : vector<16x16xf32>
    %cst_110 = arith.constant dense<0.000000e+00> : vector<16x16xf32>
    %252 = tpu.matmul %251, %0, %cst_110 {dimension_numbers = #tpu.dot_dimension_numbers<[1], [0], [0], [1], [0, 0, 1, 1], [], []>} : vector<16x16xf32>, vector<16x16xf32>, vector<16x16xf32> -> vector<16x16xf32>
    %253 = vector.broadcast %3 : vector<1x16xf32> to vector<16x16xf32>
    %254 = arith.addf %252, %253 : vector<16x16xf32>
    %cst_111 = arith.constant dense<0.000000e+00> : vector<16x16xf32>
    %255 = tpu.matmul %251, %1, %cst_111 {dimension_numbers = #tpu.dot_dimension_numbers<[1], [0], [0], [1], [0, 0, 1, 1], [], []>} : vector<16x16xf32>, vector<16x16xf32>, vector<16x16xf32> -> vector<16x16xf32>
    %256 = vector.broadcast %4 : vector<1x16xf32> to vector<16x16xf32>
    %257 = arith.addf %255, %256 : vector<16x16xf32>
    %cst_112 = arith.constant dense<0.000000e+00> : vector<16x16xf32>
    %258 = tpu.matmul %251, %2, %cst_112 {dimension_numbers = #tpu.dot_dimension_numbers<[1], [0], [0], [1], [0, 0, 1, 1], [], []>} : vector<16x16xf32>, vector<16x16xf32>, vector<16x16xf32> -> vector<16x16xf32>
    %259 = vector.broadcast %5 : vector<1x16xf32> to vector<16x16xf32>
    %260 = arith.addf %258, %259 : vector<16x16xf32>
    %c7 = arith.constant 7 : index
    %c0_113 = arith.constant 0 : index
    %c0_114 = arith.constant 0 : index
    %261 = vector.load %arg0[%c7, %c0_113, %c0_114] : memref<12x16x16xf32, #tpu.memory_space<vmem>>, vector<1x16x16xf32>
    %262 = vector.shape_cast %261 : vector<1x16x16xf32> to vector<16x16xf32>
    %263 = arith.addf %262, %254 : vector<16x16xf32>
    %264 = arith.negf %263 : vector<16x16xf32>
    %265 = math.exp %264 : vector<16x16xf32>
    %cst_115 = arith.constant 1.000000e+00 : f32
    %266 = vector.broadcast %cst_115 : f32 to vector<16x16xf32>
    %267 = arith.addf %266, %265 : vector<16x16xf32>
    %268 = arith.divf %266, %267 : vector<16x16xf32>
    %c7_116 = arith.constant 7 : index
    %c0_117 = arith.constant 0 : index
    %c0_118 = arith.constant 0 : index
    %269 = vector.load %arg1[%c7_116, %c0_117, %c0_118] : memref<12x16x16xf32, #tpu.memory_space<vmem>>, vector<1x16x16xf32>
    %270 = vector.shape_cast %269 : vector<1x16x16xf32> to vector<16x16xf32>
    %271 = arith.addf %270, %257 : vector<16x16xf32>
    %272 = arith.negf %271 : vector<16x16xf32>
    %273 = math.exp %272 : vector<16x16xf32>
    %cst_119 = arith.constant 1.000000e+00 : f32
    %274 = vector.broadcast %cst_119 : f32 to vector<16x16xf32>
    %275 = arith.addf %274, %273 : vector<16x16xf32>
    %276 = arith.divf %274, %275 : vector<16x16xf32>
    %c7_120 = arith.constant 7 : index
    %c0_121 = arith.constant 0 : index
    %c0_122 = arith.constant 0 : index
    %277 = vector.load %arg2[%c7_120, %c0_121, %c0_122] : memref<12x16x16xf32, #tpu.memory_space<vmem>>, vector<1x16x16xf32>
    %278 = vector.shape_cast %277 : vector<1x16x16xf32> to vector<16x16xf32>
    %279 = arith.mulf %268, %260 : vector<16x16xf32>
    %280 = arith.addf %278, %279 : vector<16x16xf32>
    %281 = math.tanh %280 : vector<16x16xf32>
    %cst_123 = arith.constant 1.000000e+00 : f32
    %282 = vector.broadcast %cst_123 : f32 to vector<16x16xf32>
    %283 = arith.subf %282, %276 : vector<16x16xf32>
    %284 = arith.subf %281, %251 : vector<16x16xf32>
    %285 = arith.mulf %283, %284 : vector<16x16xf32>
    %286 = arith.addf %251, %285 : vector<16x16xf32>
    %cst_124 = arith.constant dense<0.000000e+00> : vector<16x16xf32>
    %287 = tpu.matmul %286, %0, %cst_124 {dimension_numbers = #tpu.dot_dimension_numbers<[1], [0], [0], [1], [0, 0, 1, 1], [], []>} : vector<16x16xf32>, vector<16x16xf32>, vector<16x16xf32> -> vector<16x16xf32>
    %288 = vector.broadcast %3 : vector<1x16xf32> to vector<16x16xf32>
    %289 = arith.addf %287, %288 : vector<16x16xf32>
    %cst_125 = arith.constant dense<0.000000e+00> : vector<16x16xf32>
    %290 = tpu.matmul %286, %1, %cst_125 {dimension_numbers = #tpu.dot_dimension_numbers<[1], [0], [0], [1], [0, 0, 1, 1], [], []>} : vector<16x16xf32>, vector<16x16xf32>, vector<16x16xf32> -> vector<16x16xf32>
    %291 = vector.broadcast %4 : vector<1x16xf32> to vector<16x16xf32>
    %292 = arith.addf %290, %291 : vector<16x16xf32>
    %cst_126 = arith.constant dense<0.000000e+00> : vector<16x16xf32>
    %293 = tpu.matmul %286, %2, %cst_126 {dimension_numbers = #tpu.dot_dimension_numbers<[1], [0], [0], [1], [0, 0, 1, 1], [], []>} : vector<16x16xf32>, vector<16x16xf32>, vector<16x16xf32> -> vector<16x16xf32>
    %294 = vector.broadcast %5 : vector<1x16xf32> to vector<16x16xf32>
    %295 = arith.addf %293, %294 : vector<16x16xf32>
    %c8 = arith.constant 8 : index
    %c0_127 = arith.constant 0 : index
    %c0_128 = arith.constant 0 : index
    %296 = vector.load %arg0[%c8, %c0_127, %c0_128] : memref<12x16x16xf32, #tpu.memory_space<vmem>>, vector<1x16x16xf32>
    %297 = vector.shape_cast %296 : vector<1x16x16xf32> to vector<16x16xf32>
    %298 = arith.addf %297, %289 : vector<16x16xf32>
    %299 = arith.negf %298 : vector<16x16xf32>
    %300 = math.exp %299 : vector<16x16xf32>
    %cst_129 = arith.constant 1.000000e+00 : f32
    %301 = vector.broadcast %cst_129 : f32 to vector<16x16xf32>
    %302 = arith.addf %301, %300 : vector<16x16xf32>
    %303 = arith.divf %301, %302 : vector<16x16xf32>
    %c8_130 = arith.constant 8 : index
    %c0_131 = arith.constant 0 : index
    %c0_132 = arith.constant 0 : index
    %304 = vector.load %arg1[%c8_130, %c0_131, %c0_132] : memref<12x16x16xf32, #tpu.memory_space<vmem>>, vector<1x16x16xf32>
    %305 = vector.shape_cast %304 : vector<1x16x16xf32> to vector<16x16xf32>
    %306 = arith.addf %305, %292 : vector<16x16xf32>
    %307 = arith.negf %306 : vector<16x16xf32>
    %308 = math.exp %307 : vector<16x16xf32>
    %cst_133 = arith.constant 1.000000e+00 : f32
    %309 = vector.broadcast %cst_133 : f32 to vector<16x16xf32>
    %310 = arith.addf %309, %308 : vector<16x16xf32>
    %311 = arith.divf %309, %310 : vector<16x16xf32>
    %c8_134 = arith.constant 8 : index
    %c0_135 = arith.constant 0 : index
    %c0_136 = arith.constant 0 : index
    %312 = vector.load %arg2[%c8_134, %c0_135, %c0_136] : memref<12x16x16xf32, #tpu.memory_space<vmem>>, vector<1x16x16xf32>
    %313 = vector.shape_cast %312 : vector<1x16x16xf32> to vector<16x16xf32>
    %314 = arith.mulf %303, %295 : vector<16x16xf32>
    %315 = arith.addf %313, %314 : vector<16x16xf32>
    %316 = math.tanh %315 : vector<16x16xf32>
    %cst_137 = arith.constant 1.000000e+00 : f32
    %317 = vector.broadcast %cst_137 : f32 to vector<16x16xf32>
    %318 = arith.subf %317, %311 : vector<16x16xf32>
    %319 = arith.subf %316, %286 : vector<16x16xf32>
    %320 = arith.mulf %318, %319 : vector<16x16xf32>
    %321 = arith.addf %286, %320 : vector<16x16xf32>
    %cst_138 = arith.constant dense<0.000000e+00> : vector<16x16xf32>
    %322 = tpu.matmul %321, %0, %cst_138 {dimension_numbers = #tpu.dot_dimension_numbers<[1], [0], [0], [1], [0, 0, 1, 1], [], []>} : vector<16x16xf32>, vector<16x16xf32>, vector<16x16xf32> -> vector<16x16xf32>
    %323 = vector.broadcast %3 : vector<1x16xf32> to vector<16x16xf32>
    %324 = arith.addf %322, %323 : vector<16x16xf32>
    %cst_139 = arith.constant dense<0.000000e+00> : vector<16x16xf32>
    %325 = tpu.matmul %321, %1, %cst_139 {dimension_numbers = #tpu.dot_dimension_numbers<[1], [0], [0], [1], [0, 0, 1, 1], [], []>} : vector<16x16xf32>, vector<16x16xf32>, vector<16x16xf32> -> vector<16x16xf32>
    %326 = vector.broadcast %4 : vector<1x16xf32> to vector<16x16xf32>
    %327 = arith.addf %325, %326 : vector<16x16xf32>
    %cst_140 = arith.constant dense<0.000000e+00> : vector<16x16xf32>
    %328 = tpu.matmul %321, %2, %cst_140 {dimension_numbers = #tpu.dot_dimension_numbers<[1], [0], [0], [1], [0, 0, 1, 1], [], []>} : vector<16x16xf32>, vector<16x16xf32>, vector<16x16xf32> -> vector<16x16xf32>
    %329 = vector.broadcast %5 : vector<1x16xf32> to vector<16x16xf32>
    %330 = arith.addf %328, %329 : vector<16x16xf32>
    %c9 = arith.constant 9 : index
    %c0_141 = arith.constant 0 : index
    %c0_142 = arith.constant 0 : index
    %331 = vector.load %arg0[%c9, %c0_141, %c0_142] : memref<12x16x16xf32, #tpu.memory_space<vmem>>, vector<1x16x16xf32>
    %332 = vector.shape_cast %331 : vector<1x16x16xf32> to vector<16x16xf32>
    %333 = arith.addf %332, %324 : vector<16x16xf32>
    %334 = arith.negf %333 : vector<16x16xf32>
    %335 = math.exp %334 : vector<16x16xf32>
    %cst_143 = arith.constant 1.000000e+00 : f32
    %336 = vector.broadcast %cst_143 : f32 to vector<16x16xf32>
    %337 = arith.addf %336, %335 : vector<16x16xf32>
    %338 = arith.divf %336, %337 : vector<16x16xf32>
    %c9_144 = arith.constant 9 : index
    %c0_145 = arith.constant 0 : index
    %c0_146 = arith.constant 0 : index
    %339 = vector.load %arg1[%c9_144, %c0_145, %c0_146] : memref<12x16x16xf32, #tpu.memory_space<vmem>>, vector<1x16x16xf32>
    %340 = vector.shape_cast %339 : vector<1x16x16xf32> to vector<16x16xf32>
    %341 = arith.addf %340, %327 : vector<16x16xf32>
    %342 = arith.negf %341 : vector<16x16xf32>
    %343 = math.exp %342 : vector<16x16xf32>
    %cst_147 = arith.constant 1.000000e+00 : f32
    %344 = vector.broadcast %cst_147 : f32 to vector<16x16xf32>
    %345 = arith.addf %344, %343 : vector<16x16xf32>
    %346 = arith.divf %344, %345 : vector<16x16xf32>
    %c9_148 = arith.constant 9 : index
    %c0_149 = arith.constant 0 : index
    %c0_150 = arith.constant 0 : index
    %347 = vector.load %arg2[%c9_148, %c0_149, %c0_150] : memref<12x16x16xf32, #tpu.memory_space<vmem>>, vector<1x16x16xf32>
    %348 = vector.shape_cast %347 : vector<1x16x16xf32> to vector<16x16xf32>
    %349 = arith.mulf %338, %330 : vector<16x16xf32>
    %350 = arith.addf %348, %349 : vector<16x16xf32>
    %351 = math.tanh %350 : vector<16x16xf32>
    %cst_151 = arith.constant 1.000000e+00 : f32
    %352 = vector.broadcast %cst_151 : f32 to vector<16x16xf32>
    %353 = arith.subf %352, %346 : vector<16x16xf32>
    %354 = arith.subf %351, %321 : vector<16x16xf32>
    %355 = arith.mulf %353, %354 : vector<16x16xf32>
    %356 = arith.addf %321, %355 : vector<16x16xf32>
    %cst_152 = arith.constant dense<0.000000e+00> : vector<16x16xf32>
    %357 = tpu.matmul %356, %0, %cst_152 {dimension_numbers = #tpu.dot_dimension_numbers<[1], [0], [0], [1], [0, 0, 1, 1], [], []>} : vector<16x16xf32>, vector<16x16xf32>, vector<16x16xf32> -> vector<16x16xf32>
    %358 = vector.broadcast %3 : vector<1x16xf32> to vector<16x16xf32>
    %359 = arith.addf %357, %358 : vector<16x16xf32>
    %cst_153 = arith.constant dense<0.000000e+00> : vector<16x16xf32>
    %360 = tpu.matmul %356, %1, %cst_153 {dimension_numbers = #tpu.dot_dimension_numbers<[1], [0], [0], [1], [0, 0, 1, 1], [], []>} : vector<16x16xf32>, vector<16x16xf32>, vector<16x16xf32> -> vector<16x16xf32>
    %361 = vector.broadcast %4 : vector<1x16xf32> to vector<16x16xf32>
    %362 = arith.addf %360, %361 : vector<16x16xf32>
    %cst_154 = arith.constant dense<0.000000e+00> : vector<16x16xf32>
    %363 = tpu.matmul %356, %2, %cst_154 {dimension_numbers = #tpu.dot_dimension_numbers<[1], [0], [0], [1], [0, 0, 1, 1], [], []>} : vector<16x16xf32>, vector<16x16xf32>, vector<16x16xf32> -> vector<16x16xf32>
    %364 = vector.broadcast %5 : vector<1x16xf32> to vector<16x16xf32>
    %365 = arith.addf %363, %364 : vector<16x16xf32>
    %c10 = arith.constant 10 : index
    %c0_155 = arith.constant 0 : index
    %c0_156 = arith.constant 0 : index
    %366 = vector.load %arg0[%c10, %c0_155, %c0_156] : memref<12x16x16xf32, #tpu.memory_space<vmem>>, vector<1x16x16xf32>
    %367 = vector.shape_cast %366 : vector<1x16x16xf32> to vector<16x16xf32>
    %368 = arith.addf %367, %359 : vector<16x16xf32>
    %369 = arith.negf %368 : vector<16x16xf32>
    %370 = math.exp %369 : vector<16x16xf32>
    %cst_157 = arith.constant 1.000000e+00 : f32
    %371 = vector.broadcast %cst_157 : f32 to vector<16x16xf32>
    %372 = arith.addf %371, %370 : vector<16x16xf32>
    %373 = arith.divf %371, %372 : vector<16x16xf32>
    %c10_158 = arith.constant 10 : index
    %c0_159 = arith.constant 0 : index
    %c0_160 = arith.constant 0 : index
    %374 = vector.load %arg1[%c10_158, %c0_159, %c0_160] : memref<12x16x16xf32, #tpu.memory_space<vmem>>, vector<1x16x16xf32>
    %375 = vector.shape_cast %374 : vector<1x16x16xf32> to vector<16x16xf32>
    %376 = arith.addf %375, %362 : vector<16x16xf32>
    %377 = arith.negf %376 : vector<16x16xf32>
    %378 = math.exp %377 : vector<16x16xf32>
    %cst_161 = arith.constant 1.000000e+00 : f32
    %379 = vector.broadcast %cst_161 : f32 to vector<16x16xf32>
    %380 = arith.addf %379, %378 : vector<16x16xf32>
    %381 = arith.divf %379, %380 : vector<16x16xf32>
    %c10_162 = arith.constant 10 : index
    %c0_163 = arith.constant 0 : index
    %c0_164 = arith.constant 0 : index
    %382 = vector.load %arg2[%c10_162, %c0_163, %c0_164] : memref<12x16x16xf32, #tpu.memory_space<vmem>>, vector<1x16x16xf32>
    %383 = vector.shape_cast %382 : vector<1x16x16xf32> to vector<16x16xf32>
    %384 = arith.mulf %373, %365 : vector<16x16xf32>
    %385 = arith.addf %383, %384 : vector<16x16xf32>
    %386 = math.tanh %385 : vector<16x16xf32>
    %cst_165 = arith.constant 1.000000e+00 : f32
    %387 = vector.broadcast %cst_165 : f32 to vector<16x16xf32>
    %388 = arith.subf %387, %381 : vector<16x16xf32>
    %389 = arith.subf %386, %356 : vector<16x16xf32>
    %390 = arith.mulf %388, %389 : vector<16x16xf32>
    %391 = arith.addf %356, %390 : vector<16x16xf32>
    %cst_166 = arith.constant dense<0.000000e+00> : vector<16x16xf32>
    %392 = tpu.matmul %391, %0, %cst_166 {dimension_numbers = #tpu.dot_dimension_numbers<[1], [0], [0], [1], [0, 0, 1, 1], [], []>} : vector<16x16xf32>, vector<16x16xf32>, vector<16x16xf32> -> vector<16x16xf32>
    %393 = vector.broadcast %3 : vector<1x16xf32> to vector<16x16xf32>
    %394 = arith.addf %392, %393 : vector<16x16xf32>
    %cst_167 = arith.constant dense<0.000000e+00> : vector<16x16xf32>
    %395 = tpu.matmul %391, %1, %cst_167 {dimension_numbers = #tpu.dot_dimension_numbers<[1], [0], [0], [1], [0, 0, 1, 1], [], []>} : vector<16x16xf32>, vector<16x16xf32>, vector<16x16xf32> -> vector<16x16xf32>
    %396 = vector.broadcast %4 : vector<1x16xf32> to vector<16x16xf32>
    %397 = arith.addf %395, %396 : vector<16x16xf32>
    %cst_168 = arith.constant dense<0.000000e+00> : vector<16x16xf32>
    %398 = tpu.matmul %391, %2, %cst_168 {dimension_numbers = #tpu.dot_dimension_numbers<[1], [0], [0], [1], [0, 0, 1, 1], [], []>} : vector<16x16xf32>, vector<16x16xf32>, vector<16x16xf32> -> vector<16x16xf32>
    %399 = vector.broadcast %5 : vector<1x16xf32> to vector<16x16xf32>
    %400 = arith.addf %398, %399 : vector<16x16xf32>
    %c11 = arith.constant 11 : index
    %c0_169 = arith.constant 0 : index
    %c0_170 = arith.constant 0 : index
    %401 = vector.load %arg0[%c11, %c0_169, %c0_170] : memref<12x16x16xf32, #tpu.memory_space<vmem>>, vector<1x16x16xf32>
    %402 = vector.shape_cast %401 : vector<1x16x16xf32> to vector<16x16xf32>
    %403 = arith.addf %402, %394 : vector<16x16xf32>
    %404 = arith.negf %403 : vector<16x16xf32>
    %405 = math.exp %404 : vector<16x16xf32>
    %cst_171 = arith.constant 1.000000e+00 : f32
    %406 = vector.broadcast %cst_171 : f32 to vector<16x16xf32>
    %407 = arith.addf %406, %405 : vector<16x16xf32>
    %408 = arith.divf %406, %407 : vector<16x16xf32>
    %c11_172 = arith.constant 11 : index
    %c0_173 = arith.constant 0 : index
    %c0_174 = arith.constant 0 : index
    %409 = vector.load %arg1[%c11_172, %c0_173, %c0_174] : memref<12x16x16xf32, #tpu.memory_space<vmem>>, vector<1x16x16xf32>
    %410 = vector.shape_cast %409 : vector<1x16x16xf32> to vector<16x16xf32>
    %411 = arith.addf %410, %397 : vector<16x16xf32>
    %412 = arith.negf %411 : vector<16x16xf32>
    %413 = math.exp %412 : vector<16x16xf32>
    %cst_175 = arith.constant 1.000000e+00 : f32
    %414 = vector.broadcast %cst_175 : f32 to vector<16x16xf32>
    %415 = arith.addf %414, %413 : vector<16x16xf32>
    %416 = arith.divf %414, %415 : vector<16x16xf32>
    %c11_176 = arith.constant 11 : index
    %c0_177 = arith.constant 0 : index
    %c0_178 = arith.constant 0 : index
    %417 = vector.load %arg2[%c11_176, %c0_177, %c0_178] : memref<12x16x16xf32, #tpu.memory_space<vmem>>, vector<1x16x16xf32>
    %418 = vector.shape_cast %417 : vector<1x16x16xf32> to vector<16x16xf32>
    %419 = arith.mulf %408, %400 : vector<16x16xf32>
    %420 = arith.addf %418, %419 : vector<16x16xf32>
    %421 = math.tanh %420 : vector<16x16xf32>
    %cst_179 = arith.constant 1.000000e+00 : f32
    %422 = vector.broadcast %cst_179 : f32 to vector<16x16xf32>
    %423 = arith.subf %422, %416 : vector<16x16xf32>
    %424 = arith.subf %421, %391 : vector<16x16xf32>
    %425 = arith.mulf %423, %424 : vector<16x16xf32>
    %426 = arith.addf %391, %425 : vector<16x16xf32>
    %c0_180 = arith.constant 0 : index
    %c0_181 = arith.constant 0 : index
    %427 = vector.load %arg3[%c0_180, %c0_181] : memref<16x16xbf16, #tpu.memory_space<vmem>>, vector<16x16xbf16>
    %c0_182 = arith.constant 0 : index
    %c0_183 = arith.constant 0 : index
    %428 = vector.load %arg12[%c0_182, %c0_183] : memref<16x32xbf16, #tpu.memory_space<vmem>>, vector<16x32xbf16>
    %c0_184 = arith.constant 0 : index
    %c0_185 = arith.constant 0 : index
    %429 = vector.load %arg13[%c0_184, %c0_185] : memref<1x32xf32, #tpu.memory_space<vmem>>, vector<1x32xf32>
    %430 = arith.truncf %426 : vector<16x16xf32> to vector<16x16xbf16>
    %cst_186 = arith.constant dense<0.000000e+00> : vector<16x32xf32>
    %431 = tpu.matmul %430, %428, %cst_186 {dimension_numbers = #tpu.dot_dimension_numbers<[1], [0], [0], [1], [0, 0, 1, 1], [], []>} : vector<16x16xbf16>, vector<16x32xbf16>, vector<16x32xf32> -> vector<16x32xf32>
    %432 = arith.truncf %431 : vector<16x32xf32> to vector<16x32xbf16>
    %cst_187 = arith.constant dense<0.000000e+00> : vector<16x32xf32>
    %433 = tpu.matmul %427, %432, %cst_187 {dimension_numbers = #tpu.dot_dimension_numbers<[1], [0], [0], [1], [0, 0, 1, 1], [], []>} : vector<16x16xbf16>, vector<16x32xbf16>, vector<16x32xf32> -> vector<16x32xf32>
    %434 = vector.broadcast %429 : vector<1x32xf32> to vector<16x32xf32>
    %435 = arith.addf %433, %434 : vector<16x32xf32>
    %c0_188 = arith.constant 0 : index
    %436 = memref.load %arg11[%c0_188] : memref<4xf32, #tpu.memory_space<smem>>
    %cst_189 = arith.constant 0.000000e+00 : f32
    %437 = vector.broadcast %cst_189 : f32 to vector<16x32xf32>
    %438 = arith.cmpf oge, %435, %437 : vector<16x32xf32>
    %439 = vector.broadcast %436 : f32 to vector<16x32xf32>
    %440 = arith.mulf %439, %435 : vector<16x32xf32>
    %441 = arith.select %438, %435, %440 : vector<16x32xi1>, vector<16x32xf32>
    %c0_190 = arith.constant 0 : index
    %c0_191 = arith.constant 0 : index
    %442 = vector.load %arg14[%c0_190, %c0_191] : memref<32x32xbf16, #tpu.memory_space<vmem>>, vector<32x32xbf16>
    %c0_192 = arith.constant 0 : index
    %c0_193 = arith.constant 0 : index
    %443 = vector.load %arg15[%c0_192, %c0_193] : memref<1x32xf32, #tpu.memory_space<vmem>>, vector<1x32xf32>
    %444 = arith.truncf %441 : vector<16x32xf32> to vector<16x32xbf16>
    %cst_194 = arith.constant dense<0.000000e+00> : vector<16x32xf32>
    %445 = tpu.matmul %444, %442, %cst_194 {dimension_numbers = #tpu.dot_dimension_numbers<[1], [0], [0], [1], [0, 0, 1, 1], [], []>} : vector<16x32xbf16>, vector<32x32xbf16>, vector<16x32xf32> -> vector<16x32xf32>
    %446 = arith.truncf %445 : vector<16x32xf32> to vector<16x32xbf16>
    %cst_195 = arith.constant dense<0.000000e+00> : vector<16x32xf32>
    %447 = tpu.matmul %427, %446, %cst_195 {dimension_numbers = #tpu.dot_dimension_numbers<[1], [0], [0], [1], [0, 0, 1, 1], [], []>} : vector<16x16xbf16>, vector<16x32xbf16>, vector<16x32xf32> -> vector<16x32xf32>
    %448 = vector.broadcast %443 : vector<1x32xf32> to vector<16x32xf32>
    %449 = arith.addf %447, %448 : vector<16x32xf32>
    %c1_196 = arith.constant 1 : index
    %450 = memref.load %arg11[%c1_196] : memref<4xf32, #tpu.memory_space<smem>>
    %cst_197 = arith.constant 0.000000e+00 : f32
    %451 = vector.broadcast %cst_197 : f32 to vector<16x32xf32>
    %452 = arith.cmpf oge, %449, %451 : vector<16x32xf32>
    %453 = vector.broadcast %450 : f32 to vector<16x32xf32>
    %454 = arith.mulf %453, %449 : vector<16x32xf32>
    %455 = arith.select %452, %449, %454 : vector<16x32xi1>, vector<16x32xf32>
    %c0_198 = arith.constant 0 : index
    %c0_199 = arith.constant 0 : index
    %456 = vector.load %arg16[%c0_198, %c0_199] : memref<32x32xbf16, #tpu.memory_space<vmem>>, vector<32x32xbf16>
    %c0_200 = arith.constant 0 : index
    %c0_201 = arith.constant 0 : index
    %457 = vector.load %arg17[%c0_200, %c0_201] : memref<1x32xf32, #tpu.memory_space<vmem>>, vector<1x32xf32>
    %458 = arith.truncf %455 : vector<16x32xf32> to vector<16x32xbf16>
    %cst_202 = arith.constant dense<0.000000e+00> : vector<16x32xf32>
    %459 = tpu.matmul %458, %456, %cst_202 {dimension_numbers = #tpu.dot_dimension_numbers<[1], [0], [0], [1], [0, 0, 1, 1], [], []>} : vector<16x32xbf16>, vector<32x32xbf16>, vector<16x32xf32> -> vector<16x32xf32>
    %460 = arith.truncf %459 : vector<16x32xf32> to vector<16x32xbf16>
    %cst_203 = arith.constant dense<0.000000e+00> : vector<16x32xf32>
    %461 = tpu.matmul %427, %460, %cst_203 {dimension_numbers = #tpu.dot_dimension_numbers<[1], [0], [0], [1], [0, 0, 1, 1], [], []>} : vector<16x16xbf16>, vector<16x32xbf16>, vector<16x32xf32> -> vector<16x32xf32>
    %462 = vector.broadcast %457 : vector<1x32xf32> to vector<16x32xf32>
    %463 = arith.addf %461, %462 : vector<16x32xf32>
    %c2_204 = arith.constant 2 : index
    %464 = memref.load %arg11[%c2_204] : memref<4xf32, #tpu.memory_space<smem>>
    %cst_205 = arith.constant 0.000000e+00 : f32
    %465 = vector.broadcast %cst_205 : f32 to vector<16x32xf32>
    %466 = arith.cmpf oge, %463, %465 : vector<16x32xf32>
    %467 = vector.broadcast %464 : f32 to vector<16x32xf32>
    %468 = arith.mulf %467, %463 : vector<16x32xf32>
    %469 = arith.select %466, %463, %468 : vector<16x32xi1>, vector<16x32xf32>
    %c0_206 = arith.constant 0 : index
    %c0_207 = arith.constant 0 : index
    %470 = vector.load %arg18[%c0_206, %c0_207] : memref<32x32xbf16, #tpu.memory_space<vmem>>, vector<32x32xbf16>
    %c0_208 = arith.constant 0 : index
    %c0_209 = arith.constant 0 : index
    %471 = vector.load %arg19[%c0_208, %c0_209] : memref<1x32xf32, #tpu.memory_space<vmem>>, vector<1x32xf32>
    %472 = arith.truncf %469 : vector<16x32xf32> to vector<16x32xbf16>
    %cst_210 = arith.constant dense<0.000000e+00> : vector<16x32xf32>
    %473 = tpu.matmul %472, %470, %cst_210 {dimension_numbers = #tpu.dot_dimension_numbers<[1], [0], [0], [1], [0, 0, 1, 1], [], []>} : vector<16x32xbf16>, vector<32x32xbf16>, vector<16x32xf32> -> vector<16x32xf32>
    %474 = arith.truncf %473 : vector<16x32xf32> to vector<16x32xbf16>
    %cst_211 = arith.constant dense<0.000000e+00> : vector<16x32xf32>
    %475 = tpu.matmul %427, %474, %cst_211 {dimension_numbers = #tpu.dot_dimension_numbers<[1], [0], [0], [1], [0, 0, 1, 1], [], []>} : vector<16x16xbf16>, vector<16x32xbf16>, vector<16x32xf32> -> vector<16x32xf32>
    %476 = vector.broadcast %471 : vector<1x32xf32> to vector<16x32xf32>
    %477 = arith.addf %475, %476 : vector<16x32xf32>
    %c3_212 = arith.constant 3 : index
    %478 = memref.load %arg11[%c3_212] : memref<4xf32, #tpu.memory_space<smem>>
    %cst_213 = arith.constant 0.000000e+00 : f32
    %479 = vector.broadcast %cst_213 : f32 to vector<16x32xf32>
    %480 = arith.cmpf oge, %477, %479 : vector<16x32xf32>
    %481 = vector.broadcast %478 : f32 to vector<16x32xf32>
    %482 = arith.mulf %481, %477 : vector<16x32xf32>
    %483 = arith.select %480, %477, %482 : vector<16x32xi1>, vector<16x32xf32>
    %c0_214 = arith.constant 0 : index
    %c0_215 = arith.constant 0 : index
    %484 = vector.load %arg20[%c0_214, %c0_215] : memref<16x32xf32, #tpu.memory_space<vmem>>, vector<16x32xf32>
    tpu.vector_store %arg20[%c0_214, %c0_215], %483 {strides = array<i32>} : memref<16x32xf32, #tpu.memory_space<vmem>>, vector<16x32xf32>,
    %c0_216 = arith.constant 0 : index
    %c0_217 = arith.constant 0 : index
    %485 = vector.load %arg4[%c0_216, %c0_217] : memref<2x16xf32, #tpu.memory_space<vmem>>, vector<2x16xf32>
    %cst_218 = arith.constant dense<0.000000e+00> : vector<2x32xf32>
    %486 = tpu.matmul %485, %483, %cst_218 {dimension_numbers = #tpu.dot_dimension_numbers<[1], [0], [0], [1], [0, 0, 1, 1], [], []>} : vector<2x16xf32>, vector<16x32xf32>, vector<2x32xf32> -> vector<2x32xf32>
    %c0_219 = arith.constant 0 : index
    %c0_220 = arith.constant 0 : index
    %487 = vector.load %arg21[%c0_219, %c0_220] : memref<2x32xf32, #tpu.memory_space<vmem>>, vector<2x32xf32>
    tpu.vector_store %arg21[%c0_219, %c0_220], %486 {strides = array<i32>} : memref<2x32xf32, #tpu.memory_space<vmem>>, vector<2x32xf32>,
    return
  }
}

</mosaic_0001>

<bundles_post_ra>
// kernel: brain_gnn_forward.1
= control target key start
LH: loop header
LB: loop body
LE: loop exit
PB: predicated region body
PF: predicated region fallthrough
CT: control target
= control target key end

     0   :  { %s4091_s0 = inlined_call_operand.vmem [shape: f32[12,16,16], index: 0, kind: input, shape index: {}]   ;;  %s4092_s1 = inlined_call_operand.vmem [shape: f32[12,16,16], index: 1, kind: input, shape index: {}]   ;;  %s4093_s2 = inlined_call_operand.vmem [shape: f32[12,16,16], index: 2, kind: input, shape index: {}]   ;;  %s4094_s3 = inlined_call_operand.vmem [shape: bf16[16,16], index: 3, kind: input, shape index: {}]   ;;  %s4095_s4 = inlined_call_operand.vmem [shape: f32[2,16], index: 4, kind: input, shape index: {}]   ;;  %s4096_s5 = inlined_call_operand.vmem [shape: f32[16,16], index: 5, kind: input, shape index: {}]   ;;  %s4097_s6 = inlined_call_operand.vmem [shape: f32[16,16], index: 6, kind: input, shape index: {}]   ;;  %s4098_s7 = inlined_call_operand.vmem [shape: f32[16,16], index: 7, kind: input, shape index: {}]   ;;  %s4099_s8 = inlined_call_operand.vmem [shape: f32[1,16], index: 8, kind: input, shape index: {}]   ;;  %s4100_s9 = inlined_call_operand.vmem [shape: f32[1,16], index: 9, kind: input, shape index: {}]   ;;  %s4101_s10 = inlined_call_operand.vmem [shape: f32[1,16], index: 10, kind: input, shape index: {}]   ;;  %s4102_s11 = inlined_call_operand.vmem [shape: f32[4], index: 11, kind: input, shape index: {}]   ;;  %s4103_s12 = inlined_call_operand.vmem [shape: bf16[16,32], index: 12, kind: input, shape index: {}]   ;;  %s4104_s13 = inlined_call_operand.vmem [shape: f32[1,32], index: 13, kind: input, shape index: {}]   ;;  %s4105_s14 = inlined_call_operand.vmem [shape: bf16[32,32], index: 14, kind: input, shape index: {}]   ;;  %s4106_s15 = inlined_call_operand.vmem [shape: f32[1,32], index: 15, kind: input, shape index: {}]   ;;  %s4107_s16 = inlined_call_operand.vmem [shape: bf16[32,32], index: 16, kind: input, shape index: {}]   ;;  %s4108_s17 = inlined_call_operand.vmem [shape: f32[1,32], index: 17, kind: input, shape index: {}]   ;;  %s4109_s18 = inlined_call_operand.vmem [shape: bf16[32,32], index: 18, kind: input, shape index: {}]   ;;  %s4110_s19 = inlined_call_operand.vmem [shape: f32[1,32], index: 19, kind: input, shape index: {}]   ;;  %s4111_s20 = inlined_call_operand.hbm [shape: f32[16,32], index: 20, kind: output, shape index: {0}]   ;;  %s4112_s21 = inlined_call_operand.hbm [shape: f32[2,32], index: 21, kind: output, shape index: {1}]  }
   0x1   :  { %4117 = sst [smem:[#allocation11_spill]] %s4091_s0 }
   0x2   :  { %4118 = sst [smem:[#allocation12_spill]] %s4092_s1 }
   0x3   :  { %4119 = sst [smem:[#allocation13_spill]] %s4093_s2 }
   0x4   :  { %4120 = sst [smem:[#allocation14_spill]] %s4094_s3 }
   0x5   :  { %4121 = sst [smem:[#allocation15_spill]] %s4095_s4 }
   0x6   :  { %4122 = sst [smem:[#allocation16_spill]] %s4096_s5 }
   0x7   :  { %27 = vsyncpa [#allocation4], 0 }
   0x8   :  { %28 = vsyncpa [#allocation3], 0 }
   0x9   :  { %29 = vsyncpa [#allocation7], 0  ;;  %s57_s26 = sshll.u32 %s4102_s11, 4  ;;  %s3105_s27 = smov [#allocation2]   ;;  %s58_s26 = int_to_ptr.vmem [resolvable:$true] %s57_s26 }
   0xa   :  { %60 = dma.vmem_to_smem %s58_s26, 16, %s3105_s27, [#allocation4]  }
   0xb   :  { %3099 = dma.done.wait [#allocation4], 16  }
   0xc   :  { %3100 = vsyncadd [#allocation4], 4294967280 }
   0xd   :  { %81 = sfence }
   0xe   :  { %s4123_s29 = sld [smem:[#allocation16_spill]]  ;;  %v3232_v1 = vld [vmem:[%s4097_s6 + $0x8] sm:$0xff]  ;;  %v3244_v3 = vld [vmem:[%s4097_s6] sm:$0xff]  ;;  %v3106_v6 = vmov 0.0   ;;  %vm95_vm14 = vcmask 130048   ;;  %s2511_s24 = sshll.u32 %s4111_s20, 4  ;;  %s2512_s24 = int_to_ptr.hbm [resolvable:$true] %s2511_s24 }
   0xf   :  { %139 = vmatpush.msra.mxu1 %v3232_v1  ;;  %v3249_v4 = vld [vmem:[%s4098_s7 + $0x8] sm:$0xff]  ;;  %v3255_v5 = vld [vmem:[%s4098_s7] sm:$0xff]  ;;  %s4124_s4 = sld [smem:[#allocation11_spill]]  ;;  %s2525_s26 = sshll.u32 %s4112_s21, 4  ;;  %s2526_s26 = int_to_ptr.hbm [resolvable:$true] %s2525_s26 }
  0x10   :  { %165 = vmatpush.msra.mxu2 %v3249_v4  ;;  %v3279_v7 = vld [vmem:[%s4099_s8] ss:$0 sm:$0xff]  ;;  %s4125_s11 = sld [smem:[#allocation12_spill]] }
  0x11   :  { %140 = vmatpush.msra.mxu1 %v3244_v3  ;;  %v3284_v8 = vld [vmem:[%s4100_s9] ss:$0 sm:$0xff]  ;;  %s4126_s3 = sld [smem:[#allocation13_spill]] }
  0x12   :  { %141 = vmatmul.f32.vlgmr.msra.gmra.mxu1 %v3106_v6  ;;  %166 = vmatpush.msra.mxu2 %v3255_v5  ;;  %v3307_v42 = vld [vmem:[%s4101_s10] ss:$0 sm:$0xff]  ;;  %s4135_s22 = sld [smem:[#allocation14_spill]] }
  0x13   :  { %167 = vmatmul.f32.vlgmr.msra.gmra.mxu2 %v3106_v6  ;;  %338 = vmatpush.msrb.mxu1 %v3249_v4  ;;  %s2285_s2 = sld [smem:[#allocation2]] }
  0x14   :  { %v3227_v0 = vld [vmem:[%s4123_s29 + $0x8] sm:$0xff]  ;;  %v3237_v2 = vld [vmem:[%s4123_s29] sm:$0xff]  ;;  %s4136_s5 = sld [smem:[#allocation15_spill]] }
  0x15   :  { %113 = vmatpush.msra.mxu0 %v3227_v0  ;;  %292 = vmatpush.msra.mxu3 %v3227_v0  ;;  %v174_v10 = vld [vmem:[%s4124_s4] sm:$0xff]  ;;  %v175_v20 = vld [vmem:[%s4124_s4 + $0x8] sm:$0xff] }
  0x16   :  { %339 = vmatpush.msrb.mxu1 %v3255_v5  ;;  %470 = vmatpush.msrb.mxu2 %v3227_v0  ;;  %v216_v12 = vld [vmem:[%s4125_s11] sm:$0xff]  ;;  %v217_v22 = vld [vmem:[%s4125_s11 + $0x8] sm:$0xff] }
  0x17   :  { %114 = vmatpush.msra.mxu0 %v3237_v2  ;;  %293 = vmatpush.msra.mxu3 %v3237_v2  ;;  %v258_v56 = vld [vmem:[%s4126_s3] sm:$0xff] }
  0x18   :  { %115 = vmatmul.f32.vlgmr.msra.gmra.mxu0 %v3106_v6  ;;  %471 = vmatpush.msrb.mxu2 %v3237_v2 }
  0x19   :  { %315 = vmatpush.msrb.mxu0 %v3232_v1  ;;  %493 = vmatpush.msrb.mxu3 %v3232_v1 }
  0x1a   :  { %648 = vmatpush.msra.mxu1 %v3227_v0  ;;  %671 = vmatpush.msra.mxu2 %v3232_v1 }
  0x1b   :  { %316 = vmatpush.msrb.mxu0 %v3244_v3  ;;  %494 = vmatpush.msrb.mxu3 %v3244_v3 }
  0x1c   :  { %144 = vmatmul.f32.gmra.mxu1 %v3106_v6  ;;  %170 = vmatmul.f32.gmra.mxu2 %v3106_v6 }
  0x1d   :  { %516 = vmatpush.msra.mxu0 %v3249_v4  ;;  %649 = vmatpush.msra.mxu1 %v3237_v2 }
  0x1e   :  { %672 = vmatpush.msra.mxu2 %v3244_v3 }
  0x1f   :  { %517 = vmatpush.msra.mxu0 %v3255_v5 }
  0x20   :  { %118 = vmatmul.f32.gmra.mxu0 %v3106_v6 }
  0x8f   :  { %v142_v11 = vpop.f32.mrf.mxu1 }
  0x90   :  { %v143_v14 = vadd.f32 %v3284_v8, %v142_v11 }
  0x92   :  { %v218_v16 = vadd.f32 %v216_v12, %v143_v14 }
  0x94   :  { %v2542_v18 = vmul.f32 -1.442695, %v218_v16 }
  0x95   :  { %v116_v9 = vpop.f32.mrf.mxu0 }
  0x96   :  { %v117_v13 = vadd.f32 %v3279_v7, %v116_v9  ;;  %v168_v37 = vpop.f32.mrf.mxu2 }
  0x97   :  { %v169_v49 = vadd.f32 %v3307_v42, %v168_v37 }
  0x98   :  { %v176_v15 = vadd.f32 %v174_v10, %v117_v13 }
  0x99   :  { %v145_v21 = vpop.f32.mrf.mxu1 }
  0x9a   :  { %v2540_v17 = vmul.f32 -1.442695, %v176_v15  ;;  %v146_v24 = vadd.f32 %v3284_v8, %v145_v21 }
  0x9c   :  { %2785 = vpow2.f32 %v2540_v17  ;;  %v219_v26 = vadd.f32 %v217_v22, %v146_v24 }
  0x9d   :  { %2787 = vpow2.f32 %v2542_v18  ;;  %v119_v19 = vpop.f32.mrf.mxu0 }
  0x9e   :  { %v120_v23 = vadd.f32 %v3279_v7, %v119_v19  ;;  %v2543_v31 = vmul.f32 -1.442695, %v219_v26 }
  0x9f   :  { %v171_v61 = vpop.f32.mrf.mxu2 }
  0xa0   :  { %v177_v25 = vadd.f32 %v175_v20, %v120_v23  ;;  %v172_v14 = vadd.f32 %v3307_v42, %v171_v61  ;;  %v259_v23 = vld [vmem:[%s4126_s3 + $0x8] sm:$0xff] }
  0xa2   :  { %v2786_v27 = vpop.eup %2785  ;;  %v2541_v28 = vmul.f32 -1.442695, %v177_v25 }
  0xa3   :  { %v2788_v29 = vpop.eup %2787  ;;  %v184_v30 = vadd.f32 1.0, %v2786_v27 }
  0xa4   :  { %v226_v32 = vadd.f32 1.0, %v2788_v29  ;;  %2789 = vpow2.f32 %v2541_v28 }
  0xa5   :  { %2791 = vrcp.f32 %v184_v30  ;;  %v197_v45 = vand.u32 2147483648, %v184_v30  ;;  %v195_v47 = vand.u32 2147483647, %v184_v30  ;;  %vm191_vm1 = vweird.f32 %v184_v30 }
  0xa6   :  { %2793 = vrcp.f32 %v226_v32  ;;  %vm233_vm4 = vweird.f32 %v226_v32  ;;  %v239_v59 = vand.u32 2147483648, %v226_v32  ;;  %v237_v9 = vand.u32 2147483647, %v226_v32 }
  0xa7   :  { %2795 = vpow2.f32 %v2543_v31  ;;  %v198_v52 = vor.u32 1.1754944e-38, %v197_v45  ;;  %vm196_vm3 = vcmp.eq.f32.partialorder %v195_v47, 8.507059e+37  ;;  %v2550_v45 = vld [vmem:[%s4124_s4 + $0x10] sm:$0xff] }
  0xa8   :  { %v240_v16 = vor.u32 1.1754944e-38, %v239_v59  ;;  %vm238_vm10 = vcmp.eq.f32.partialorder %v237_v9, 8.507059e+37 }
  0xaa   :  { %v2790_v33 = vpop.eup %2789 }
  0xab   :  { %v2792_v34 = vpop.eup %2791  ;;  %v185_v35 = vadd.f32 1.0, %v2790_v33 }
  0xac   :  { %v2794_v36 = vpop.eup %2793  ;;  %v187_v38 = vmul.f32 %v2792_v34, %v184_v30  ;;  %vm192_vm0 = vweird.f32 %v2792_v34 }
  0xad   :  { %v2796_v39 = vpop.eup %2795  ;;  %v229_v40 = vmul.f32 %v2794_v36, %v226_v32  ;;  %2797 = vrcp.f32 %v185_v35  ;;  %vm193_vm2 = vmor %vm191_vm1, %vm192_vm0  ;;  %vm234_vm5 = vweird.f32 %v2794_v36  ;;  %v212_v6 = vand.u32 2147483648, %v185_v35 }
  0xae   :  { %v3302_v41 = vadd.f32 1.0, %v2796_v39  ;;  %v188_v43 = vsub.f32 1.0, %v187_v38  ;;  %v210_v12 = vand.u32 2147483647, %v185_v35  ;;  %vm235_vm7 = vmor %vm233_vm4, %vm234_vm5  ;;  %vm206_vm8 = vweird.f32 %v185_v35  ;;  %v2554_v39 = vld [vmem:[%s4125_s11 + $0x10] sm:$0xff] }
  0xaf   :  { %v230_v44 = vsub.f32 1.0, %v229_v40  ;;  %v213_v19 = vor.u32 1.1754944e-38, %v212_v6 }
  0xb0   :  { %2799 = vrcp.f32 %v3302_v41  ;;  %v189_v46 = vmul.f32 %v2792_v34, %v188_v43  ;;  %vm211_vm11 = vcmp.eq.f32.partialorder %v210_v12, 8.507059e+37  ;;  %vm248_vm12 = vweird.f32 %v3302_v41 }
  0xb1   :  { %v231_v48 = vmul.f32 %v2794_v36, %v230_v44  ;;  %v254_v25 = vand.u32 2147483648, %v3302_v41  ;;  %v252_v28 = vand.u32 2147483647, %v3302_v41 }
  0xb2   :  { %v190_v50 = vadd.f32 %v2792_v34, %v189_v46 }
  0xb3   :  { %v2798_v51 = vpop.eup %2797  ;;  %v232_v57 = vadd.f32 %v2794_v36, %v231_v48  ;;  %v255_v33 = vor.u32 1.1754944e-38, %v254_v25  ;;  %vm253_vm0 = vcmp.eq.f32.partialorder %v252_v28, 8.507059e+37  ;;  %v2555_v48 = vld [vmem:[%s4125_s11 + $0x18] sm:$0xff] }
  0xb4   :  { %v194_v53 = vsel %vm193_vm2, %v2792_v34, %v190_v50  ;;  %v202_v54 = vmul.f32 %v2798_v51, %v185_v35  ;;  %vm207_vm6 = vweird.f32 %v2798_v51 }
  0xb5   :  { %v199_v55 = vsel %vm196_vm3, %v198_v52, %v194_v53  ;;  %v236_v15 = vsel %vm235_vm7, %v2794_v36, %v232_v57  ;;  %vm208_vm9 = vmor %vm206_vm8, %vm207_vm6 }
  0xb6   :  { %v2800_v58 = vpop.eup %2799  ;;  %v260_v60 = vmul.f32 %v199_v55, %v169_v49  ;;  %v203_v62 = vsub.f32 1.0, %v202_v54  ;;  %v241_v21 = vsel %vm238_vm10, %v240_v16, %v236_v15 }
  0xb7   :  { %v244_v63 = vmul.f32 %v2800_v58, %v3302_v41  ;;  %vm249_vm13 = vweird.f32 %v2800_v58  ;;  %v266_v27 = vsub.f32 1.0, %v241_v21 }
  0xb8   :  { %v262_v10 = vadd.f32 %v260_v60, %v258_v56  ;;  %v204_v11 = vmul.f32 %v2798_v51, %v203_v62  ;;  %vm250_vm15 = vmor %vm248_vm12, %vm249_vm13  ;;  %v2551_v56 = vld [vmem:[%s4124_s4 + $0x18] sm:$0xff] }
  0xb9   :  { %v245_v13 = vsub.f32 1.0, %v244_v63 }
  0xba   :  { %2801 = vtanh.f32 %v262_v10  ;;  %v205_v17 = vadd.f32 %v2798_v51, %v204_v11 }
  0xbb   :  { %v246_v18 = vmul.f32 %v2800_v58, %v245_v13 }
  0xbc   :  { %v209_v20 = vsel %vm208_vm9, %v2798_v51, %v205_v17 }
  0xbd   :  { %v214_v22 = vsel %vm211_vm11, %v213_v19, %v209_v20  ;;  %v247_v24 = vadd.f32 %v2800_v58, %v246_v18 }
  0xbe   :  { %v261_v26 = vmul.f32 %v214_v22, %v172_v14 }
  0xbf   :  { %v251_v32 = vsel %vm250_vm15, %v2800_v58, %v247_v24 }
  0xc0   :  { %v2802_v29 = vpop.eup %2801  ;;  %v263_v30 = vadd.f32 %v261_v26, %v259_v23  ;;  %v256_v34 = vsel %vm253_vm0, %v255_v33, %v251_v32  ;;  %v2558_v32 = vld [vmem:[%s4126_s3 + $0x10] sm:$0xff] }
  0xc1   :  { %v3323_v31 = vmul.f32 %v2802_v29, %v266_v27  ;;  %v267_v35 = vsub.f32 1.0, %v256_v34 }
  0xc2   :  { %2803 = vtanh.f32 %v263_v30 }
  0xc3   :  { %2544 = vmatmul.msk.f32.vlgmr.msra.gmra.mxu3 %vm95_vm14, %v3323_v31  ;;  %2546 = vmatmul.msk.f32.vlgmr.msrb.gmra.mxu0 %vm95_vm14, %v3323_v31 }
  0xc4   :  { %2548 = vmatmul.msk.f32.vlgmr.msrb.gmra.mxu1 %vm95_vm14, %v3323_v31  ;;  %694 = vmatpush.msra.mxu3 %v3249_v4 }
  0xc5   :  { %826 = vmatpush.msrb.mxu0 %v3227_v0  ;;  %849 = vmatpush.msrb.mxu1 %v3232_v1 }
  0xc6   :  { %695 = vmatpush.msra.mxu3 %v3255_v5 }
  0xc7   :  { %827 = vmatpush.msrb.mxu0 %v3237_v2  ;;  %850 = vmatpush.msrb.mxu1 %v3244_v3 }
  0xc8   :  { %v2804_v36 = vpop.eup %2803 }
  0xc9   :  { %v3337_v37 = vmul.f32 %v2804_v36, %v267_v35 }
  0xcb   :  { %2545 = vmatmul.msk.f32.gmra.mxu3 %vm95_vm14, %v3337_v37  ;;  %2547 = vmatmul.msk.f32.gmra.mxu0 %vm95_vm14, %v3337_v37 }
  0xcc   :  { %2549 = vmatmul.msk.f32.gmra.mxu1 %vm95_vm14, %v3337_v37 }
 0x140   :  { %v318_v38 = vpop.f32.mrf.mxu0 }
 0x141   :  { %v319_v40 = vadd.f32 %v3284_v8, %v318_v38  ;;  %v341_v17 = vpop.f32.mrf.mxu1 }
 0x142   :  { %v342_v27 = vadd.f32 %v3307_v42, %v341_v17 }
 0x143   :  { %v393_v41 = vadd.f32 %v2554_v39, %v319_v40 }
 0x145   :  { %v2556_v43 = vmul.f32 -1.442695, %v393_v41 }
 0x146   :  { %v295_v44 = vpop.f32.mrf.mxu3 }
 0x147   :  { %2805 = vpow2.f32 %v2556_v43  ;;  %v296_v46 = vadd.f32 %v3279_v7, %v295_v44 }
 0x148   :  { %v321_v47 = vpop.f32.mrf.mxu0 }
 0x149   :  { %v350_v49 = vadd.f32 %v2550_v45, %v296_v46  ;;  %v322_v50 = vadd.f32 %v3284_v8, %v321_v47  ;;  %v344_v45 = vpop.f32.mrf.mxu1 }
 0x14b   :  { %v2552_v51 = vmul.f32 -1.442695, %v350_v49  ;;  %v394_v52 = vadd.f32 %v2555_v48, %v322_v50 }
 0x14d   :  { %v2806_v53 = vpop.eup %2805  ;;  %2807 = vpow2.f32 %v2552_v51  ;;  %v2557_v54 = vmul.f32 -1.442695, %v394_v52  ;;  %v345_v52 = vadd.f32 %v3307_v42, %v344_v45 }
 0x14e   :  { %v298_v55 = vpop.f32.mrf.mxu3  ;;  %v3360_v57 = vadd.f32 1.0, %v2806_v53 }
 0x14f   :  { %2809 = vpow2.f32 %v2557_v54  ;;  %v299_v58 = vadd.f32 %v3279_v7, %v298_v55  ;;  %v2559_v55 = vld [vmem:[%s4126_s3 + $0x18] sm:$0xff] }
 0x150   :  { %2811 = vrcp.f32 %v3360_v57  ;;  %v414_v33 = vand.u32 2147483648, %v3360_v57  ;;  %vm408_vm7 = vweird.f32 %v3360_v57  ;;  %v412_v44 = vand.u32 2147483647, %v3360_v57 }
 0x151   :  { %v351_v59 = vadd.f32 %v2551_v56, %v299_v58 }
 0x152   :  { %v415_v51 = vor.u32 1.1754944e-38, %v414_v33  ;;  %vm413_vm12 = vcmp.eq.f32.partialorder %v412_v44, 8.507059e+37 }
 0x153   :  { %v2808_v60 = vpop.eup %2807  ;;  %v2553_v61 = vmul.f32 -1.442695, %v351_v59 }
 0x154   :  { %v358_v62 = vadd.f32 1.0, %v2808_v60 }
 0x155   :  { %v2810_v63 = vpop.eup %2809  ;;  %2813 = vpow2.f32 %v2553_v61 }
 0x156   :  { %2815 = vrcp.f32 %v358_v62  ;;  %v3364_v6 = vadd.f32 1.0, %v2810_v63  ;;  %v2812_v9 = vpop.eup %2811  ;;  %v371_v18 = vand.u32 2147483648, %v358_v62  ;;  %v369_v21 = vand.u32 2147483647, %v358_v62 }
 0x157   :  { %v404_v12 = vmul.f32 %v2812_v9, %v3360_v57  ;;  %vm365_vm2 = vweird.f32 %v358_v62  ;;  %vm409_vm5 = vweird.f32 %v2812_v9 }
 0x158   :  { %2817 = vrcp.f32 %v3364_v6  ;;  %v372_v25 = vor.u32 1.1754944e-38, %v371_v18  ;;  %vm370_vm4 = vcmp.eq.f32.partialorder %v369_v21, 8.507059e+37  ;;  %vm3379_vm8 = vmor %vm408_vm7, %vm409_vm5  ;;  %v429_v60 = vand.u32 2147483648, %v3364_v6 }
 0x159   :  { %v405_v16 = vsub.f32 1.0, %v404_v12  ;;  %vm423_vm15 = vweird.f32 %v3364_v6 }
 0x15a   :  { %v430_v12 = vor.u32 1.1754944e-38, %v429_v60 }
 0x15b   :  { %v2814_v10 = vpop.eup %2813  ;;  %v406_v24 = vmul.f32 %v2812_v9, %v405_v16 }
 0x15c   :  { %v2816_v11 = vpop.eup %2815  ;;  %v359_v13 = vadd.f32 1.0, %v2814_v10 }
 0x15d   :  { %v361_v14 = vmul.f32 %v2816_v11, %v358_v62  ;;  %vm366_vm1 = vweird.f32 %v2816_v11  ;;  %v407_v36 = vadd.f32 %v2812_v9, %v406_v24  ;;  %v427_v62 = vand.u32 2147483647, %v3364_v6 }
 0x15e   :  { %2819 = vrcp.f32 %v359_v13  ;;  %v3368_v19 = vpop.eup %2817  ;;  %vm367_vm3 = vmor %vm365_vm2, %vm366_vm1  ;;  %v386_v39 = vand.u32 2147483648, %v359_v13  ;;  %v384_v41 = vand.u32 2147483647, %v359_v13  ;;  %vm380_vm9 = vweird.f32 %v359_v13 }
 0x15f   :  { %v362_v15 = vsub.f32 1.0, %v361_v14  ;;  %v419_v26 = vmul.f32 %v3368_v19, %v3364_v6  ;;  %v411_v50 = vsel %vm3379_vm8, %v2812_v9, %v407_v36  ;;  %vm424_vm13 = vweird.f32 %v3368_v19 }
 0x160   :  { %v387_v49 = vor.u32 1.1754944e-38, %v386_v39  ;;  %vm385_vm11 = vcmp.eq.f32.partialorder %v384_v41, 8.507059e+37  ;;  %v416_v57 = vsel %vm413_vm12, %v415_v51, %v411_v50  ;;  %vm425_vm0 = vmor %vm423_vm15, %vm424_vm13  ;;  %vm428_vm1 = vcmp.eq.f32.partialorder %v427_v62, 8.507059e+37 }
 0x161   :  { %v363_v20 = vmul.f32 %v2816_v11, %v362_v15  ;;  %v420_v38 = vsub.f32 1.0, %v419_v26  ;;  %v442_v63 = vsub.f32 1.0, %v416_v57 }
 0x163   :  { %v364_v22 = vadd.f32 %v2816_v11, %v363_v20  ;;  %v421_v48 = vmul.f32 %v3368_v19, %v420_v38 }
 0x164   :  { %v2820_v23 = vpop.eup %2819 }
 0x165   :  { %v368_v28 = vsel %vm367_vm3, %v2816_v11, %v364_v22  ;;  %v376_v29 = vmul.f32 %v2820_v23, %v359_v13  ;;  %vm381_vm6 = vweird.f32 %v2820_v23  ;;  %v422_v58 = vadd.f32 %v3368_v19, %v421_v48 }
 0x166   :  { %v373_v30 = vsel %vm370_vm4, %v372_v25, %v368_v28  ;;  %vm382_vm10 = vmor %vm380_vm9, %vm381_vm6  ;;  %v2567_v28 = vld [vmem:[%s4124_s4 + $0x28] sm:$0xff] }
 0x167   :  { %v436_v34 = vmul.f32 %v373_v30, %v342_v27  ;;  %v377_v35 = vsub.f32 1.0, %v376_v29  ;;  %v426_v11 = vsel %vm425_vm0, %v3368_v19, %v422_v58  ;;  %v2566_v19 = vld [vmem:[%s4124_s4 + $0x20] sm:$0xff]  ;;  %v2571_v30 = vld [vmem:[%s4125_s11 + $0x28] sm:$0xff] }
 0x168   :  { %v431_v14 = vsel %vm428_vm1, %v430_v12, %v426_v11  ;;  %v2574_v11 = vld [vmem:[%s4126_s3 + $0x20] sm:$0xff] }
 0x169   :  { %v378_v40 = vmul.f32 %v2820_v23, %v377_v35  ;;  %v438_v43 = vadd.f32 %v2558_v32, %v436_v34  ;;  %v443_v15 = vsub.f32 1.0, %v431_v14 }
 0x16b   :  { %v379_v47 = vadd.f32 %v2820_v23, %v378_v40  ;;  %2821 = vtanh.f32 %v438_v43 }
 0x16d   :  { %v383_v53 = vsel %vm382_vm10, %v2820_v23, %v379_v47 }
 0x16e   :  { %v388_v54 = vsel %vm385_vm11, %v387_v49, %v383_v53 }
 0x16f   :  { %v437_v56 = vmul.f32 %v388_v54, %v345_v52 }
 0x171   :  { %v2822_v59 = vpop.eup %2821  ;;  %v439_v61 = vadd.f32 %v2559_v55, %v437_v56 }
 0x172   :  { %v444_v9 = vsub.f32 %v2822_v59, %v3323_v31 }
 0x173   :  { %2823 = vtanh.f32 %v439_v61 }
 0x174   :  { %v446_v10 = vmul.f32 %v444_v9, %v442_v63 }
 0x176   :  { %v3398_v13 = vadd.f32 %v446_v10, %v3323_v31 }
 0x178   :  { %2560 = vmatmul.msk.f32.vlgmr.msrb.gmra.mxu2 %vm95_vm14, %v3398_v13  ;;  %2562 = vmatmul.msk.f32.vlgmr.msrb.gmra.mxu3 %vm95_vm14, %v3398_v13 }
 0x179   :  { %v2824_v6 = vpop.eup %2823  ;;  %2564 = vmatmul.msk.f32.vlgmr.msra.gmra.mxu0 %vm95_vm14, %v3398_v13  ;;  %872 = vmatpush.msrb.mxu2 %v3249_v4 }
 0x17a   :  { %v445_v16 = vsub.f32 %v2824_v6, %v3337_v37  ;;  %1004 = vmatpush.msrb.mxu3 %v3227_v0  ;;  %1027 = vmatpush.msra.mxu0 %v3232_v1 }
 0x17b   :  { %873 = vmatpush.msrb.mxu2 %v3255_v5 }
 0x17c   :  { %v447_v31 = vmul.f32 %v445_v16, %v443_v15  ;;  %1005 = vmatpush.msrb.mxu3 %v3237_v2  ;;  %1028 = vmatpush.msra.mxu0 %v3244_v3 }
 0x17e   :  { %v3414_v17 = vadd.f32 %v447_v31, %v3337_v37  ;;  %v2570_v37 = vld [vmem:[%s4125_s11 + $0x20] sm:$0xff] }
 0x180   :  { %2561 = vmatmul.msk.f32.gmra.mxu2 %vm95_vm14, %v3414_v17  ;;  %2563 = vmatmul.msk.f32.gmra.mxu3 %vm95_vm14, %v3414_v17 }
 0x181   :  { %2565 = vmatmul.msk.f32.gmra.mxu0 %vm95_vm14, %v3414_v17 }
 0x1f6   :  { %v519_v53 = vpop.f32.mrf.mxu0 }
 0x1f7   :  { %v520_v62 = vadd.f32 %v3307_v42, %v519_v53 }
 0x1fb   :  { %v473_v18 = vpop.f32.mrf.mxu2  ;;  %v496_v20 = vpop.f32.mrf.mxu3 }
 0x1fc   :  { %v474_v21 = vadd.f32 %v3279_v7, %v473_v18  ;;  %v497_v22 = vadd.f32 %v3284_v8, %v496_v20 }
 0x1fe   :  { %v528_v23 = vadd.f32 %v2566_v19, %v474_v21  ;;  %v571_v24 = vadd.f32 %v2570_v37, %v497_v22  ;;  %v522_v22 = vpop.f32.mrf.mxu0 }
 0x200   :  { %v2568_v25 = vmul.f32 -1.442695, %v528_v23  ;;  %v2572_v26 = vmul.f32 -1.442695, %v571_v24 }
 0x202   :  { %2825 = vpow2.f32 %v2568_v25 }
 0x203   :  { %2827 = vpow2.f32 %v2572_v26  ;;  %v476_v27 = vpop.f32.mrf.mxu2  ;;  %v499_v29 = vpop.f32.mrf.mxu3 }
 0x204   :  { %v477_v32 = vadd.f32 %v3279_v7, %v476_v27  ;;  %v500_v33 = vadd.f32 %v3284_v8, %v499_v29 }
 0x206   :  { %v529_v34 = vadd.f32 %v2567_v28, %v477_v32  ;;  %v572_v35 = vadd.f32 %v2571_v30, %v500_v33  ;;  %v523_v30 = vadd.f32 %v3307_v42, %v522_v22 }
 0x208   :  { %v2826_v36 = vpop.eup %2825  ;;  %v2569_v38 = vmul.f32 -1.442695, %v529_v34  ;;  %v2573_v41 = vmul.f32 -1.442695, %v572_v35  ;;  %v2575_v34 = vld [vmem:[%s4126_s3 + $0x28] sm:$0xff] }
 0x209   :  { %v2828_v39 = vpop.eup %2827  ;;  %v536_v40 = vadd.f32 1.0, %v2826_v36 }
 0x20a   :  { %v579_v43 = vadd.f32 1.0, %v2828_v39  ;;  %2829 = vpow2.f32 %v2569_v38 }
 0x20b   :  { %2831 = vrcp.f32 %v536_v40  ;;  %v549_v54 = vand.u32 2147483648, %v536_v40  ;;  %v547_v57 = vand.u32 2147483647, %v536_v40  ;;  %vm543_vm3 = vweird.f32 %v536_v40 }
 0x20c   :  { %2833 = vrcp.f32 %v579_v43  ;;  %v592_v6 = vand.u32 2147483648, %v579_v43  ;;  %vm586_vm8 = vweird.f32 %v579_v43  ;;  %v590_v21 = vand.u32 2147483647, %v579_v43 }
 0x20d   :  { %2835 = vpow2.f32 %v2573_v41  ;;  %v550_v60 = vor.u32 1.1754944e-38, %v549_v54  ;;  %vm548_vm5 = vcmp.eq.f32.partialorder %v547_v57, 8.507059e+37  ;;  %v2583_v57 = vld [vmem:[%s4124_s4 + $0x38] sm:$0xff] }
 0x20e   :  { %v593_v29 = vor.u32 1.1754944e-38, %v592_v6  ;;  %vm591_vm13 = vcmp.eq.f32.partialorder %v590_v21, 8.507059e+37 }
 0x210   :  { %v2830_v44 = vpop.eup %2829 }
 0x211   :  { %v2832_v45 = vpop.eup %2831  ;;  %v537_v46 = vadd.f32 1.0, %v2830_v44 }
 0x212   :  { %v2834_v47 = vpop.eup %2833  ;;  %v539_v48 = vmul.f32 %v2832_v45, %v536_v40  ;;  %vm544_vm2 = vweird.f32 %v2832_v45 }
 0x213   :  { %v2836_v49 = vpop.eup %2835  ;;  %v582_v50 = vmul.f32 %v2834_v47, %v579_v43  ;;  %2837 = vrcp.f32 %v537_v46  ;;  %vm545_vm4 = vmor %vm543_vm3, %vm544_vm2  ;;  %vm587_vm6 = vweird.f32 %v2834_v47  ;;  %v564_v31 = vand.u32 2147483648, %v537_v46 }
 0x214   :  { %v540_v51 = vsub.f32 1.0, %v539_v48  ;;  %v3438_v52 = vadd.f32 1.0, %v2836_v49  ;;  %v562_v20 = vand.u32 2147483647, %v537_v46  ;;  %vm3446_vm9 = vmor %vm586_vm8, %vm587_vm6  ;;  %vm558_vm10 = vweird.f32 %v537_v46 }
 0x215   :  { %v583_v55 = vsub.f32 1.0, %v582_v50  ;;  %v565_v26 = vor.u32 1.1754944e-38, %v564_v31 }
 0x216   :  { %v541_v56 = vmul.f32 %v2832_v45, %v540_v51  ;;  %2839 = vrcp.f32 %v3438_v52  ;;  %vm563_vm12 = vcmp.eq.f32.partialorder %v562_v20, 8.507059e+37  ;;  %v607_v40 = vand.u32 2147483648, %v3438_v52 }
 0x217   :  { %v584_v61 = vmul.f32 %v2834_v47, %v583_v55  ;;  %vm601_vm0 = vweird.f32 %v3438_v52  ;;  %v605_v43 = vand.u32 2147483647, %v3438_v52 }
 0x218   :  { %v542_v58 = vadd.f32 %v2832_v45, %v541_v56  ;;  %v608_v48 = vor.u32 1.1754944e-38, %v607_v40 }
 0x219   :  { %v2838_v59 = vpop.eup %2837  ;;  %v585_v16 = vadd.f32 %v2834_v47, %v584_v61  ;;  %vm606_vm2 = vcmp.eq.f32.partialorder %v605_v43, 8.507059e+37 }
 0x21a   :  { %v546_v63 = vsel %vm545_vm4, %v2832_v45, %v542_v58  ;;  %v554_v9 = vmul.f32 %v2838_v59, %v537_v46  ;;  %vm559_vm7 = vweird.f32 %v2838_v59 }
 0x21b   :  { %v551_v10 = vsel %vm548_vm5, %v550_v60, %v546_v63  ;;  %vm560_vm11 = vmor %vm558_vm10, %vm559_vm7  ;;  %v589_v28 = vsel %vm3446_vm9, %v2834_v47, %v585_v16 }
 0x21c   :  { %v2840_v12 = vpop.eup %2839  ;;  %v614_v14 = vmul.f32 %v551_v10, %v520_v62  ;;  %v555_v15 = vsub.f32 1.0, %v554_v9  ;;  %v594_v36 = vsel %vm591_vm13, %v593_v29, %v589_v28 }
 0x21d   :  { %v597_v18 = vmul.f32 %v2840_v12, %v3438_v52  ;;  %vm602_vm15 = vweird.f32 %v2840_v12  ;;  %v620_v44 = vsub.f32 1.0, %v594_v36 }
 0x21e   :  { %v556_v19 = vmul.f32 %v2838_v59, %v555_v15  ;;  %v616_v37 = vadd.f32 %v2574_v11, %v614_v14  ;;  %vm603_vm1 = vmor %vm601_vm0, %vm602_vm15  ;;  %v2587_v11 = vld [vmem:[%s4125_s11 + $0x38] sm:$0xff] }
 0x21f   :  { %v598_v23 = vsub.f32 1.0, %v597_v18 }
 0x220   :  { %v557_v25 = vadd.f32 %v2838_v59, %v556_v19  ;;  %2841 = vtanh.f32 %v616_v37 }
 0x221   :  { %v599_v27 = vmul.f32 %v2840_v12, %v598_v23 }
 0x222   :  { %v561_v32 = vsel %vm560_vm11, %v2838_v59, %v557_v25 }
 0x223   :  { %v566_v33 = vsel %vm563_vm12, %v565_v26, %v561_v32  ;;  %v600_v38 = vadd.f32 %v2840_v12, %v599_v27 }
 0x224   :  { %v615_v35 = vmul.f32 %v566_v33, %v523_v30 }
 0x225   :  { %v604_v47 = vsel %vm603_vm1, %v2840_v12, %v600_v38  ;;  %v2590_v38 = vld [vmem:[%s4126_s3 + $0x30] sm:$0xff] }
 0x226   :  { %v2842_v39 = vpop.eup %2841  ;;  %v617_v41 = vadd.f32 %v2575_v34, %v615_v35  ;;  %v609_v50 = vsel %vm606_vm2, %v608_v48, %v604_v47 }
 0x227   :  { %v622_v45 = vsub.f32 %v2842_v39, %v3398_v13  ;;  %v621_v52 = vsub.f32 1.0, %v609_v50 }
 0x228   :  { %2843 = vtanh.f32 %v617_v41 }
 0x229   :  { %v624_v46 = vmul.f32 %v622_v45, %v620_v44 }
 0x22b   :  { %v3461_v49 = vadd.f32 %v624_v46, %v3398_v13 }
 0x22d   :  { %2576 = vmatmul.msk.f32.vlgmr.msra.gmra.mxu1 %vm95_vm14, %v3461_v49  ;;  %2578 = vmatmul.msk.f32.vlgmr.msra.gmra.mxu2 %vm95_vm14, %v3461_v49 }
 0x22e   :  { %v2844_v51 = vpop.eup %2843  ;;  %2580 = vmatmul.msk.f32.vlgmr.msra.gmra.mxu3 %vm95_vm14, %v3461_v49  ;;  %1050 = vmatpush.msra.mxu1 %v3249_v4 }
 0x22f   :  { %v623_v53 = vsub.f32 %v2844_v51, %v3414_v17  ;;  %1182 = vmatpush.msra.mxu2 %v3227_v0  ;;  %1205 = vmatpush.msra.mxu3 %v3232_v1  ;;  %v2582_v1 = vld [vmem:[%s4124_s4 + $0x30] sm:$0xff] }
 0x230   :  { %1051 = vmatpush.msra.mxu1 %v3255_v5 }
 0x231   :  { %v625_v13 = vmul.f32 %v623_v53, %v621_v52  ;;  %1183 = vmatpush.msra.mxu2 %v3237_v2  ;;  %1206 = vmatpush.msra.mxu3 %v3244_v3 }
 0x233   :  { %v3477_v54 = vadd.f32 %v625_v13, %v3414_v17  ;;  %v2586_v17 = vld [vmem:[%s4125_s11 + $0x30] sm:$0xff] }
 0x235   :  { %2577 = vmatmul.msk.f32.gmra.mxu1 %vm95_vm14, %v3477_v54  ;;  %2579 = vmatmul.msk.f32.gmra.mxu2 %vm95_vm14, %v3477_v54 }
 0x236   :  { %2581 = vmatmul.msk.f32.gmra.mxu3 %vm95_vm14, %v3477_v54 }
 0x2aa   :  { %v651_v0 = vpop.f32.mrf.mxu1 }
 0x2ab   :  { %v652_v2 = vadd.f32 %v3279_v7, %v651_v0 }
 0x2ad   :  { %v706_v3 = vadd.f32 %v2582_v1, %v652_v2 }
 0x2af   :  { %v2584_v4 = vmul.f32 -1.442695, %v706_v3 }
 0x2b0   :  { %v674_v5 = vpop.f32.mrf.mxu2 }
 0x2b1   :  { %2845 = vpow2.f32 %v2584_v4  ;;  %v675_v55 = vadd.f32 %v3284_v8, %v674_v5  ;;  %v697_v23 = vpop.f32.mrf.mxu3 }
 0x2b2   :  { %v654_v56 = vpop.f32.mrf.mxu1  ;;  %v698_v34 = vadd.f32 %v3307_v42, %v697_v23  ;;  %v3566_v23 = vld [vmem:[%s4097_s6] sm:$0xff] }
 0x2b3   :  { %v749_v58 = vadd.f32 %v2586_v17, %v675_v55  ;;  %v655_v59 = vadd.f32 %v3279_v7, %v654_v56 }
 0x2b5   :  { %v2588_v60 = vmul.f32 -1.442695, %v749_v58  ;;  %v707_v61 = vadd.f32 %v2583_v57, %v655_v59  ;;  %v2591_v58 = vld [vmem:[%s4126_s3 + $0x38] sm:$0xff] }
 0x2b7   :  { %v2846_v62 = vpop.eup %2845  ;;  %2847 = vpow2.f32 %v2588_v60  ;;  %v2585_v63 = vmul.f32 -1.442695, %v707_v61 }
 0x2b8   :  { %v714_v9 = vadd.f32 1.0, %v2846_v62  ;;  %v677_v10 = vpop.f32.mrf.mxu2 }
 0x2b9   :  { %2849 = vpow2.f32 %v2585_v63  ;;  %v678_v12 = vadd.f32 %v3284_v8, %v677_v10  ;;  %v700_v0 = vpop.f32.mrf.mxu3 }
 0x2ba   :  { %2851 = vrcp.f32 %v714_v9  ;;  %v727_v21 = vand.u32 2147483648, %v714_v9  ;;  %v725_v25 = vand.u32 2147483647, %v714_v9  ;;  %vm721_vm4 = vweird.f32 %v714_v9 }
 0x2bb   :  { %v750_v14 = vadd.f32 %v2587_v11, %v678_v12  ;;  %v701_v17 = vadd.f32 %v3307_v42, %v700_v0 }
 0x2bc   :  { %v728_v30 = vor.u32 1.1754944e-38, %v727_v21  ;;  %vm726_vm6 = vcmp.eq.f32.partialorder %v725_v25, 8.507059e+37  ;;  %v3554_v21 = vld [vmem:[%s4098_s7] sm:$0xff] }
 0x2bd   :  { %v2848_v6 = vpop.eup %2847  ;;  %v2589_v15 = vmul.f32 -1.442695, %v750_v14 }
 0x2be   :  { %v757_v16 = vadd.f32 1.0, %v2848_v6 }
 0x2bf   :  { %v2850_v31 = vpop.eup %2849  ;;  %2853 = vpow2.f32 %v2589_v15 }
 0x2c0   :  { %v2852_v18 = vpop.eup %2851  ;;  %2855 = vrcp.f32 %v757_v16  ;;  %v715_v20 = vadd.f32 1.0, %v2850_v31  ;;  %vm764_vm7 = vweird.f32 %v757_v16  ;;  %v770_v45 = vand.u32 2147483648, %v757_v16  ;;  %v3535_v31 = vld [vmem:[%s4098_s7 + $0x8] sm:$0xff] }
 0x2c1   :  { %v717_v19 = vmul.f32 %v2852_v18, %v714_v9  ;;  %vm722_vm3 = vweird.f32 %v2852_v18  ;;  %v768_v50 = vand.u32 2147483647, %v757_v16 }
 0x2c2   :  { %2857 = vrcp.f32 %v715_v20  ;;  %vm723_vm5 = vmor %vm721_vm4, %vm722_vm3  ;;  %v742_v47 = vand.u32 2147483648, %v715_v20  ;;  %v740_v52 = vand.u32 2147483647, %v715_v20  ;;  %vm736_vm11 = vweird.f32 %v715_v20 }
 0x2c3   :  { %v718_v37 = vsub.f32 1.0, %v717_v19  ;;  %v771_v3 = vor.u32 1.1754944e-38, %v770_v45  ;;  %vm769_vm13 = vcmp.eq.f32.partialorder %v768_v50, 8.507059e+37  ;;  %v3547_v19 = vld [vmem:[%s4097_s6 + $0x8] sm:$0xff] }
 0x2c4   :  { %v743_v5 = vor.u32 1.1754944e-38, %v742_v47  ;;  %vm741_vm15 = vcmp.eq.f32.partialorder %v740_v52, 8.507059e+37 }
 0x2c5   :  { %v2854_v22 = vpop.eup %2853  ;;  %v719_v24 = vmul.f32 %v2852_v18, %v718_v37 }
 0x2c6   :  { %v2856_v26 = vpop.eup %2855  ;;  %v3501_v27 = vadd.f32 1.0, %v2854_v22  ;;  %v3560_v22 = vld [vmem:[%s4123_s29] sm:$0xff] }
 0x2c7   :  { %v760_v28 = vmul.f32 %v2856_v26, %v757_v16  ;;  %v720_v29 = vadd.f32 %v2852_v18, %v719_v24  ;;  %vm765_vm8 = vweird.f32 %v2856_v26 }
 0x2c8   :  { %2859 = vrcp.f32 %v3501_v27  ;;  %v2858_v32 = vpop.eup %2857  ;;  %vm3508_vm10 = vmor %vm764_vm7, %vm765_vm8  ;;  %v785_v9 = vand.u32 2147483648, %v3501_v27  ;;  %vm779_vm1 = vweird.f32 %v3501_v27  ;;  %v783_v42 = vand.u32 2147483647, %v3501_v27 }
 0x2c9   :  { %v761_v33 = vsub.f32 1.0, %v760_v28  ;;  %v724_v35 = vsel %vm723_vm5, %v2852_v18, %v720_v29  ;;  %v732_v39 = vmul.f32 %v2858_v32, %v715_v20  ;;  %vm737_vm9 = vweird.f32 %v2858_v32  ;;  %v3541_v18 = vld [vmem:[%s4123_s29 + $0x8] sm:$0xff] }
 0x2ca   :  { %v729_v36 = vsel %vm726_vm6, %v728_v30, %v724_v35  ;;  %vm738_vm12 = vmor %vm736_vm11, %vm737_vm9  ;;  %v786_v6 = vor.u32 1.1754944e-38, %v785_v9  ;;  %vm784_vm3 = vcmp.eq.f32.partialorder %v783_v42, 8.507059e+37  ;;  %v2606_v42 = vld [vmem:[%s4126_s3 + $0x40] sm:$0xff] }
 0x2cb   :  { %v762_v40 = vmul.f32 %v2856_v26, %v761_v33  ;;  %v792_v41 = vmul.f32 %v729_v36, %v698_v34  ;;  %v733_v43 = vsub.f32 1.0, %v732_v39 }
 0x2cd   :  { %v763_v44 = vadd.f32 %v2856_v26, %v762_v40  ;;  %v794_v46 = vadd.f32 %v2590_v38, %v792_v41  ;;  %v734_v51 = vmul.f32 %v2858_v32, %v733_v43  ;;  %v2599_v38 = vld [vmem:[%s4124_s4 + $0x48] sm:$0xff]  ;;  %v3601_v41 = vld [vmem:[%s4100_s9] ss:$0 sm:$0xff] }
 0x2ce   :  { %v2860_v48 = vpop.eup %2859  ;;  %v2603_v40 = vld [vmem:[%s4125_s11 + $0x48] sm:$0xff] }
 0x2cf   :  { %2861 = vtanh.f32 %v794_v46  ;;  %v775_v13 = vmul.f32 %v2860_v48, %v3501_v27  ;;  %v735_v1 = vadd.f32 %v2858_v32, %v734_v51  ;;  %v767_v2 = vsel %vm3508_vm10, %v2856_v26, %v763_v44  ;;  %v2598_v27 = vld [vmem:[%s4124_s4 + $0x40] sm:$0xff] }
 0x2d0   :  { %v772_v59 = vsel %vm769_vm13, %v771_v3, %v767_v2  ;;  %vm780_vm0 = vweird.f32 %v2860_v48 }
 0x2d1   :  { %v776_v4 = vsub.f32 1.0, %v775_v13  ;;  %v739_v55 = vsel %vm738_vm12, %v2858_v32, %v735_v1  ;;  %v798_v11 = vsub.f32 1.0, %v772_v59  ;;  %vm781_vm2 = vmor %vm779_vm1, %vm780_vm0 }
 0x2d2   :  { %v744_v57 = vsel %vm741_vm15, %v743_v5, %v739_v55 }
 0x2d3   :  { %v777_v56 = vmul.f32 %v2860_v48, %v776_v4  ;;  %v793_v60 = vmul.f32 %v744_v57, %v701_v17 }
 0x2d5   :  { %v2862_v61 = vpop.eup %2861  ;;  %v778_v62 = vadd.f32 %v2860_v48, %v777_v56  ;;  %v795_v10 = vadd.f32 %v2591_v58, %v793_v60 }
 0x2d6   :  { %v800_v63 = vsub.f32 %v2862_v61, %v3461_v49 }
 0x2d7   :  { %2863 = vtanh.f32 %v795_v10  ;;  %v782_v14 = vsel %vm781_vm2, %v2860_v48, %v778_v62 }
 0x2d8   :  { %v802_v12 = vmul.f32 %v800_v63, %v798_v11  ;;  %v787_v16 = vsel %vm784_vm3, %v786_v6, %v782_v14  ;;  %v3610_v63 = vld [vmem:[%s4101_s10] ss:$0 sm:$0xff] }
 0x2d9   :  { %v799_v37 = vsub.f32 1.0, %v787_v16 }
 0x2da   :  { %v3524_v15 = vadd.f32 %v802_v12, %v3461_v49 }
 0x2dc   :  { %2592 = vmatmul.msk.f32.vlgmr.msrb.gmra.mxu0 %vm95_vm14, %v3524_v15  ;;  %2594 = vmatmul.msk.f32.vlgmr.msrb.gmra.mxu1 %vm95_vm14, %v3524_v15 }
 0x2dd   :  { %2596 = vmatmul.msk.f32.vlgmr.msrb.gmra.mxu2 %vm95_vm14, %v3524_v15  ;;  %1228 = vmatpush.msrb.mxu0 %v3535_v31  ;;  %v2864_v49 = vpop.eup %2863 }
 0x2de   :  { %1360 = vmatpush.msrb.mxu1 %v3541_v18  ;;  %1383 = vmatpush.msrb.mxu2 %v3547_v19  ;;  %v801_v20 = vsub.f32 %v2864_v49, %v3477_v54 }
 0x2df   :  { %1229 = vmatpush.msrb.mxu0 %v3554_v21 }
 0x2e0   :  { %1361 = vmatpush.msrb.mxu1 %v3560_v22  ;;  %1384 = vmatpush.msrb.mxu2 %v3566_v23  ;;  %v803_v24 = vmul.f32 %v801_v20, %v799_v37 }
 0x2e2   :  { %v3570_v25 = vadd.f32 %v803_v24, %v3477_v54  ;;  %v2602_v54 = vld [vmem:[%s4125_s11 + $0x40] sm:$0xff] }
 0x2e4   :  { %2593 = vmatmul.msk.f32.gmra.mxu0 %vm95_vm14, %v3570_v25  ;;  %2595 = vmatmul.msk.f32.gmra.mxu1 %vm95_vm14, %v3570_v25 }
 0x2e5   :  { %2597 = vmatmul.msk.f32.gmra.mxu2 %vm95_vm14, %v3570_v25 }
 0x359   :  { %v829_v26 = vpop.f32.mrf.mxu0  ;;  %v852_v28 = vpop.f32.mrf.mxu1 }
 0x35a   :  { %v830_v29 = vadd.f32 %v3279_v7, %v829_v26  ;;  %v853_v30 = vadd.f32 %v3284_v8, %v852_v28  ;;  %v3595_v7 = vld [vmem:[%s4099_s8] ss:$0 sm:$0xff] }
 0x35c   :  { %v884_v32 = vadd.f32 %v2598_v27, %v830_v29  ;;  %v927_v33 = vadd.f32 %v2602_v54, %v853_v30 }
 0x35e   :  { %v2600_v34 = vmul.f32 -1.442695, %v884_v32  ;;  %v2604_v35 = vmul.f32 -1.442695, %v927_v33 }
 0x360   :  { %2865 = vpow2.f32 %v2600_v34  ;;  %v875_v59 = vpop.f32.mrf.mxu2 }
 0x361   :  { %2867 = vpow2.f32 %v2604_v35  ;;  %v832_v36 = vpop.f32.mrf.mxu0  ;;  %v855_v39 = vpop.f32.mrf.mxu1  ;;  %v876_v9 = vadd.f32 %v3610_v63, %v875_v59 }
 0x362   :  { %v833_v8 = vadd.f32 %v3595_v7, %v832_v36  ;;  %v856_v43 = vadd.f32 %v3601_v41, %v855_v39 }
 0x364   :  { %v885_v44 = vadd.f32 %v2599_v38, %v833_v8  ;;  %v928_v45 = vadd.f32 %v2603_v40, %v856_v43 }
 0x366   :  { %v2866_v46 = vpop.eup %2865  ;;  %v2601_v50 = vmul.f32 -1.442695, %v885_v44  ;;  %v2605_v52 = vmul.f32 -1.442695, %v928_v45 }
 0x367   :  { %v2868_v47 = vpop.eup %2867  ;;  %v892_v48 = vadd.f32 1.0, %v2866_v46  ;;  %v2607_v46 = vld [vmem:[%s4126_s3 + $0x48] sm:$0xff] }
 0x368   :  { %v935_v51 = vadd.f32 1.0, %v2868_v47  ;;  %v878_v35 = vpop.f32.mrf.mxu2 }
 0x369   :  { %2869 = vrcp.f32 %v892_v48  ;;  %v905_v55 = vand.u32 2147483648, %v892_v48  ;;  %v903_v58 = vand.u32 2147483647, %v892_v48  ;;  %vm899_vm5 = vweird.f32 %v892_v48 }
 0x36a   :  { %2871 = vrcp.f32 %v935_v51  ;;  %v948_v20 = vand.u32 2147483648, %v935_v51  ;;  %vm942_vm9 = vweird.f32 %v935_v51  ;;  %v946_v26 = vand.u32 2147483647, %v935_v51 }
 0x36b   :  { %2873 = vpow2.f32 %v2601_v50  ;;  %v906_v62 = vor.u32 1.1754944e-38, %v905_v55  ;;  %vm904_vm7 = vcmp.eq.f32.partialorder %v903_v58, 8.507059e+37  ;;  %v879_v8 = vadd.f32 %v3610_v63, %v878_v35  ;;  %v2618_v58 = vld [vmem:[%s4125_s11 + $0x50] sm:$0xff] }
 0x36c   :  { %2875 = vpow2.f32 %v2605_v52  ;;  %v949_v34 = vor.u32 1.1754944e-38, %v948_v20  ;;  %vm947_vm12 = vcmp.eq.f32.partialorder %v946_v26, 8.507059e+37 }
 0x36f   :  { %v2870_v53 = vpop.eup %2869 }
 0x370   :  { %v2872_v13 = vpop.eup %2871  ;;  %v895_v0 = vmul.f32 %v2870_v53, %v892_v48  ;;  %vm900_vm4 = vweird.f32 %v2870_v53 }
 0x371   :  { %v2874_v1 = vpop.eup %2873  ;;  %v938_v2 = vmul.f32 %v2872_v13, %v935_v51  ;;  %vm901_vm6 = vmor %vm899_vm5, %vm900_vm4  ;;  %vm943_vm8 = vweird.f32 %v2872_v13 }
 0x372   :  { %v2876_v3 = vpop.eup %2875  ;;  %v896_v4 = vsub.f32 1.0, %v895_v0  ;;  %v893_v5 = vadd.f32 1.0, %v2874_v1  ;;  %vm3617_vm10 = vmor %vm942_vm9, %vm943_vm8 }
 0x373   :  { %v939_v17 = vsub.f32 1.0, %v938_v2  ;;  %v3604_v56 = vadd.f32 1.0, %v2876_v3 }
 0x374   :  { %v897_v57 = vmul.f32 %v2870_v53, %v896_v4  ;;  %2877 = vrcp.f32 %v893_v5  ;;  %v920_v29 = vand.u32 2147483648, %v893_v5  ;;  %v918_v32 = vand.u32 2147483647, %v893_v5 }
 0x375   :  { %2879 = vrcp.f32 %v3604_v56  ;;  %v940_v61 = vmul.f32 %v2872_v13, %v939_v17  ;;  %vm914_vm13 = vweird.f32 %v893_v5  ;;  %v963_v52 = vand.u32 2147483648, %v3604_v56 }
 0x376   :  { %v898_v60 = vadd.f32 %v2870_v53, %v897_v57  ;;  %v921_v39 = vor.u32 1.1754944e-38, %v920_v29  ;;  %vm919_vm0 = vcmp.eq.f32.partialorder %v918_v32, 8.507059e+37  ;;  %vm957_vm2 = vweird.f32 %v3604_v56 }
 0x377   :  { %v941_v16 = vadd.f32 %v2872_v13, %v940_v61  ;;  %v961_v0 = vand.u32 2147483647, %v3604_v56  ;;  %v964_v3 = vor.u32 1.1754944e-38, %v963_v52 }
 0x378   :  { %v902_v10 = vsel %vm901_vm6, %v2870_v53, %v898_v60 }
 0x379   :  { %v907_v11 = vsel %vm904_vm7, %v906_v62, %v902_v10  ;;  %v945_v33 = vsel %vm3617_vm10, %v2872_v13, %v941_v16  ;;  %vm962_vm4 = vcmp.eq.f32.partialorder %v961_v0, 8.507059e+37  ;;  %v2614_v62 = vld [vmem:[%s4124_s4 + $0x50] sm:$0xff] }
 0x37a   :  { %v2878_v12 = vpop.eup %2877  ;;  %v970_v14 = vmul.f32 %v907_v11, %v876_v9  ;;  %v950_v40 = vsel %vm947_vm12, %v949_v34, %v945_v33  ;;  %v2622_v0 = vld [vmem:[%s4126_s3 + $0x50] sm:$0xff] }
 0x37b   :  { %v2880_v6 = vpop.eup %2879  ;;  %v910_v49 = vmul.f32 %v2878_v12, %v893_v5  ;;  %vm915_vm11 = vweird.f32 %v2878_v12  ;;  %v976_v50 = vsub.f32 1.0, %v950_v40 }
 0x37c   :  { %v972_v37 = vadd.f32 %v2606_v42, %v970_v14  ;;  %v953_v24 = vmul.f32 %v2880_v6, %v3604_v56  ;;  %vm916_vm15 = vmor %vm914_vm13, %vm915_vm11  ;;  %vm958_vm1 = vweird.f32 %v2880_v6 }
 0x37d   :  { %v911_v27 = vsub.f32 1.0, %v910_v49  ;;  %vm959_vm3 = vmor %vm957_vm2, %vm958_vm1 }
 0x37e   :  { %2881 = vtanh.f32 %v972_v37  ;;  %v954_v54 = vsub.f32 1.0, %v953_v24  ;;  %v2615_v24 = vld [vmem:[%s4124_s4 + $0x58] sm:$0xff] }
 0x37f   :  { %v912_v30 = vmul.f32 %v2878_v12, %v911_v27 }
 0x380   :  { %v955_v38 = vmul.f32 %v2880_v6, %v954_v54 }
 0x381   :  { %v913_v36 = vadd.f32 %v2878_v12, %v912_v30 }
 0x382   :  { %v956_v51 = vadd.f32 %v2880_v6, %v955_v38 }
 0x383   :  { %v917_v43 = vsel %vm916_vm15, %v2878_v12, %v913_v36  ;;  %v2619_v12 = vld [vmem:[%s4125_s11 + $0x58] sm:$0xff] }
 0x384   :  { %v2882_v44 = vpop.eup %2881  ;;  %v922_v45 = vsel %vm919_vm0, %v921_v39, %v917_v43  ;;  %v960_v2 = vsel %vm959_vm3, %v2880_v6, %v956_v51 }
 0x385   :  { %v978_v47 = vsub.f32 %v2882_v44, %v3524_v15  ;;  %v971_v48 = vmul.f32 %v922_v45, %v879_v8  ;;  %v965_v4 = vsel %vm962_vm4, %v964_v3, %v960_v2 }
 0x386   :  { %v977_v17 = vsub.f32 1.0, %v965_v4 }
 0x387   :  { %v973_v53 = vadd.f32 %v2607_v46, %v971_v48  ;;  %v980_v13 = vmul.f32 %v978_v47, %v976_v50 }
 0x389   :  { %2883 = vtanh.f32 %v973_v53  ;;  %v3632_v1 = vadd.f32 %v980_v13, %v3524_v15 }
 0x38b   :  { %2608 = vmatmul.msk.f32.vlgmr.msrb.gmra.mxu3 %vm95_vm14, %v3632_v1  ;;  %2610 = vmatmul.msk.f32.vlgmr.msra.gmra.mxu0 %vm95_vm14, %v3632_v1 }
 0x38c   :  { %2612 = vmatmul.msk.f32.vlgmr.msra.gmra.mxu1 %vm95_vm14, %v3632_v1  ;;  %1406 = vmatpush.msrb.mxu3 %v3535_v31 }
 0x38d   :  { %1538 = vmatpush.msra.mxu0 %v3541_v18  ;;  %1561 = vmatpush.msra.mxu1 %v3547_v19 }
 0x38e   :  { %1407 = vmatpush.msrb.mxu3 %v3554_v21 }
 0x38f   :  { %v2884_v15 = vpop.eup %2883  ;;  %1539 = vmatpush.msra.mxu0 %v3560_v22  ;;  %1562 = vmatpush.msra.mxu1 %v3566_v23 }
 0x390   :  { %v979_v5 = vsub.f32 %v2884_v15, %v3570_v25 }
 0x392   :  { %v981_v55 = vmul.f32 %v979_v5, %v977_v17 }
 0x394   :  { %v3648_v56 = vadd.f32 %v981_v55, %v3570_v25 }
 0x396   :  { %2609 = vmatmul.msk.f32.gmra.mxu3 %vm95_vm14, %v3648_v56  ;;  %2611 = vmatmul.msk.f32.gmra.mxu0 %vm95_vm14, %v3648_v56 }
 0x397   :  { %2613 = vmatmul.msk.f32.gmra.mxu1 %vm95_vm14, %v3648_v56 }
 0x408   :  { %v1030_v57 = vpop.f32.mrf.mxu0 }
 0x409   :  { %v1031_v59 = vadd.f32 %v3601_v41, %v1030_v57  ;;  %v1053_v46 = vpop.f32.mrf.mxu1 }
 0x40a   :  { %v1054_v52 = vadd.f32 %v3610_v63, %v1053_v46 }
 0x40b   :  { %v1105_v60 = vadd.f32 %v2618_v58, %v1031_v59 }
 0x40d   :  { %v2620_v61 = vmul.f32 -1.442695, %v1105_v60 }
 0x40e   :  { %v1007_v25 = vpop.f32.mrf.mxu3 }
 0x40f   :  { %2885 = vpow2.f32 %v2620_v61  ;;  %v1008_v9 = vadd.f32 %v3595_v7, %v1007_v25 }
 0x411   :  { %v1062_v10 = vadd.f32 %v2614_v62, %v1008_v9 }
 0x413   :  { %v2616_v11 = vmul.f32 -1.442695, %v1062_v10  ;;  %v1033_v42 = vpop.f32.mrf.mxu0 }
 0x414   :  { %v1034_v14 = vadd.f32 %v3601_v41, %v1033_v42  ;;  %v1056_v10 = vpop.f32.mrf.mxu1 }
 0x415   :  { %v2886_v6 = vpop.eup %2885  ;;  %2887 = vpow2.f32 %v2616_v11 }
 0x416   :  { %v1113_v16 = vadd.f32 1.0, %v2886_v6  ;;  %v1106_v49 = vadd.f32 %v2619_v12, %v1034_v14 }
 0x418   :  { %v2621_v20 = vmul.f32 -1.442695, %v1106_v49  ;;  %2889 = vrcp.f32 %v1113_v16  ;;  %v1126_v5 = vand.u32 2147483648, %v1113_v16  ;;  %vm1120_vm10 = vweird.f32 %v1113_v16 }
 0x419   :  { %v1010_v37 = vpop.f32.mrf.mxu3  ;;  %v1124_v57 = vand.u32 2147483647, %v1113_v16 }
 0x41a   :  { %v1011_v26 = vadd.f32 %v3595_v7, %v1010_v37  ;;  %2891 = vpow2.f32 %v2621_v20  ;;  %v1127_v25 = vor.u32 1.1754944e-38, %v1126_v5 }
 0x41b   :  { %v2888_v27 = vpop.eup %2887  ;;  %vm1125_vm13 = vcmp.eq.f32.partialorder %v1124_v57, 8.507059e+37 }
 0x41c   :  { %v1070_v28 = vadd.f32 1.0, %v2888_v27  ;;  %v1063_v54 = vadd.f32 %v2615_v24, %v1011_v26  ;;  %v2623_v26 = vld [vmem:[%s4126_s3 + $0x58] sm:$0xff] }
 0x41e   :  { %2893 = vrcp.f32 %v1070_v28  ;;  %v2617_v29 = vmul.f32 -1.442695, %v1063_v54  ;;  %v2890_v30 = vpop.eup %2889  ;;  %v1083_v8 = vand.u32 2147483648, %v1070_v28  ;;  %v1081_v45 = vand.u32 2147483647, %v1070_v28 }
 0x41f   :  { %v1116_v35 = vmul.f32 %v2890_v30, %v1113_v16  ;;  %vm1077_vm6 = vweird.f32 %v1070_v28  ;;  %vm1121_vm9 = vweird.f32 %v2890_v30  ;;  %v1057_v16 = vadd.f32 %v3610_v63, %v1056_v10 }
 0x420   :  { %v2892_v32 = vpop.eup %2891  ;;  %2895 = vpow2.f32 %v2617_v29  ;;  %v1084_v50 = vor.u32 1.1754944e-38, %v1083_v8  ;;  %vm1082_vm8 = vcmp.eq.f32.partialorder %v1081_v45, 8.507059e+37  ;;  %vm1122_vm11 = vmor %vm1120_vm10, %vm1121_vm9 }
 0x421   :  { %v3672_v33 = vadd.f32 1.0, %v2892_v32  ;;  %v1117_v40 = vsub.f32 1.0, %v1116_v35 }
 0x423   :  { %2897 = vrcp.f32 %v3672_v33  ;;  %v1118_v48 = vmul.f32 %v2890_v30, %v1117_v40  ;;  %v1141_v29 = vand.u32 2147483648, %v3672_v33  ;;  %vm1135_vm3 = vweird.f32 %v3672_v33 }
 0x424   :  { %v2894_v34 = vpop.eup %2893  ;;  %v1139_v32 = vand.u32 2147483647, %v3672_v33 }
 0x425   :  { %v1073_v36 = vmul.f32 %v2894_v34, %v1070_v28  ;;  %vm1078_vm5 = vweird.f32 %v2894_v34  ;;  %v1119_v4 = vadd.f32 %v2890_v30, %v1118_v48 }
 0x426   :  { %v2896_v38 = vpop.eup %2895  ;;  %vm1079_vm7 = vmor %vm1077_vm6, %vm1078_vm5  ;;  %vm1140_vm5 = vcmp.eq.f32.partialorder %v1139_v32, 8.507059e+37 }
 0x427   :  { %v1074_v39 = vsub.f32 1.0, %v1073_v36  ;;  %v1071_v43 = vadd.f32 1.0, %v2896_v38  ;;  %v1123_v61 = vsel %vm1122_vm11, %v2890_v30, %v1119_v4  ;;  %v1142_v36 = vor.u32 1.1754944e-38, %v1141_v29 }
 0x428   :  { %v1128_v42 = vsel %vm1125_vm13, %v1127_v25, %v1123_v61 }
 0x429   :  { %v1075_v44 = vmul.f32 %v2894_v34, %v1074_v39  ;;  %2899 = vrcp.f32 %v1071_v43  ;;  %v3675_v51 = vpop.eup %2897  ;;  %v1098_v60 = vand.u32 2147483648, %v1071_v43  ;;  %v1096_v9 = vand.u32 2147483647, %v1071_v43 }
 0x42a   :  { %v1131_v15 = vmul.f32 %v3675_v51, %v3672_v33  ;;  %vm1092_vm15 = vweird.f32 %v1071_v43  ;;  %v1154_v37 = vsub.f32 1.0, %v1128_v42  ;;  %vm1136_vm2 = vweird.f32 %v3675_v51 }
 0x42b   :  { %v1076_v47 = vadd.f32 %v2894_v34, %v1075_v44  ;;  %v1099_v14 = vor.u32 1.1754944e-38, %v1098_v60  ;;  %vm1097_vm1 = vcmp.eq.f32.partialorder %v1096_v9, 8.507059e+37  ;;  %vm1137_vm4 = vmor %vm1135_vm3, %vm1136_vm2  ;;  %v2630_v44 = vld [vmem:[%s4124_s4 + $0x60] sm:$0xff] }
 0x42c   :  { %v1132_v59 = vsub.f32 1.0, %v1131_v15 }
 0x42d   :  { %v1080_v53 = vsel %vm1079_vm7, %v2894_v34, %v1076_v47 }
 0x42e   :  { %v1085_v13 = vsel %vm1082_vm8, %v1084_v50, %v1080_v53  ;;  %v1133_v12 = vmul.f32 %v3675_v51, %v1132_v59 }
 0x42f   :  { %v1148_v2 = vmul.f32 %v1085_v13, %v1054_v52  ;;  %v2900_v3 = vpop.eup %2899  ;;  %v2631_v13 = vld [vmem:[%s4124_s4 + $0x68] sm:$0xff] }
 0x430   :  { %v1088_v17 = vmul.f32 %v2900_v3, %v1071_v43  ;;  %vm1093_vm12 = vweird.f32 %v2900_v3  ;;  %v1134_v28 = vadd.f32 %v3675_v51, %v1133_v12 }
 0x431   :  { %v1150_v55 = vadd.f32 %v2622_v0, %v1148_v2  ;;  %vm1094_vm0 = vmor %vm1092_vm15, %vm1093_vm12  ;;  %v2635_v2 = vld [vmem:[%s4125_s11 + $0x68] sm:$0xff] }
 0x432   :  { %v1089_v58 = vsub.f32 1.0, %v1088_v17  ;;  %v1138_v35 = vsel %vm1137_vm4, %v3675_v51, %v1134_v28 }
 0x433   :  { %2901 = vtanh.f32 %v1150_v55 }
 0x434   :  { %v1090_v62 = vmul.f32 %v2900_v3, %v1089_v58 }
 0x436   :  { %v1091_v11 = vadd.f32 %v2900_v3, %v1090_v62 }
 0x438   :  { %v1095_v49 = vsel %vm1094_vm0, %v2900_v3, %v1091_v11 }
 0x439   :  { %v2902_v6 = vpop.eup %2901  ;;  %v1100_v20 = vsel %vm1097_vm1, %v1099_v14, %v1095_v49 }
 0x43a   :  { %v1156_v24 = vsub.f32 %v2902_v6, %v3632_v1  ;;  %v1149_v27 = vmul.f32 %v1100_v20, %v1057_v16 }
 0x43c   :  { %v1158_v54 = vmul.f32 %v1156_v24, %v1154_v37  ;;  %v1151_v30 = vadd.f32 %v2623_v26, %v1149_v27 }
 0x43e   :  { %v3695_v34 = vadd.f32 %v1158_v54, %v3632_v1  ;;  %2903 = vtanh.f32 %v1151_v30  ;;  %v1143_v1 = vsel %vm1140_vm5, %v1142_v36, %v1138_v35  ;;  %v2638_v30 = vld [vmem:[%s4126_s3 + $0x60] sm:$0xff] }
 0x43f   :  { %v1155_v38 = vsub.f32 1.0, %v1143_v1 }
 0x440   :  { %2624 = vmatmul.msk.f32.vlgmr.msra.gmra.mxu2 %vm95_vm14, %v3695_v34  ;;  %2626 = vmatmul.msk.f32.vlgmr.msra.gmra.mxu3 %vm95_vm14, %v3695_v34 }
 0x441   :  { %2628 = vmatmul.msk.f32.vlgmr.msrb.gmra.mxu0 %vm95_vm14, %v3695_v34  ;;  %1584 = vmatpush.msra.mxu2 %v3535_v31 }
 0x442   :  { %1716 = vmatpush.msra.mxu3 %v3541_v18  ;;  %1739 = vmatpush.msrb.mxu0 %v3547_v19 }
 0x443   :  { %1585 = vmatpush.msra.mxu2 %v3554_v21 }
 0x444   :  { %1717 = vmatpush.msra.mxu3 %v3560_v22  ;;  %1740 = vmatpush.msrb.mxu0 %v3566_v23  ;;  %v2904_v33 = vpop.eup %2903 }
 0x445   :  { %v1157_v39 = vsub.f32 %v2904_v33, %v3648_v56 }
 0x447   :  { %v1159_v40 = vmul.f32 %v1157_v39, %v1155_v38 }
 0x449   :  { %v3712_v8 = vadd.f32 %v1159_v40, %v3648_v56  ;;  %v2634_v56 = vld [vmem:[%s4125_s11 + $0x60] sm:$0xff] }
 0x44b   :  { %2625 = vmatmul.msk.f32.gmra.mxu2 %vm95_vm14, %v3712_v8  ;;  %2627 = vmatmul.msk.f32.gmra.mxu3 %vm95_vm14, %v3712_v8 }
 0x44c   :  { %2629 = vmatmul.msk.f32.gmra.mxu0 %vm95_vm14, %v3712_v8 }
 0x4be   :  { %v1231_v20 = vpop.f32.mrf.mxu0 }
 0x4bf   :  { %v1232_v28 = vadd.f32 %v3610_v63, %v1231_v20 }
 0x4c3   :  { %v1185_v43 = vpop.f32.mrf.mxu2  ;;  %v1208_v45 = vpop.f32.mrf.mxu3 }
 0x4c4   :  { %v1186_v46 = vadd.f32 %v3595_v7, %v1185_v43  ;;  %v1209_v47 = vadd.f32 %v3601_v41, %v1208_v45 }
 0x4c6   :  { %v1240_v48 = vadd.f32 %v2630_v44, %v1186_v46  ;;  %v1283_v50 = vadd.f32 %v2634_v56, %v1209_v47 }
 0x4c8   :  { %v2632_v51 = vmul.f32 -1.442695, %v1240_v48  ;;  %v2636_v52 = vmul.f32 -1.442695, %v1283_v50 }
 0x4c9   :  { %v1234_v48 = vpop.f32.mrf.mxu0 }
 0x4ca   :  { %2905 = vpow2.f32 %v2632_v51 }
 0x4cb   :  { %2907 = vpow2.f32 %v2636_v52 }
 0x4ce   :  { %v1188_v53 = vpop.f32.mrf.mxu2  ;;  %v1211_v0 = vpop.f32.mrf.mxu3 }
 0x4cf   :  { %v1189_v4 = vadd.f32 %v3595_v7, %v1188_v53  ;;  %v1212_v15 = vadd.f32 %v3601_v41, %v1211_v0  ;;  %v1235_v0 = vadd.f32 %v3610_v63, %v1234_v48 }
 0x4d0   :  { %v2906_v3 = vpop.eup %2905 }
 0x4d1   :  { %v2908_v5 = vpop.eup %2907  ;;  %v1248_v17 = vadd.f32 1.0, %v2906_v3  ;;  %v1241_v57 = vadd.f32 %v2631_v13, %v1189_v4  ;;  %v1284_v58 = vadd.f32 %v2635_v2, %v1212_v15 }
 0x4d2   :  { %v1291_v55 = vadd.f32 1.0, %v2908_v5 }
 0x4d3   :  { %2909 = vrcp.f32 %v1248_v17  ;;  %v2633_v59 = vmul.f32 -1.442695, %v1241_v57  ;;  %v2637_v60 = vmul.f32 -1.442695, %v1284_v58  ;;  %v1261_v42 = vand.u32 2147483648, %v1248_v17 }
 0x4d4   :  { %2911 = vrcp.f32 %v1291_v55  ;;  %v1259_v16 = vand.u32 2147483647, %v1248_v17  ;;  %vm1255_vm7 = vweird.f32 %v1248_v17  ;;  %v1304_v1 = vand.u32 2147483648, %v1291_v55 }
 0x4d5   :  { %2913 = vpow2.f32 %v2633_v59  ;;  %v1262_v26 = vor.u32 1.1754944e-38, %v1261_v42  ;;  %vm1298_vm11 = vweird.f32 %v1291_v55  ;;  %v1302_v39 = vand.u32 2147483647, %v1291_v55 }
 0x4d6   :  { %2915 = vpow2.f32 %v2637_v60  ;;  %vm1260_vm9 = vcmp.eq.f32.partialorder %v1259_v16, 8.507059e+37  ;;  %v1305_v56 = vor.u32 1.1754944e-38, %v1304_v1 }
 0x4d7   :  { %vm1303_vm13 = vcmp.eq.f32.partialorder %v1302_v39, 8.507059e+37 }
 0x4d9   :  { %v2910_v61 = vpop.eup %2909 }
 0x4da   :  { %v2912_v25 = vpop.eup %2911  ;;  %v1251_v62 = vmul.f32 %v2910_v61, %v1248_v17  ;;  %vm1256_vm6 = vweird.f32 %v2910_v61 }
 0x4db   :  { %v1294_v9 = vmul.f32 %v2912_v25, %v1291_v55  ;;  %v2914_v11 = vpop.eup %2913  ;;  %vm1257_vm8 = vmor %vm1255_vm7, %vm1256_vm6  ;;  %vm1299_vm10 = vweird.f32 %v2912_v25  ;;  %v2639_v55 = vld [vmem:[%s4126_s3 + $0x68] sm:$0xff] }
 0x4dc   :  { %v1252_v10 = vsub.f32 1.0, %v1251_v62  ;;  %v2916_v14 = vpop.eup %2915  ;;  %v1249_v49 = vadd.f32 1.0, %v2914_v11  ;;  %vm1300_vm12 = vmor %vm1298_vm11, %vm1299_vm10 }
 0x4dd   :  { %v1295_v12 = vsub.f32 1.0, %v1294_v9  ;;  %v3736_v37 = vadd.f32 1.0, %v2916_v14 }
 0x4de   :  { %v1253_v6 = vmul.f32 %v2910_v61, %v1252_v10  ;;  %2917 = vrcp.f32 %v1249_v49  ;;  %v1276_v46 = vand.u32 2147483648, %v1249_v49  ;;  %v1274_v51 = vand.u32 2147483647, %v1249_v49 }
 0x4df   :  { %v1296_v27 = vmul.f32 %v2912_v25, %v1295_v12  ;;  %2919 = vrcp.f32 %v3736_v37  ;;  %vm1270_vm0 = vweird.f32 %v1249_v49  ;;  %v1319_v60 = vand.u32 2147483648, %v3736_v37 }
 0x4e0   :  { %v1254_v24 = vadd.f32 %v2910_v61, %v1253_v6  ;;  %v1277_v2 = vor.u32 1.1754944e-38, %v1276_v46  ;;  %vm1275_vm2 = vcmp.eq.f32.partialorder %v1274_v51, 8.507059e+37  ;;  %vm1313_vm4 = vweird.f32 %v3736_v37 }
 0x4e1   :  { %v1297_v35 = vadd.f32 %v2912_v25, %v1296_v27  ;;  %v1317_v62 = vand.u32 2147483647, %v3736_v37 }
 0x4e2   :  { %v1258_v54 = vsel %vm1257_vm8, %v2910_v61, %v1254_v24 }
 0x4e3   :  { %v1263_v29 = vsel %vm1260_vm9, %v1262_v26, %v1258_v54  ;;  %v1301_v45 = vsel %vm1300_vm12, %v2912_v25, %v1297_v35  ;;  %vm1318_vm6 = vcmp.eq.f32.partialorder %v1317_v62, 8.507059e+37  ;;  %v2650_v26 = vld [vmem:[%s4125_s11 + $0x70] sm:$0xff] }
 0x4e4   :  { %v1326_v32 = vmul.f32 %v1263_v29, %v1232_v28  ;;  %v2918_v36 = vpop.eup %2917  ;;  %v1306_v52 = vsel %vm1303_vm13, %v1305_v56, %v1301_v45 }
 0x4e5   :  { %v2920_v38 = vpop.eup %2919  ;;  %v1266_v40 = vmul.f32 %v2918_v36, %v1249_v49  ;;  %vm1271_vm15 = vweird.f32 %v2918_v36  ;;  %v1332_v15 = vsub.f32 1.0, %v1306_v52  ;;  %v2646_v49 = vld [vmem:[%s4124_s4 + $0x70] sm:$0xff] }
 0x4e6   :  { %v1328_v33 = vadd.f32 %v2638_v30, %v1326_v32  ;;  %v1309_v43 = vmul.f32 %v2920_v38, %v3736_v37  ;;  %vm1272_vm1 = vmor %vm1270_vm0, %vm1271_vm15  ;;  %vm1314_vm3 = vweird.f32 %v2920_v38 }
 0x4e7   :  { %v1267_v44 = vsub.f32 1.0, %v1266_v40  ;;  %vm1315_vm5 = vmor %vm1313_vm4, %vm1314_vm3 }
 0x4e8   :  { %2921 = vtanh.f32 %v1328_v33  ;;  %v1310_v47 = vsub.f32 1.0, %v1309_v43 }
 0x4e9   :  { %v1268_v50 = vmul.f32 %v2918_v36, %v1267_v44  ;;  %v2651_v44 = vld [vmem:[%s4125_s11 + $0x78] sm:$0xff] }
 0x4ea   :  { %v1311_v3 = vmul.f32 %v2920_v38, %v1310_v47 }
 0x4eb   :  { %v1269_v53 = vadd.f32 %v2918_v36, %v1268_v50 }
 0x4ec   :  { %v1312_v59 = vadd.f32 %v2920_v38, %v1311_v3 }
 0x4ed   :  { %v1273_v4 = vsel %vm1272_vm1, %v2918_v36, %v1269_v53  ;;  %v2647_v36 = vld [vmem:[%s4124_s4 + $0x78] sm:$0xff] }
 0x4ee   :  { %v2922_v13 = vpop.eup %2921  ;;  %v1278_v17 = vsel %vm1275_vm2, %v1277_v2, %v1273_v4  ;;  %v1316_v9 = vsel %vm1315_vm5, %v2920_v38, %v1312_v59 }
 0x4ef   :  { %v1334_v5 = vsub.f32 %v2922_v13, %v3695_v34  ;;  %v1327_v57 = vmul.f32 %v1278_v17, %v1235_v0 }
 0x4f1   :  { %v1336_v58 = vmul.f32 %v1334_v5, %v1332_v15  ;;  %v1329_v25 = vadd.f32 %v2639_v55, %v1327_v57 }
 0x4f3   :  { %v3751_v61 = vadd.f32 %v1336_v58, %v3695_v34  ;;  %2923 = vtanh.f32 %v1329_v25  ;;  %v1320_v34 = vor.u32 1.1754944e-38, %v1319_v60  ;;  %v2654_v58 = vld [vmem:[%s4126_s3 + $0x70] sm:$0xff] }
 0x4f5   :  { %2640 = vmatmul.msk.f32.vlgmr.msrb.gmra.mxu1 %vm95_vm14, %v3751_v61  ;;  %2642 = vmatmul.msk.f32.vlgmr.msrb.gmra.mxu2 %vm95_vm14, %v3751_v61  ;;  %v1321_v10 = vsel %vm1318_vm6, %v1320_v34, %v1316_v9 }
 0x4f6   :  { %2644 = vmatmul.msk.f32.vlgmr.msrb.gmra.mxu3 %vm95_vm14, %v3751_v61  ;;  %1762 = vmatpush.msrb.mxu1 %v3535_v31  ;;  %v1333_v42 = vsub.f32 1.0, %v1321_v10 }
 0x4f7   :  { %1894 = vmatpush.msrb.mxu2 %v3541_v18  ;;  %1917 = vmatpush.msrb.mxu3 %v3547_v19 }
 0x4f8   :  { %1763 = vmatpush.msrb.mxu1 %v3554_v21 }
 0x4f9   :  { %1895 = vmatpush.msrb.mxu2 %v3560_v22  ;;  %1918 = vmatpush.msrb.mxu3 %v3566_v23  ;;  %v2924_v11 = vpop.eup %2923 }
 0x4fa   :  { %v1335_v12 = vsub.f32 %v2924_v11, %v3712_v8 }
 0x4fc   :  { %v1337_v14 = vmul.f32 %v1335_v12, %v1333_v42 }
 0x4fe   :  { %v3769_v6 = vadd.f32 %v1337_v14, %v3712_v8 }
 0x500   :  { %2641 = vmatmul.msk.f32.gmra.mxu1 %vm95_vm14, %v3769_v6  ;;  %2643 = vmatmul.msk.f32.gmra.mxu2 %vm95_vm14, %v3769_v6 }
 0x501   :  { %2645 = vmatmul.msk.f32.gmra.mxu3 %vm95_vm14, %v3769_v6 }
 0x572   :  { %v1363_v16 = vpop.f32.mrf.mxu1 }
 0x573   :  { %v1364_v20 = vadd.f32 %v3595_v7, %v1363_v16 }
 0x575   :  { %v1418_v37 = vadd.f32 %v2646_v49, %v1364_v20 }
 0x577   :  { %v2648_v24 = vmul.f32 -1.442695, %v1418_v37 }
 0x578   :  { %v1386_v8 = vpop.f32.mrf.mxu2 }
 0x579   :  { %2925 = vpow2.f32 %v2648_v24  ;;  %v1387_v27 = vadd.f32 %v3601_v41, %v1386_v8  ;;  %v1409_v0 = vpop.f32.mrf.mxu3 }
 0x57a   :  { %v1410_v17 = vadd.f32 %v3610_v63, %v1409_v0 }
 0x57b   :  { %v1461_v28 = vadd.f32 %v2650_v26, %v1387_v27 }
 0x57d   :  { %v2652_v54 = vmul.f32 -1.442695, %v1461_v28  ;;  %v1366_v30 = vpop.f32.mrf.mxu1 }
 0x57e   :  { %v1367_v35 = vadd.f32 %v3595_v7, %v1366_v30 }
 0x57f   :  { %v2926_v29 = vpop.eup %2925  ;;  %2927 = vpow2.f32 %v2652_v54 }
 0x580   :  { %v1426_v32 = vadd.f32 1.0, %v2926_v29  ;;  %v1419_v1 = vadd.f32 %v2647_v36, %v1367_v35 }
 0x582   :  { %2929 = vrcp.f32 %v1426_v32  ;;  %v2649_v38 = vmul.f32 -1.442695, %v1419_v1  ;;  %v1439_v50 = vand.u32 2147483648, %v1426_v32  ;;  %v1437_v53 = vand.u32 2147483647, %v1426_v32 }
 0x583   :  { %v1389_v39 = vpop.f32.mrf.mxu2  ;;  %vm1433_vm8 = vweird.f32 %v1426_v32 }
 0x584   :  { %v1390_v43 = vadd.f32 %v3601_v41, %v1389_v39  ;;  %2931 = vpow2.f32 %v2649_v38  ;;  %v1440_v15 = vor.u32 1.1754944e-38, %v1439_v50  ;;  %vm1438_vm10 = vcmp.eq.f32.partialorder %v1437_v53, 8.507059e+37  ;;  %v1412_v27 = vpop.f32.mrf.mxu3  ;;  %v2655_v39 = vld [vmem:[%s4126_s3 + $0x78] sm:$0xff] }
 0x585   :  { %v2928_v33 = vpop.eup %2927  ;;  %v1413_v1 = vadd.f32 %v3610_v63, %v1412_v27 }
 0x586   :  { %v1469_v40 = vadd.f32 1.0, %v2928_v33  ;;  %v1462_v46 = vadd.f32 %v2651_v44, %v1390_v43 }
 0x588   :  { %v2930_v45 = vpop.eup %2929  ;;  %2933 = vrcp.f32 %v1469_v40  ;;  %v2653_v48 = vmul.f32 -1.442695, %v1462_v46  ;;  %v1482_v34 = vand.u32 2147483648, %v1469_v40  ;;  %vm1476_vm12 = vweird.f32 %v1469_v40 }
 0x589   :  { %v1429_v56 = vmul.f32 %v2930_v45, %v1426_v32  ;;  %vm1434_vm7 = vweird.f32 %v2930_v45  ;;  %v1480_v42 = vand.u32 2147483647, %v1469_v40 }
 0x58a   :  { %v2932_v51 = vpop.eup %2931  ;;  %2935 = vpow2.f32 %v2653_v48  ;;  %vm1435_vm9 = vmor %vm1433_vm8, %vm1434_vm7  ;;  %v1483_v16 = vor.u32 1.1754944e-38, %v1482_v34 }
 0x58b   :  { %v1430_v47 = vsub.f32 1.0, %v1429_v56  ;;  %v1427_v2 = vadd.f32 1.0, %v2932_v51  ;;  %vm1481_vm15 = vcmp.eq.f32.partialorder %v1480_v42, 8.507059e+37 }
 0x58d   :  { %v1431_v52 = vmul.f32 %v2930_v45, %v1430_v47  ;;  %2937 = vrcp.f32 %v1427_v2  ;;  %v1454_v20 = vand.u32 2147483648, %v1427_v2  ;;  %v1452_v24 = vand.u32 2147483647, %v1427_v2 }
 0x58e   :  { %v2934_v13 = vpop.eup %2933  ;;  %vm1448_vm1 = vweird.f32 %v1427_v2 }
 0x58f   :  { %v1472_v3 = vmul.f32 %v2934_v13, %v1469_v40  ;;  %v1432_v4 = vadd.f32 %v2930_v45, %v1431_v52  ;;  %vm1477_vm11 = vweird.f32 %v2934_v13  ;;  %v1455_v32 = vor.u32 1.1754944e-38, %v1454_v20 }
 0x590   :  { %v2936_v59 = vpop.eup %2935  ;;  %vm1478_vm13 = vmor %vm1476_vm12, %vm1477_vm11  ;;  %vm1453_vm3 = vcmp.eq.f32.partialorder %v1452_v24, 8.507059e+37 }
 0x591   :  { %v1473_v5 = vsub.f32 1.0, %v1472_v3  ;;  %v1436_v55 = vsel %vm1435_vm9, %v2930_v45, %v1432_v4  ;;  %v1470_v62 = vadd.f32 1.0, %v2936_v59 }
 0x592   :  { %v1441_v57 = vsel %vm1438_vm10, %v1440_v15, %v1436_v55 }
 0x593   :  { %v1474_v60 = vmul.f32 %v2934_v13, %v1473_v5  ;;  %v1504_v25 = vmul.f32 %v1441_v57, %v1410_v17  ;;  %v2938_v11 = vpop.eup %2937  ;;  %2939 = vrcp.f32 %v1470_v62  ;;  %v1497_v46 = vand.u32 2147483648, %v1470_v62 }
 0x594   :  { %v1444_v12 = vmul.f32 %v2938_v11, %v1427_v2  ;;  %vm1449_vm0 = vweird.f32 %v2938_v11  ;;  %vm1491_vm5 = vweird.f32 %v1470_v62  ;;  %v1495_v48 = vand.u32 2147483647, %v1470_v62 }
 0x595   :  { %v1475_v9 = vadd.f32 %v2934_v13, %v1474_v60  ;;  %v1506_v10 = vadd.f32 %v2654_v58, %v1504_v25  ;;  %vm1450_vm2 = vmor %vm1448_vm1, %vm1449_vm0  ;;  %v1498_v50 = vor.u32 1.1754944e-38, %v1497_v46  ;;  %v2663_v25 = vld [vmem:[%s4124_s4 + $0x88] sm:$0xff] }
 0x596   :  { %v1445_v49 = vsub.f32 1.0, %v1444_v12  ;;  %vm1496_vm7 = vcmp.eq.f32.partialorder %v1495_v48, 8.507059e+37 }
 0x597   :  { %2941 = vtanh.f32 %v1506_v10  ;;  %v1479_v14 = vsel %vm1478_vm13, %v2934_v13, %v1475_v9  ;;  %v2667_v9 = vld [vmem:[%s4125_s11 + $0x88] sm:$0xff] }
 0x598   :  { %v1446_v37 = vmul.f32 %v2938_v11, %v1445_v49  ;;  %v1484_v8 = vsel %vm1481_vm15, %v1483_v16, %v1479_v14 }
 0x599   :  { %v2940_v26 = vpop.eup %2939  ;;  %v1510_v35 = vsub.f32 1.0, %v1484_v8 }
 0x59a   :  { %v1487_v54 = vmul.f32 %v2940_v26, %v1470_v62  ;;  %v1447_v29 = vadd.f32 %v2938_v11, %v1446_v37  ;;  %vm1492_vm4 = vweird.f32 %v2940_v26 }
 0x59b   :  { %vm1493_vm6 = vmor %vm1491_vm5, %vm1492_vm4 }
 0x59c   :  { %v1488_v36 = vsub.f32 1.0, %v1487_v54  ;;  %v1451_v33 = vsel %vm1450_vm2, %v2938_v11, %v1447_v29 }
 0x59d   :  { %v2942_v28 = vpop.eup %2941  ;;  %v1456_v38 = vsel %vm1453_vm3, %v1455_v32, %v1451_v33  ;;  %v2670_v33 = vld [vmem:[%s4126_s3 + $0x80] sm:$0xff] }
 0x59e   :  { %v1512_v30 = vsub.f32 %v2942_v28, %v3751_v61  ;;  %v1489_v43 = vmul.f32 %v2940_v26, %v1488_v36  ;;  %v1505_v44 = vmul.f32 %v1456_v38, %v1413_v1 }
 0x5a0   :  { %v1514_v40 = vmul.f32 %v1512_v30, %v1510_v35  ;;  %v1490_v56 = vadd.f32 %v2940_v26, %v1489_v43  ;;  %v1507_v47 = vadd.f32 %v2655_v39, %v1505_v44 }
 0x5a2   :  { %v3803_v45 = vadd.f32 %v1514_v40, %v3751_v61  ;;  %2943 = vtanh.f32 %v1507_v47  ;;  %v1494_v61 = vsel %vm1493_vm6, %v2940_v26, %v1490_v56 }
 0x5a3   :  { %v1499_v51 = vsel %vm1496_vm7, %v1498_v50, %v1494_v61 }
 0x5a4   :  { %2656 = vmatmul.msk.f32.vlgmr.msra.gmra.mxu0 %vm95_vm14, %v3803_v45  ;;  %2658 = vmatmul.msk.f32.vlgmr.msra.gmra.mxu1 %vm95_vm14, %v3803_v45  ;;  %v1511_v13 = vsub.f32 1.0, %v1499_v51 }
 0x5a5   :  { %2660 = vmatmul.msk.f32.vlgmr.msra.gmra.mxu2 %vm95_vm14, %v3803_v45  ;;  %1940 = vmatpush.msra.mxu0 %v3535_v31 }
 0x5a6   :  { %2072 = vmatpush.msra.mxu1 %v3541_v18  ;;  %2095 = vmatpush.msra.mxu2 %v3547_v19  ;;  %v2662_v19 = vld [vmem:[%s4124_s4 + $0x80] sm:$0xff] }
 0x5a7   :  { %1941 = vmatpush.msra.mxu0 %v3554_v21 }
 0x5a8   :  { %2073 = vmatpush.msra.mxu1 %v3560_v22  ;;  %2096 = vmatpush.msra.mxu2 %v3566_v23  ;;  %v2944_v52 = vpop.eup %2943  ;;  %v2666_v22 = vld [vmem:[%s4125_s11 + $0x80] sm:$0xff] }
 0x5a9   :  { %v1513_v53 = vsub.f32 %v2944_v52, %v3769_v6 }
 0x5ab   :  { %v1515_v0 = vmul.f32 %v1513_v53, %v1511_v13 }
 0x5ad   :  { %v3819_v31 = vadd.f32 %v1515_v0, %v3769_v6 }
 0x5af   :  { %2657 = vmatmul.msk.f32.gmra.mxu0 %vm95_vm14, %v3819_v31  ;;  %2659 = vmatmul.msk.f32.gmra.mxu1 %vm95_vm14, %v3819_v31 }
 0x5b0   :  { %2661 = vmatmul.msk.f32.gmra.mxu2 %vm95_vm14, %v3819_v31 }
 0x621   :  { %v1541_v18 = vpop.f32.mrf.mxu0  ;;  %v1564_v21 = vpop.f32.mrf.mxu1 }
 0x622   :  { %v1542_v23 = vadd.f32 %v3595_v7, %v1541_v18  ;;  %v1565_v6 = vadd.f32 %v3601_v41, %v1564_v21 }
 0x624   :  { %v1596_v2 = vadd.f32 %v2662_v19, %v1542_v23  ;;  %v1639_v3 = vadd.f32 %v2666_v22, %v1565_v6 }
 0x626   :  { %v2664_v4 = vmul.f32 -1.442695, %v1596_v2  ;;  %v2668_v15 = vmul.f32 -1.442695, %v1639_v3  ;;  %v3855_v3 = vld [vmem:[%s4101_s10] ss:$0 sm:$0xff] }
 0x627   :  { %s2740_s10 = sld [smem:[#allocation2 + $0x1]] }
 0x628   :  { %2945 = vpow2.f32 %v2664_v4  ;;  %v1587_v26 = vpop.f32.mrf.mxu2 }
 0x629   :  { %2947 = vpow2.f32 %v2668_v15  ;;  %v1588_v35 = vadd.f32 %v3610_v63, %v1587_v26  ;;  %v2678_v26 = vld [vmem:[%s4124_s4 + $0x90] sm:$0xff] }
 0x62c   :  { %v1544_v57 = vpop.f32.mrf.mxu0  ;;  %v1567_v58 = vpop.f32.mrf.mxu1 }
 0x62d   :  { %v1545_v60 = vadd.f32 %v3595_v7, %v1544_v57  ;;  %v1568_v62 = vadd.f32 %v3601_v41, %v1567_v58 }
 0x62e   :  { %v2946_v5 = vpop.eup %2945 }
 0x62f   :  { %v2948_v17 = vpop.eup %2947  ;;  %v1604_v55 = vadd.f32 1.0, %v2946_v5  ;;  %v1597_v34 = vadd.f32 %v2663_v25, %v1545_v60  ;;  %v1640_v10 = vadd.f32 %v2667_v9, %v1568_v62 }
 0x630   :  { %v1647_v59 = vadd.f32 1.0, %v2948_v17 }
 0x631   :  { %2949 = vrcp.f32 %v1604_v55  ;;  %v2665_v11 = vmul.f32 -1.442695, %v1597_v34  ;;  %v2669_v42 = vmul.f32 -1.442695, %v1640_v10  ;;  %v1617_v37 = vand.u32 2147483648, %v1604_v55  ;;  %v3036_v34 = vld [vmem:[%s4098_s7] sm:$0xff] }
 0x632   :  { %2951 = vrcp.f32 %v1647_v59  ;;  %v1615_v24 = vand.u32 2147483647, %v1604_v55  ;;  %vm1611_vm9 = vweird.f32 %v1604_v55  ;;  %v1660_v40 = vand.u32 2147483648, %v1647_v59 }
 0x633   :  { %2953 = vpow2.f32 %v2665_v11  ;;  %v1618_v30 = vor.u32 1.1754944e-38, %v1617_v37  ;;  %vm1654_vm13 = vweird.f32 %v1647_v59  ;;  %v1658_v44 = vand.u32 2147483647, %v1647_v59  ;;  %v1590_v19 = vpop.f32.mrf.mxu2  ;;  %v3895_v37 = vld [vmem:[%s4100_s9] ss:$0 sm:$0xff]  ;;  %s3108_s9 = smov 128  }
 0x634   :  { %2955 = vpow2.f32 %v2669_v42  ;;  %vm1616_vm11 = vcmp.eq.f32.partialorder %v1615_v24, 8.507059e+37  ;;  %v1661_v48 = vor.u32 1.1754944e-38, %v1660_v40  ;;  %v1591_v4 = vadd.f32 %v3855_v3, %v1590_v19 }
 0x635   :  { %vm1659_vm0 = vcmp.eq.f32.partialorder %v1658_v44, 8.507059e+37  ;;  %v2679_v44 = vld [vmem:[%s4124_s4 + $0x98] sm:$0xff] }
 0x637   :  { %v2950_v12 = vpop.eup %2949 }
 0x638   :  { %v2952_v14 = vpop.eup %2951  ;;  %v1607_v7 = vmul.f32 %v2950_v12, %v1604_v55  ;;  %vm1612_vm8 = vweird.f32 %v2950_v12  ;;  %v2671_v55 = vld [vmem:[%s4126_s3 + $0x88] sm:$0xff] }
 0x639   :  { %v1650_v16 = vmul.f32 %v2952_v14, %v1647_v59  ;;  %v2954_v8 = vpop.eup %2953  ;;  %vm1613_vm10 = vmor %vm1611_vm9, %vm1612_vm8  ;;  %vm1655_vm12 = vweird.f32 %v2952_v14 }
 0x63a   :  { %v1608_v49 = vsub.f32 1.0, %v1607_v7  ;;  %v2956_v27 = vpop.eup %2955  ;;  %v1605_v54 = vadd.f32 1.0, %v2954_v8  ;;  %vm1656_vm15 = vmor %vm1654_vm13, %vm1655_vm12 }
 0x63b   :  { %v1651_v20 = vsub.f32 1.0, %v1650_v16  ;;  %v3843_v32 = vadd.f32 1.0, %v2956_v27  ;;  %v3904_v27 = vld [vmem:[%s4099_s8] ss:$0 sm:$0xff]  ;;  %s3110_s8 = smov [#allocation6]  }
 0x63c   :  { %v1609_v41 = vmul.f32 %v2950_v12, %v1608_v49  ;;  %2957 = vrcp.f32 %v1605_v54  ;;  %v1632_v52 = vand.u32 2147483648, %v1605_v54  ;;  %v1630_v0 = vand.u32 2147483647, %v1605_v54  ;;  %s2523_s25 = sshll.u32 %s3110_s8, 4  ;;  %s2524_s25 = int_to_ptr.vmem [resolvable:$true] %s2523_s25 }
 0x63d   :  { %v1652_v29 = vmul.f32 %v2952_v14, %v1651_v20  ;;  %2959 = vrcp.f32 %v3843_v32  ;;  %vm1626_vm2 = vweird.f32 %v1605_v54  ;;  %v1675_v60 = vand.u32 2147483648, %v3843_v32  ;;  %v2682_v20 = vld [vmem:[%s4125_s11 + $0x90] sm:$0xff] }
 0x63e   :  { %v1610_v28 = vadd.f32 %v2950_v12, %v1609_v41  ;;  %v1633_v2 = vor.u32 1.1754944e-38, %v1632_v52  ;;  %vm1631_vm4 = vcmp.eq.f32.partialorder %v1630_v0, 8.507059e+37  ;;  %vm1669_vm6 = vweird.f32 %v3843_v32 }
 0x63f   :  { %v1653_v39 = vadd.f32 %v2952_v14, %v1652_v29  ;;  %v1673_v62 = vand.u32 2147483647, %v3843_v32  ;;  %v1676_v10 = vor.u32 1.1754944e-38, %v1675_v60 }
 0x640   :  { %v1614_v36 = vsel %vm1613_vm10, %v2950_v12, %v1610_v28 }
 0x641   :  { %v1619_v1 = vsel %vm1616_vm11, %v1618_v30, %v1614_v36  ;;  %v1657_v47 = vsel %vm1656_vm15, %v2952_v14, %v1653_v39  ;;  %vm1674_vm8 = vcmp.eq.f32.partialorder %v1673_v62, 8.507059e+37  ;;  %v2683_v36 = vld [vmem:[%s4125_s11 + $0x98] sm:$0xff] }
 0x642   :  { %v1682_v38 = vmul.f32 %v1619_v1, %v1588_v35  ;;  %v2958_v56 = vpop.eup %2957  ;;  %v1662_v53 = vsel %vm1659_vm0, %v1661_v48, %v1657_v47 }
 0x643   :  { %v2960_v63 = vpop.eup %2959  ;;  %v1622_v46 = vmul.f32 %v2958_v56, %v1605_v54  ;;  %vm1627_vm1 = vweird.f32 %v2958_v56  ;;  %v1688_v23 = vsub.f32 1.0, %v1662_v53 }
 0x644   :  { %v1684_v43 = vadd.f32 %v2670_v33, %v1682_v38  ;;  %v1665_v61 = vmul.f32 %v2960_v63, %v3843_v32  ;;  %vm1628_vm3 = vmor %vm1626_vm2, %vm1627_vm1  ;;  %vm1670_vm5 = vweird.f32 %v2960_v63 }
 0x645   :  { %v1623_v50 = vsub.f32 1.0, %v1622_v46  ;;  %vm1671_vm7 = vmor %vm1669_vm6, %vm1670_vm5 }
 0x646   :  { %2961 = vtanh.f32 %v1684_v43  ;;  %v1666_v51 = vsub.f32 1.0, %v1665_v61 }
 0x647   :  { %v1624_v13 = vmul.f32 %v2958_v56, %v1623_v50 }
 0x648   :  { %v1667_v6 = vmul.f32 %v2960_v63, %v1666_v51 }
 0x649   :  { %v1625_v22 = vadd.f32 %v2958_v56, %v1624_v13 }
 0x64a   :  { %v1668_v59 = vadd.f32 %v2960_v63, %v1667_v6 }
 0x64b   :  { %v1629_v15 = vsel %vm1628_vm3, %v2958_v56, %v1625_v22 }
 0x64c   :  { %v2962_v18 = vpop.eup %2961  ;;  %v1634_v17 = vsel %vm1631_vm4, %v1633_v2, %v1629_v15  ;;  %v1672_v9 = vsel %vm1671_vm7, %v2960_v63, %v1668_v59 }
 0x64d   :  { %v1690_v21 = vsub.f32 %v2962_v18, %v3803_v45  ;;  %v1683_v57 = vmul.f32 %v1634_v17, %v1591_v4  ;;  %v1677_v11 = vsel %vm1674_vm8, %v1676_v10, %v1672_v9 }
 0x64e   :  { %v1689_v14 = vsub.f32 1.0, %v1677_v11 }
 0x64f   :  { %v1692_v5 = vmul.f32 %v1690_v21, %v1688_v23  ;;  %v1685_v25 = vadd.f32 %v2671_v55, %v1683_v57  ;;  %v2686_v55 = vld [vmem:[%s4126_s3 + $0x90] sm:$0xff] }
 0x651   :  { %v3862_v58 = vadd.f32 %v1692_v5, %v3803_v45  ;;  %v3035_v45 = vld [vmem:[%s4098_s7 + $0x8] sm:$0xff]  ;;  %2963 = vtanh.f32 %v1685_v25  ;;  %s2751_s7 = sld [smem:[#allocation2 + $0x2]] }
 0x653   :  { %2672 = vmatmul.msk.f32.vlgmr.msra.gmra.mxu3 %vm95_vm14, %v3862_v58  ;;  %2674 = vmatmul.msk.f32.vlgmr.msrb.gmra.mxu0 %vm95_vm14, %v3862_v58 }
 0x654   :  { %2676 = vmatmul.msk.f32.vlgmr.msrb.gmra.mxu1 %vm95_vm14, %v3862_v58  ;;  %2118 = vmatpush.msra.mxu3 %v3035_v45 }
 0x656   :  { %2119 = vmatpush.msra.mxu3 %v3036_v34 }
 0x657   :  { %v2964_v42 = vpop.eup %2963 }
 0x658   :  { %v1691_v12 = vsub.f32 %v2964_v42, %v3819_v31 }
 0x65a   :  { %v1693_v7 = vmul.f32 %v1691_v12, %v1689_v14 }
 0x65c   :  { %v3881_v16 = vadd.f32 %v1693_v7, %v3819_v31 }
 0x65e   :  { %2673 = vmatmul.msk.f32.gmra.mxu3 %vm95_vm14, %v3881_v16  ;;  %2675 = vmatmul.msk.f32.gmra.mxu0 %vm95_vm14, %v3881_v16 }
 0x65f   :  { %2677 = vmatmul.msk.f32.gmra.mxu1 %vm95_vm14, %v3881_v16 }
 0x6d0   :  { %v1742_v49 = vpop.f32.mrf.mxu0 }
 0x6d1   :  { %v1743_v31 = vadd.f32 %v3895_v37, %v1742_v49  ;;  %v1765_v21 = vpop.f32.mrf.mxu1 }
 0x6d2   :  { %v1766_v15 = vadd.f32 %v3855_v3, %v1765_v21 }
 0x6d3   :  { %v1817_v41 = vadd.f32 %v2682_v20, %v1743_v31 }
 0x6d5   :  { %v2684_v24 = vmul.f32 -1.442695, %v1817_v41 }
 0x6d6   :  { %v1719_v8 = vpop.f32.mrf.mxu3 }
 0x6d7   :  { %2965 = vpow2.f32 %v2684_v24  ;;  %v1720_v28 = vadd.f32 %v3904_v27, %v1719_v8 }
 0x6d9   :  { %v1774_v54 = vadd.f32 %v2678_v26, %v1720_v28 }
 0x6db   :  { %v2680_v29 = vmul.f32 -1.442695, %v1774_v54  ;;  %v1745_v35 = vpop.f32.mrf.mxu0 }
 0x6dc   :  { %v1746_v1 = vadd.f32 %v3895_v37, %v1745_v35  ;;  %v1768_v24 = vpop.f32.mrf.mxu1 }
 0x6dd   :  { %v2966_v30 = vpop.eup %2965  ;;  %2967 = vpow2.f32 %v2680_v29 }
 0x6de   :  { %v1825_v32 = vadd.f32 1.0, %v2966_v30  ;;  %v1818_v38 = vadd.f32 %v2683_v36, %v1746_v1 }
 0x6e0   :  { %2969 = vrcp.f32 %v1825_v32  ;;  %v2685_v40 = vmul.f32 -1.442695, %v1818_v38  ;;  %v1838_v25 = vand.u32 2147483648, %v1825_v32  ;;  %vm1832_vm15 = vweird.f32 %v1825_v32 }
 0x6e1   :  { %v1722_v43 = vpop.f32.mrf.mxu3  ;;  %v1836_v45 = vand.u32 2147483647, %v1825_v32 }
 0x6e2   :  { %v1723_v56 = vadd.f32 %v3904_v27, %v1722_v43  ;;  %v1839_v11 = vor.u32 1.1754944e-38, %v1838_v25 }
 0x6e3   :  { %v2968_v33 = vpop.eup %2967  ;;  %vm1837_vm1 = vcmp.eq.f32.partialorder %v1836_v45, 8.507059e+37 }
 0x6e4   :  { %v1782_v39 = vadd.f32 1.0, %v2968_v33  ;;  %v1775_v46 = vadd.f32 %v2679_v44, %v1723_v56  ;;  %v2687_v33 = vld [vmem:[%s4126_s3 + $0x98] sm:$0xff] }
 0x6e6   :  { %2971 = vrcp.f32 %v1782_v39  ;;  %v2970_v63 = vpop.eup %2969  ;;  %v2681_v47 = vmul.f32 -1.442695, %v1775_v46  ;;  %v1795_v0 = vand.u32 2147483648, %v1782_v39  ;;  %v1793_v19 = vand.u32 2147483647, %v1782_v39 }
 0x6e7   :  { %2973 = vpow2.f32 %v2685_v40  ;;  %v1828_v61 = vmul.f32 %v2970_v63, %v1825_v32  ;;  %vm1789_vm10 = vweird.f32 %v1782_v39  ;;  %vm1833_vm13 = vweird.f32 %v2970_v63 }
 0x6e8   :  { %2975 = vpow2.f32 %v2681_v47  ;;  %v1796_v2 = vor.u32 1.1754944e-38, %v1795_v0  ;;  %vm1794_vm12 = vcmp.eq.f32.partialorder %v1793_v19, 8.507059e+37  ;;  %vm1834_vm0 = vmor %vm1832_vm15, %vm1833_vm13  ;;  %v1769_v32 = vadd.f32 %v3855_v3, %v1768_v24 }
 0x6e9   :  { %v1829_v13 = vsub.f32 1.0, %v1828_v61 }
 0x6eb   :  { %v1830_v6 = vmul.f32 %v2970_v63, %v1829_v13 }
 0x6ec   :  { %v2972_v48 = vpop.eup %2971 }
 0x6ed   :  { %v2974_v50 = vpop.eup %2973  ;;  %v1785_v51 = vmul.f32 %v2972_v48, %v1782_v39  ;;  %vm1790_vm9 = vweird.f32 %v2972_v48  ;;  %v1831_v59 = vadd.f32 %v2970_v63, %v1830_v6 }
 0x6ee   :  { %v3915_v53 = vadd.f32 1.0, %v2974_v50  ;;  %v2976_v22 = vpop.eup %2975  ;;  %vm1791_vm11 = vmor %vm1789_vm10, %vm1790_vm9 }
 0x6ef   :  { %v1786_v52 = vsub.f32 1.0, %v1785_v51  ;;  %v1783_v4 = vadd.f32 1.0, %v2976_v22  ;;  %v1835_v10 = vsel %vm1834_vm0, %v2970_v63, %v1831_v59 }
 0x6f0   :  { %2977 = vrcp.f32 %v3915_v53  ;;  %v1840_v14 = vsel %vm1837_vm1, %v1839_v11, %v1835_v10  ;;  %v1853_v40 = vand.u32 2147483648, %v3915_v53  ;;  %vm1847_vm7 = vweird.f32 %v3915_v53 }
 0x6f1   :  { %v1787_v18 = vmul.f32 %v2972_v48, %v1786_v52  ;;  %2979 = vrcp.f32 %v1783_v4  ;;  %v1810_v49 = vand.u32 2147483648, %v1783_v4  ;;  %v1808_v41 = vand.u32 2147483647, %v1783_v4  ;;  %v2694_v52 = vld [vmem:[%s4124_s4 + $0xa0] sm:$0xff] }
 0x6f2   :  { %v1866_v8 = vsub.f32 1.0, %v1840_v14  ;;  %vm1804_vm3 = vweird.f32 %v1783_v4  ;;  %v1851_v43 = vand.u32 2147483647, %v3915_v53  ;;  %v1854_v56 = vor.u32 1.1754944e-38, %v1853_v40 }
 0x6f3   :  { %v1788_v23 = vadd.f32 %v2972_v48, %v1787_v18  ;;  %v1811_v29 = vor.u32 1.1754944e-38, %v1810_v49  ;;  %vm1809_vm5 = vcmp.eq.f32.partialorder %v1808_v41, 8.507059e+37 }
 0x6f4   :  { %vm1852_vm9 = vcmp.eq.f32.partialorder %v1851_v43, 8.507059e+37 }
 0x6f5   :  { %v1792_v5 = vsel %vm1791_vm11, %v2972_v48, %v1788_v23 }
 0x6f6   :  { %v1797_v17 = vsel %vm1794_vm12, %v1796_v2, %v1792_v5  ;;  %v2978_v60 = vpop.eup %2977 }
 0x6f7   :  { %v1860_v57 = vmul.f32 %v1797_v17, %v1766_v15  ;;  %v2980_v9 = vpop.eup %2979  ;;  %v1843_v34 = vmul.f32 %v2978_v60, %v3915_v53  ;;  %vm1848_vm6 = vweird.f32 %v2978_v60  ;;  %v2695_v17 = vld [vmem:[%s4124_s4 + $0xa8] sm:$0xff] }
 0x6f8   :  { %v1800_v42 = vmul.f32 %v2980_v9, %v1783_v4  ;;  %vm1805_vm2 = vweird.f32 %v2980_v9  ;;  %vm1849_vm8 = vmor %vm1847_vm7, %vm1848_vm6 }
 0x6f9   :  { %v1862_v62 = vadd.f32 %v2686_v55, %v1860_v57  ;;  %v1844_v7 = vsub.f32 1.0, %v1843_v34  ;;  %vm1806_vm4 = vmor %vm1804_vm3, %vm1805_vm2  ;;  %v2699_v55 = vld [vmem:[%s4125_s11 + $0xa8] sm:$0xff] }
 0x6fa   :  { %v1801_v12 = vsub.f32 1.0, %v1800_v42 }
 0x6fb   :  { %2981 = vtanh.f32 %v1862_v62  ;;  %v1845_v54 = vmul.f32 %v2978_v60, %v1844_v7 }
 0x6fc   :  { %v1802_v31 = vmul.f32 %v2980_v9, %v1801_v12 }
 0x6fd   :  { %v1846_v39 = vadd.f32 %v2978_v60, %v1845_v54 }
 0x6fe   :  { %v1803_v28 = vadd.f32 %v2980_v9, %v1802_v31 }
 0x6ff   :  { %v1850_v44 = vsel %vm1849_vm8, %v2978_v60, %v1846_v39 }
 0x700   :  { %v1807_v35 = vsel %vm1806_vm4, %v2980_v9, %v1803_v28  ;;  %v1855_v63 = vsel %vm1852_vm9, %v1854_v56, %v1850_v44 }
 0x701   :  { %v2982_v20 = vpop.eup %2981  ;;  %v1812_v36 = vsel %vm1809_vm5, %v1811_v29, %v1807_v35  ;;  %v1867_v47 = vsub.f32 1.0, %v1855_v63  ;;  %v2702_v35 = vld [vmem:[%s4126_s3 + $0xa0] sm:$0xff] }
 0x702   :  { %v1868_v26 = vsub.f32 %v2982_v20, %v3862_v58  ;;  %v1861_v38 = vmul.f32 %v1812_v36, %v1769_v32 }
 0x704   :  { %v1870_v30 = vmul.f32 %v1868_v26, %v1866_v8 }
 0x706   :  { %v3926_v1 = vadd.f32 %v1870_v30, %v3862_v58  ;;  %v1863_v58 = vadd.f32 %v2687_v33, %v1861_v38 }
 0x708   :  { %2688 = vmatmul.msk.f32.vlgmr.msrb.gmra.mxu2 %vm95_vm14, %v3926_v1  ;;  %2690 = vmatmul.msk.f32.vlgmr.msrb.gmra.mxu3 %vm95_vm14, %v3926_v1  ;;  %2983 = vtanh.f32 %v1863_v58 }
 0x709   :  { %2692 = vmatmul.msk.f32.vlgmr.msra.gmra.mxu0 %vm95_vm14, %v3926_v1 }
 0x70e   :  { %v2984_v46 = vpop.eup %2983 }
 0x70f   :  { %v1869_v48 = vsub.f32 %v2984_v46, %v3881_v16 }
 0x711   :  { %v1871_v61 = vmul.f32 %v1869_v48, %v1867_v47 }
 0x713   :  { %v3942_v50 = vadd.f32 %v1871_v61, %v3881_v16  ;;  %v2698_v16 = vld [vmem:[%s4125_s11 + $0xa0] sm:$0xff] }
 0x715   :  { %2689 = vmatmul.msk.f32.gmra.mxu2 %vm95_vm14, %v3942_v50  ;;  %2691 = vmatmul.msk.f32.gmra.mxu3 %vm95_vm14, %v3942_v50 }
 0x716   :  { %2693 = vmatmul.msk.f32.gmra.mxu0 %vm95_vm14, %v3942_v50 }
 0x786   :  { %v1943_v20 = vpop.f32.mrf.mxu0 }
 0x787   :  { %v1944_v28 = vadd.f32 %v3855_v3, %v1943_v20  ;;  %v2714_v20 = vld [vmem:[%s4125_s11 + $0xb0] sm:$0xff] }
 0x78b   :  { %v1897_v51 = vpop.f32.mrf.mxu2  ;;  %v1920_v53 = vpop.f32.mrf.mxu3 }
 0x78c   :  { %v1898_v13 = vadd.f32 %v3904_v27, %v1897_v51  ;;  %v1921_v0 = vadd.f32 %v3895_v37, %v1920_v53 }
 0x78e   :  { %v1952_v18 = vadd.f32 %v2694_v52, %v1898_v13  ;;  %v1995_v19 = vadd.f32 %v2698_v16, %v1921_v0 }
 0x790   :  { %v2696_v21 = vmul.f32 -1.442695, %v1952_v18  ;;  %v2700_v22 = vmul.f32 -1.442695, %v1995_v19 }
 0x792   :  { %2985 = vpow2.f32 %v2696_v21 }
 0x793   :  { %2987 = vpow2.f32 %v2700_v22  ;;  %v1946_v18 = vpop.f32.mrf.mxu0 }
 0x798   :  { %v2986_v23 = vpop.eup %2985  ;;  %v1900_v15 = vpop.f32.mrf.mxu2 }
 0x799   :  { %v2988_v6 = vpop.eup %2987  ;;  %v1960_v2 = vadd.f32 1.0, %v2986_v23  ;;  %v1923_v5 = vpop.f32.mrf.mxu3  ;;  %v1901_v57 = vadd.f32 %v3904_v27, %v1900_v15 }
 0x79a   :  { %v2003_v4 = vadd.f32 1.0, %v2988_v6  ;;  %v1924_v59 = vadd.f32 %v3895_v37, %v1923_v5  ;;  %v1947_v6 = vadd.f32 %v3855_v3, %v1946_v18  ;;  %v2703_v5 = vld [vmem:[%s4126_s3 + $0xa8] sm:$0xff] }
 0x79b   :  { %2989 = vrcp.f32 %v1960_v2  ;;  %v1953_v60 = vadd.f32 %v2695_v17, %v1901_v57  ;;  %v1973_v12 = vand.u32 2147483648, %v1960_v2  ;;  %v1971_v49 = vand.u32 2147483647, %v1960_v2 }
 0x79c   :  { %2991 = vrcp.f32 %v2003_v4  ;;  %v1996_v25 = vadd.f32 %v2699_v55, %v1924_v59  ;;  %vm1967_vm11 = vweird.f32 %v1960_v2  ;;  %v2016_v38 = vand.u32 2147483648, %v2003_v4 }
 0x79d   :  { %v2697_v45 = vmul.f32 -1.442695, %v1953_v60  ;;  %v1974_v24 = vor.u32 1.1754944e-38, %v1973_v12  ;;  %vm1972_vm13 = vcmp.eq.f32.partialorder %v1971_v49, 8.507059e+37  ;;  %vm2010_vm0 = vweird.f32 %v2003_v4  ;;  %v2710_v12 = vld [vmem:[%s4124_s4 + $0xb0] sm:$0xff] }
 0x79e   :  { %v2701_v9 = vmul.f32 -1.442695, %v1996_v25  ;;  %v2014_v40 = vand.u32 2147483647, %v2003_v4  ;;  %v2017_v44 = vor.u32 1.1754944e-38, %v2016_v38 }
 0x79f   :  { %2993 = vpow2.f32 %v2697_v45 }
 0x7a0   :  { %2995 = vpow2.f32 %v2701_v9  ;;  %vm2015_vm2 = vcmp.eq.f32.partialorder %v2014_v40, 8.507059e+37 }
 0x7a1   :  { %v2990_v62 = vpop.eup %2989 }
 0x7a2   :  { %v2992_v34 = vpop.eup %2991  ;;  %v1963_v10 = vmul.f32 %v2990_v62, %v1960_v2  ;;  %vm1968_vm10 = vweird.f32 %v2990_v62 }
 0x7a3   :  { %v2006_v11 = vmul.f32 %v2992_v34, %v2003_v4  ;;  %vm1969_vm12 = vmor %vm1967_vm11, %vm1968_vm10  ;;  %vm2011_vm15 = vweird.f32 %v2992_v34 }
 0x7a4   :  { %v1964_v42 = vsub.f32 1.0, %v1963_v10  ;;  %vm2012_vm1 = vmor %vm2010_vm0, %vm2011_vm15 }
 0x7a5   :  { %v2007_v14 = vsub.f32 1.0, %v2006_v11  ;;  %v2994_v41 = vpop.eup %2993 }
 0x7a6   :  { %v1965_v7 = vmul.f32 %v2990_v62, %v1964_v42  ;;  %v2996_v26 = vpop.eup %2995  ;;  %v1961_v29 = vadd.f32 1.0, %v2994_v41 }
 0x7a7   :  { %v2008_v8 = vmul.f32 %v2992_v34, %v2007_v14  ;;  %v2004_v32 = vadd.f32 1.0, %v2996_v26 }
 0x7a8   :  { %v1966_v31 = vadd.f32 %v2990_v62, %v1965_v7  ;;  %2997 = vrcp.f32 %v1961_v29  ;;  %v1986_v51 = vand.u32 2147483647, %v1961_v29  ;;  %v1988_v52 = vand.u32 2147483648, %v1961_v29 }
 0x7a9   :  { %v2009_v33 = vadd.f32 %v2992_v34, %v2008_v8  ;;  %2999 = vrcp.f32 %v2004_v32  ;;  %vm1982_vm4 = vweird.f32 %v1961_v29  ;;  %v2031_v57 = vand.u32 2147483648, %v2004_v32 }
 0x7aa   :  { %v1970_v54 = vsel %vm1969_vm12, %v2990_v62, %v1966_v31  ;;  %v1989_v22 = vor.u32 1.1754944e-38, %v1988_v52  ;;  %vm1987_vm6 = vcmp.eq.f32.partialorder %v1986_v51, 8.507059e+37  ;;  %vm2025_vm8 = vweird.f32 %v2004_v32 }
 0x7ab   :  { %v1975_v30 = vsel %vm1972_vm13, %v1974_v24, %v1970_v54  ;;  %v2013_v58 = vsel %vm2012_vm1, %v2992_v34, %v2009_v33  ;;  %v2029_v59 = vand.u32 2147483647, %v2004_v32  ;;  %v2032_v25 = vor.u32 1.1754944e-38, %v2031_v57  ;;  %v2711_v54 = vld [vmem:[%s4124_s4 + $0xb8] sm:$0xff] }
 0x7ac   :  { %v2038_v36 = vmul.f32 %v1975_v30, %v1944_v28  ;;  %v2018_v47 = vsel %vm2015_vm2, %v2017_v44, %v2013_v58 }
 0x7ad   :  { %v2044_v13 = vsub.f32 1.0, %v2018_v47  ;;  %vm2030_vm10 = vcmp.eq.f32.partialorder %v2029_v59, 8.507059e+37 }
 0x7ae   :  { %v2040_v39 = vadd.f32 %v2702_v35, %v2038_v36  ;;  %v2998_v43 = vpop.eup %2997 }
 0x7af   :  { %v3000_v56 = vpop.eup %2999  ;;  %v1978_v63 = vmul.f32 %v2998_v43, %v1961_v29  ;;  %vm1983_vm3 = vweird.f32 %v2998_v43 }
 0x7b0   :  { %3001 = vtanh.f32 %v2040_v39  ;;  %v2021_v46 = vmul.f32 %v3000_v56, %v2004_v32  ;;  %vm1984_vm5 = vmor %vm1982_vm4, %vm1983_vm3  ;;  %vm2026_vm7 = vweird.f32 %v3000_v56  ;;  %v2715_v39 = vld [vmem:[%s4125_s11 + $0xb8] sm:$0xff] }
 0x7b1   :  { %v1979_v48 = vsub.f32 1.0, %v1978_v63  ;;  %vm2027_vm9 = vmor %vm2025_vm8, %vm2026_vm7 }
 0x7b2   :  { %v2022_v53 = vsub.f32 1.0, %v2021_v46 }
 0x7b3   :  { %v1980_v16 = vmul.f32 %v2998_v43, %v1979_v48 }
 0x7b4   :  { %v2023_v23 = vmul.f32 %v3000_v56, %v2022_v53 }
 0x7b5   :  { %v1981_v19 = vadd.f32 %v2998_v43, %v1980_v16 }
 0x7b6   :  { %v3002_v61 = vpop.eup %3001  ;;  %v2024_v55 = vadd.f32 %v3000_v56, %v2023_v23 }
 0x7b7   :  { %v2046_v0 = vsub.f32 %v3002_v61, %v3926_v1  ;;  %v1985_v2 = vsel %vm1984_vm5, %v2998_v43, %v1981_v19  ;;  %v2765_v61 = vld [vmem:[%s4103_s12] sm:$0xff] }
 0x7b8   :  { %v1990_v15 = vsel %vm1987_vm6, %v1989_v22, %v1985_v2  ;;  %v2028_v60 = vsel %vm2027_vm9, %v3000_v56, %v2024_v55  ;;  %2252 = vmatpush.bf16.msrb.mxu0 %v2765_v61 }
 0x7b9   :  { %v2048_v21 = vmul.f32 %v2046_v0, %v2044_v13  ;;  %v2039_v17 = vmul.f32 %v1990_v15, %v1947_v6  ;;  %v2033_v62 = vsel %vm2030_vm10, %v2032_v25, %v2028_v60  ;;  %v2718_v15 = vld [vmem:[%s4126_s3 + $0xb0] sm:$0xff] }
 0x7ba   :  { %v2045_v9 = vsub.f32 1.0, %v2033_v62 }
 0x7bb   :  { %v3973_v4 = vadd.f32 %v2048_v21, %v3926_v1  ;;  %v2041_v1 = vadd.f32 %v2703_v5, %v2039_v17 }
 0x7bd   :  { %2704 = vmatmul.msk.f32.vlgmr.msra.gmra.mxu1 %vm95_vm14, %v3973_v4  ;;  %2706 = vmatmul.msk.f32.vlgmr.msra.gmra.mxu2 %vm95_vm14, %v3973_v4  ;;  %3003 = vtanh.f32 %v2041_v1 }
 0x7be   :  { %2708 = vmatmul.msk.f32.vlgmr.msra.gmra.mxu3 %vm95_vm14, %v3973_v4 }
 0x7c3   :  { %v3004_v45 = vpop.eup %3003 }
 0x7c4   :  { %v2047_v34 = vsub.f32 %v3004_v45, %v3942_v50 }
 0x7c6   :  { %v2049_v10 = vmul.f32 %v2047_v34, %v2045_v9 }
 0x7c8   :  { %v3986_v11 = vadd.f32 %v2049_v10, %v3942_v50 }
 0x7ca   :  { %2705 = vmatmul.msk.f32.gmra.mxu1 %vm95_vm14, %v3986_v11  ;;  %2707 = vmatmul.msk.f32.gmra.mxu2 %vm95_vm14, %v3986_v11 }
 0x7cb   :  { %2709 = vmatmul.msk.f32.gmra.mxu3 %vm95_vm14, %v3986_v11 }
 0x83a   :  { %v2075_v42 = vpop.f32.mrf.mxu1 }
 0x83b   :  { %v2076_v14 = vadd.f32 %v3904_v27, %v2075_v42 }
 0x83d   :  { %v2130_v7 = vadd.f32 %v2710_v12, %v2076_v14 }
 0x83f   :  { %v2712_v49 = vmul.f32 -1.442695, %v2130_v7 }
 0x840   :  { %v2098_v50 = vpop.f32.mrf.mxu2 }
 0x841   :  { %3005 = vpow2.f32 %v2712_v49  ;;  %v2099_v31 = vadd.f32 %v3895_v37, %v2098_v50  ;;  %v2121_v16 = vpop.f32.mrf.mxu3  ;;  %v2719_v49 = vld [vmem:[%s4126_s3 + $0xb8] sm:$0xff] }
 0x842   :  { %v2122_v21 = vadd.f32 %v3855_v3, %v2121_v16 }
 0x843   :  { %v2173_v41 = vadd.f32 %v2714_v20, %v2099_v31 }
 0x845   :  { %v2716_v24 = vmul.f32 -1.442695, %v2173_v41 }
 0x847   :  { %v3006_v8 = vpop.eup %3005  ;;  %3007 = vpow2.f32 %v2716_v24  ;;  %v2078_v28 = vpop.f32.mrf.mxu1 }
 0x848   :  { %v2138_v26 = vadd.f32 1.0, %v3006_v8  ;;  %v2079_v29 = vadd.f32 %v3904_v27, %v2078_v28 }
 0x84a   :  { %3009 = vrcp.f32 %v2138_v26  ;;  %v2131_v30 = vadd.f32 %v2711_v54, %v2079_v29  ;;  %v2151_v47 = vand.u32 2147483648, %v2138_v26  ;;  %vm2145_vm12 = vweird.f32 %v2138_v26 }
 0x84c   :  { %v2713_v33 = vmul.f32 -1.442695, %v2131_v30  ;;  %v2152_v13 = vor.u32 1.1754944e-38, %v2151_v47 }
 0x84d   :  { %v3008_v32 = vpop.eup %3007  ;;  %v2101_v38 = vpop.f32.mrf.mxu2 }
 0x84e   :  { %v2102_v40 = vadd.f32 %v3895_v37, %v2101_v38  ;;  %v4010_v58 = vadd.f32 1.0, %v3008_v32  ;;  %3011 = vpow2.f32 %v2713_v33  ;;  %v2149_v37 = vand.u32 2147483647, %v2138_v26  ;;  %v2124_v62 = vpop.f32.mrf.mxu3 }
 0x84f   :  { %v2125_v10 = vadd.f32 %v3855_v3, %v2124_v62 }
 0x850   :  { %v3010_v35 = vpop.eup %3009  ;;  %v2174_v44 = vadd.f32 %v2715_v39, %v2102_v40  ;;  %3013 = vrcp.f32 %v4010_v58  ;;  %vm2150_vm15 = vcmp.eq.f32.partialorder %v2149_v37, 8.507059e+37  ;;  %v2194_v50 = vand.u32 2147483648, %v4010_v58  ;;  %v2781_v37 = vld [vmem:[%s4104_s13] ss:$0 sm:$0xff] }
 0x851   :  { %v2141_v36 = vmul.f32 %v3010_v35, %v2138_v26  ;;  %vm2146_vm11 = vweird.f32 %v3010_v35  ;;  %vm2188_vm5 = vweird.f32 %v4010_v58  ;;  %v2192_v31 = vand.u32 2147483647, %v4010_v58 }
 0x852   :  { %v2717_v63 = vmul.f32 -1.442695, %v2174_v44  ;;  %vm2147_vm13 = vmor %vm2145_vm12, %vm2146_vm11  ;;  %v2195_v54 = vor.u32 1.1754944e-38, %v2194_v50 }
 0x853   :  { %v2142_v43 = vsub.f32 1.0, %v2141_v36  ;;  %vm2193_vm10 = vcmp.eq.f32.partialorder %v2192_v31, 8.507059e+37 }
 0x854   :  { %3015 = vpow2.f32 %v2717_v63  ;;  %v3012_v27 = vpop.eup %3011 }
 0x855   :  { %v2143_v56 = vmul.f32 %v3010_v35, %v2142_v43  ;;  %v2139_v48 = vadd.f32 1.0, %v3012_v27 }
 0x856   :  { %v3014_v51 = vpop.eup %3013 }
 0x857   :  { %v2144_v46 = vadd.f32 %v3010_v35, %v2143_v56  ;;  %3017 = vrcp.f32 %v2139_v48  ;;  %v2184_v18 = vmul.f32 %v3014_v51, %v4010_v58  ;;  %v2166_v17 = vand.u32 2147483648, %v2139_v48 }
 0x858   :  { %v2164_v59 = vand.u32 2147483647, %v2139_v48  ;;  %vm2160_vm1 = vweird.f32 %v2139_v48  ;;  %vm2189_vm4 = vweird.f32 %v3014_v51 }
 0x859   :  { %v2148_v52 = vsel %vm2147_vm13, %v3010_v35, %v2144_v46  ;;  %v2185_v2 = vsub.f32 1.0, %v2184_v18  ;;  %v2167_v34 = vor.u32 1.1754944e-38, %v2166_v17  ;;  %vm2190_vm7 = vmor %vm2188_vm5, %vm2189_vm4  ;;  %v2782_v17 = vld [vmem:[%s4106_s15] ss:$0 sm:$0xff] }
 0x85a   :  { %v3016_v53 = vpop.eup %3015  ;;  %v2153_v19 = vsel %vm2150_vm15, %v2152_v13, %v2148_v52  ;;  %vm2165_vm3 = vcmp.eq.f32.partialorder %v2164_v59, 8.507059e+37  ;;  %v2288_v52 = vstv %s2285_s2  ;;  %vm2311_vm15 = vcmask 261120   ;;  %s3109_s2 = smov 8  }
 0x85b   :  { %v2182_v0 = vadd.f32 1.0, %v3016_v53  ;;  %v2216_v23 = vmul.f32 %v2153_v19, %v2122_v21  ;;  %v2186_v60 = vmul.f32 %v3014_v51, %v2185_v2  ;;  %v2769_v2 = vld [vmem:[%s4107_s16 + $0x8] sm:$0xff] }
 0x85c   :  { %2382 = vmatpush.bf16.msra.mxu0 %v2769_v2 }
 0x85d   :  { %3019 = vrcp.f32 %v2182_v0  ;;  %v3018_v22 = vpop.eup %3017  ;;  %v2218_v57 = vadd.f32 %v2718_v15, %v2216_v23  ;;  %v2187_v12 = vadd.f32 %v3014_v51, %v2186_v60  ;;  %v2209_v3 = vand.u32 2147483648, %v2182_v0  ;;  %v2768_v15 = vld [vmem:[%s4107_s16] sm:$0xff] }
 0x85e   :  { %v2156_v6 = vmul.f32 %v3018_v22, %v2139_v48  ;;  %vm2161_vm0 = vweird.f32 %v3018_v22  ;;  %vm2203_vm8 = vweird.f32 %v2182_v0  ;;  %v2207_v26 = vand.u32 2147483647, %v2182_v0  ;;  %v4036_v48 = vld [vmem:[%s4135_s22] sm:$0xff] }
 0x85f   :  { %vm2162_vm2 = vmor %vm2160_vm1, %vm2161_vm0  ;;  %3021 = vtanh.f32 %v2218_v57  ;;  %v2191_v8 = vsel %vm2190_vm7, %v3014_v51, %v2187_v12  ;;  %v2210_v32 = vor.u32 1.1754944e-38, %v2209_v3  ;;  %v2350_v57 = vstv %s2740_s10  ;;  %v2771_v12 = vld [vmem:[%s4109_s18 + $0x8] sm:$0xff] }
 0x860   :  { %v2157_v5 = vsub.f32 1.0, %v2156_v6  ;;  %v2196_v30 = vsel %vm2193_vm10, %v2195_v54, %v2191_v8  ;;  %vm2208_vm11 = vcmp.eq.f32.partialorder %v2207_v26, 8.507059e+37  ;;  %2383 = vmatpush.bf16.msra.mxu0 %v2768_v15 }
 0x861   :  { %v2222_v33 = vsub.f32 1.0, %v2196_v30 }
 0x862   :  { %v2158_v1 = vmul.f32 %v3018_v22, %v2157_v5 }
 0x863   :  { %v3020_v55 = vpop.eup %3019 }
 0x864   :  { %v2199_v25 = vmul.f32 %v3020_v55, %v2182_v0  ;;  %v2159_v45 = vadd.f32 %v3018_v22, %v2158_v1  ;;  %vm2204_vm6 = vweird.f32 %v3020_v55 }
 0x865   :  { %v3022_v28 = vpop.eup %3021  ;;  %vm2205_vm9 = vmor %vm2203_vm8, %vm2204_vm6  ;;  %vm2503_vm6 = vcmask 254976  }
 0x866   :  { %v2200_v9 = vsub.f32 1.0, %v2199_v25  ;;  %v2163_v42 = vsel %vm2162_vm2, %v3018_v22, %v2159_v45  ;;  %v2224_v35 = vsub.f32 %v3022_v28, %v3973_v4 }
 0x867   :  { %v2168_v7 = vsel %vm2165_vm3, %v2167_v34, %v2163_v42 }
 0x868   :  { %v2201_v14 = vmul.f32 %v3020_v55, %v2200_v9  ;;  %v2217_v20 = vmul.f32 %v2168_v7, %v2125_v10  ;;  %v2226_v39 = vmul.f32 %v2224_v35, %v2222_v33 }
 0x86a   :  { %v2202_v41 = vadd.f32 %v3020_v55, %v2201_v14  ;;  %v2219_v24 = vadd.f32 %v2719_v49, %v2217_v20  ;;  %v2228_v44 = vadd.f32 %v2226_v39, %v3973_v4  ;;  %v2767_v4 = vld [vmem:[%s4105_s14 + $0x8] sm:$0xff]  ;;  %v2770_v14 = vld [vmem:[%s4109_s18] sm:$0xff]  ;;  %v2411_v20 = vstv %s2751_s7 }
 0x86b   :  { %2321 = vmatpush.bf16.msrb.mxu2 %v2767_v4  ;;  %v2783_v49 = vld [vmem:[%s4108_s17] ss:$0 sm:$0xff]  ;;  %s2762_s17 = sld [smem:[#allocation2 + $0x3]] }
 0x86c   :  { %3023 = vtanh.f32 %v2219_v24  ;;  %v2206_v29 = vsel %vm2205_vm9, %v3020_v55, %v2202_v41 }
 0x86d   :  { %v2211_v36 = vsel %vm2208_vm11, %v2210_v32, %v2206_v29  ;;  %v2784_v32 = vld [vmem:[%s4110_s19] ss:$0 sm:$0xff]  ;;  %s3107_s19 = smov [#allocation5]  }
 0x86e   :  { %v2223_v40 = vsub.f32 1.0, %v2211_v36  ;;  %s2509_s22 = sshll.u32 %s3107_s19, 4  ;;  %s2510_s22 = int_to_ptr.vmem [resolvable:$true] %s2509_s22 }
 0x871   :  { %v2472_v36 = vstv %s2762_s17 }
 0x872   :  { %v3024_v38 = vpop.eup %3023 }
 0x873   :  { %v2225_v58 = vsub.f32 %v3024_v38, %v3986_v11 }
 0x875   :  { %v2227_v43 = vmul.f32 %v2225_v58, %v2223_v40 }
 0x877   :  { %v2229_v56 = vadd.f32 %v2227_v43, %v3986_v11  ;;  %v2766_v11 = vld [vmem:[%s4105_s14] sm:$0xff] }
 0x878   :  { %2322 = vmatpush.bf16.msrb.mxu2 %v2766_v11 }
 0x879   :  { %v2235_v63 = vpack.c.bf16 %v2229_v56, %v2228_v44  ;;  %v2479_v56 = vld [vmem:[%s4136_s5] sm:$0x3] }
 0x87b   :  { %2724 = vmatmul.msk.bf16.vlgmr.msrb.gmra.mxu0 %vm95_vm14, %v2235_v63 }
 0x87c   :  { %2443 = vmatpush.bf16.msra.mxu2 %v2771_v12 }
 0x880   :  { %2444 = vmatpush.bf16.msra.mxu2 %v2770_v14 }
 0x8f8   :  { %v2254_v27 = vpop.f32.mrf.mxu0 }
 0x900   :  { %v2256_v46 = vpop.f32.mrf.mxu0 }
 0x901   :  { %v2259_v47 = vpack.c.bf16 %v2256_v46, %v2254_v27 }
 0x903   :  { %2278 = vmatpush.bf16.msrb.mxu1 %v2259_v47 }
 0x906   :  { %2729 = vmatmul.msk.bf16.vlgmr.msrb.gmra.mxu1 %vm95_vm14, %v4036_v48 }
 0x983   :  { %v2280_v61 = vpop.f32.mrf.mxu1 }
 0x984   :  { %v2281_v51 = vadd.f32 %v2781_v37, %v2280_v61 }
 0x986   :  { %v2289_v16 = vmul.f32 %v2288_v52, %v2281_v51  ;;  %vm2286_vm12 = vcmp.ge.f32.partialorder %v2281_v51, 0.0 }
 0x988   :  { %v2291_v18 = vsel %vm2286_vm12, %v2281_v51, %v2289_v16 }
 0x98b   :  { %v2282_v53 = vpop.f32.mrf.mxu1 }
 0x98c   :  { %v2283_v13 = vadd.f32 %v2781_v37, %v2282_v53 }
 0x98e   :  { %vm2287_vm13 = vcmp.ge.f32.partialorder %v2283_v13, 0.0  ;;  %v2290_v0 = vmul.f32 %v2288_v52, %v2283_v13 }
 0x990   :  { %v2292_v19 = vsel %vm2287_vm13, %v2283_v13, %v2290_v0 }
 0x991   :  { %v2298_v21 = vpack.c.bf16 %v2292_v19, %v2291_v18 }
 0x993   :  { %2738 = vmatmul.msk.bf16.vlgmr.msrb.gmra.mxu2 %vm2311_vm15, %v2298_v21 }
 0xa16   :  { %v2324_v22 = vpop.f32.mrf.mxu2 }
 0xa1e   :  { %v2326_v23 = vpop.f32.mrf.mxu2 }
 0xa1f   :  { %v2329_v6 = vpack.c.bf16 %v2326_v23, %v2324_v22 }
 0xa21   :  { %2340 = vmatpush.bf16.msrb.mxu3 %v2329_v6 }
 0xa24   :  { %2739 = vmatmul.msk.bf16.vlgmr.msrb.gmra.mxu3 %vm95_vm14, %v4036_v48 }
 0xaa7   :  { %v2342_v5 = vpop.f32.mrf.mxu3 }
 0xaa8   :  { %v2343_v55 = vadd.f32 %v2782_v17, %v2342_v5 }
 0xaaa   :  { %v2351_v59 = vmul.f32 %v2350_v57, %v2343_v55  ;;  %vm2348_vm0 = vcmp.ge.f32.partialorder %v2343_v55, 0.0 }
 0xaac   :  { %v2353_v62 = vsel %vm2348_vm0, %v2343_v55, %v2351_v59 }
 0xaaf   :  { %v2344_v1 = vpop.f32.mrf.mxu3 }
 0xab0   :  { %v2345_v60 = vadd.f32 %v2782_v17, %v2344_v1 }
 0xab2   :  { %vm2349_vm1 = vcmp.ge.f32.partialorder %v2345_v60, 0.0  ;;  %v2352_v25 = vmul.f32 %v2350_v57, %v2345_v60 }
 0xab4   :  { %v2354_v45 = vsel %vm2349_vm1, %v2345_v60, %v2352_v25 }
 0xab5   :  { %v2360_v9 = vpack.c.bf16 %v2354_v45, %v2353_v62 }
 0xab7   :  { %2749 = vmatmul.msk.bf16.vlgmr.msra.gmra.mxu0 %vm2311_vm15, %v2360_v9 }
 0xb34   :  { %v2385_v34 = vpop.f32.mrf.mxu0 }
 0xb3c   :  { %v2387_v10 = vpop.f32.mrf.mxu0 }
 0xb3d   :  { %v2390_v42 = vpack.c.bf16 %v2387_v10, %v2385_v34 }
 0xb3f   :  { %2401 = vmatpush.bf16.msra.mxu1 %v2390_v42 }
 0xb42   :  { %2750 = vmatmul.msk.bf16.vlgmr.msra.gmra.mxu1 %vm95_vm14, %v4036_v48 }
 0xbbf   :  { %v2403_v7 = vpop.f32.mrf.mxu1 }
 0xbc0   :  { %v2404_v50 = vadd.f32 %v2783_v49, %v2403_v7 }
 0xbc2   :  { %v2412_v41 = vmul.f32 %v2411_v20, %v2404_v50  ;;  %vm2409_vm2 = vcmp.ge.f32.partialorder %v2404_v50, 0.0 }
 0xbc4   :  { %v2414_v8 = vsel %vm2409_vm2, %v2404_v50, %v2412_v41 }
 0xbc7   :  { %v2405_v31 = vpop.f32.mrf.mxu1 }
 0xbc8   :  { %v2406_v3 = vadd.f32 %v2783_v49, %v2405_v31 }
 0xbca   :  { %vm2410_vm3 = vcmp.ge.f32.partialorder %v2406_v3, 0.0  ;;  %v2413_v24 = vmul.f32 %v2411_v20, %v2406_v3 }
 0xbcc   :  { %v2415_v26 = vsel %vm2410_vm3, %v2406_v3, %v2413_v24 }
 0xbcd   :  { %v2421_v28 = vpack.c.bf16 %v2415_v26, %v2414_v8 }
 0xbcf   :  { %2760 = vmatmul.msk.bf16.vlgmr.msra.gmra.mxu2 %vm2311_vm15, %v2421_v28 }
 0xc52   :  { %v2446_v54 = vpop.f32.mrf.mxu2 }
 0xc5a   :  { %v2448_v29 = vpop.f32.mrf.mxu2 }
 0xc5b   :  { %v2451_v30 = vpack.c.bf16 %v2448_v29, %v2446_v54 }
 0xc5d   :  { %2462 = vmatpush.bf16.msra.mxu3 %v2451_v30 }
 0xc60   :  { %2761 = vmatmul.msk.bf16.vlgmr.msra.gmra.mxu3 %vm95_vm14, %v4036_v48 }
 0xce3   :  { %v2464_v35 = vpop.f32.mrf.mxu3 }
 0xce4   :  { %v2465_v33 = vadd.f32 %v2784_v32, %v2464_v35 }
 0xce6   :  { %v2473_v38 = vmul.f32 %v2472_v36, %v2465_v33  ;;  %vm2470_vm4 = vcmp.ge.f32.partialorder %v2465_v33, 0.0 }
 0xce8   :  { %v2475_v39 = vsel %vm2470_vm4, %v2465_v33, %v2473_v38 }
 0xce9   :  { %2477 = vst.msk [vmem:[#allocation5] sm:$0xff] %vm2311_vm15, %v2475_v39 }
 0xceb   :  { %v2466_v40 = vpop.f32.mrf.mxu3 }
 0xcec   :  { %v2467_v58 = vadd.f32 %v2784_v32, %v2466_v40 }
 0xcee   :  { %vm2471_vm5 = vcmp.ge.f32.partialorder %v2467_v58, 0.0  ;;  %v2474_v43 = vmul.f32 %v2472_v36, %v2467_v58 }
 0xcf0   :  { %v2476_v44 = vsel %vm2471_vm5, %v2467_v58, %v2474_v43 }
 0xcf1   :  { %2478 = vst.msk [vmem:[#allocation5 + $0x8] sm:$0xff] %vm2311_vm15, %v2476_v44  ;;  %2497 = vmatpush.msrb.mxu0 %v2476_v44 }
 0xcf2   :  { %2517 = dma.vmem_to_hbm [thread:$0]  %s2510_s22, 256, %s2512_s24, [#allocation3], %s3108_s9, %s3108_s9, %s3109_s2  }
 0xcf3   :  { %2498 = vmatpush.msrb.mxu0 %v2475_v39 }
 0xcf4   :  { %2763 = vmatmul.msk.f32.vlgmr.msrb.gmra.mxu0 %vm95_vm14, %v2479_v56 }
 0xd71   :  { %v2500_v63 = vpop.f32.mrf.mxu0 }
 0xd72   :  { %2504 = vst.msk [vmem:[#allocation6] sm:$0x3] %vm2503_vm6, %v2500_v63 }
 0xd73   :  { %2528 = dma.vmem_to_hbm [thread:$0]  %s2524_s25, 32, %s2526_s26, [#allocation7]  }
 0xd74   :  { %3101 = dma.done.wait [#allocation3], 256  }
 0xd75   :  { %3102 = vsyncadd [#allocation3], 4294967040 }
 0xd76   :  { %3103 = dma.done.wait [#allocation7], 32  }
 0xd77   :  { %3104 = vsyncadd [#allocation7], 4294967264 }
 0xd78   :  { %2537 = vsyncpa [#allocation3], 1 }
 0xd79   :  { %2538 = vsyncpa [#allocation7], 1 }
 0xd7a   :  { %2539 = vsyncpa [#allocation4], 1 }

</bundles_post_ra>
